<compile_context>
chip_gen: v6e
topology: v6e:2x2x1
jax: 0.10.0
libtpu: 0.0.40
codegen_flags: <defaults>
</compile_context>

<pallas_src>
from functools import partial

import jax
import jax.numpy as jnp
from jax.experimental import pallas as pl
from jax.experimental.pallas import tpu as pltpu

# ------------- small synthetic config (same structure as SiglipVisionConfig)
HIDDEN = 64          # hidden_size
INTER = 128          # intermediate_size
NUM_LAYERS = 2       # num_hidden_layers
NUM_HEADS = 4        # num_attention_heads
NUM_CHANNELS = 3     # num_channel
IMAGE_SIZE = 32      # image_size
PATCH_SIZE = 8       # patch_size
EPS = 1e-6           # layer_norm_eps
HEAD_DIM = HIDDEN // NUM_HEADS
SCALE = HEAD_DIM ** -0.5
NUM_PATCHES = (IMAGE_SIZE // PATCH_SIZE) ** 2          # 16 tokens
PATCH_DIM = NUM_CHANNELS * PATCH_SIZE * PATCH_SIZE     # 192 (C * p * p)
BATCH = 2
# TODO(synk): attention_dropout (p=0.0 / inference) is a no-op and is omitted.


# ---------------------------------------------------------------- math helpers
def _layernorm(x, g, b, eps):
    mu = jnp.mean(x, axis=-1, keepdims=True)
    var = jnp.mean((x - mu) ** 2, axis=-1, keepdims=True)
    return (x - mu) * jax.lax.rsqrt(var + eps) * g + b


def _gelu_tanh(x):
    # gelu(approximate='tanh')
    c = 0.7978845608028654  # sqrt(2/pi)
    return 0.5 * x * (1.0 + jnp.tanh(c * (x + 0.044715 * x * x * x)))


# ---------------------------------------------------------------- fused kernel
def siglip_fused_kernel(patches_ref, w_patch_ref, pos_ref,
                        ln1_g_ref, ln1_b_ref,
                        w_qkv_ref, b_qkv_ref, wo_ref, bo_ref,
                        ln2_g_ref, ln2_b_ref,
                        w1_ref, b1_ref, w2_ref, b2_ref,
                        post_g_ref, post_b_ref,
                        out_ref,
                        *, num_layers, num_heads, head_dim, eps):
    BB, N, K = patches_ref.shape          # images in this grid step, tokens, C*p*p
    D = w_patch_ref.shape[1]              # hidden
    T = BB * N                            # all tokens of this step stacked as rows

    # ---- patch embedding: extracted patches @ flattened conv weight
    p = patches_ref[...].reshape(T, K).astype(jnp.bfloat16)
    x = jnp.dot(p, w_patch_ref[...], preferred_element_type=jnp.float32)   # (T, D)
    # positional embedding (conv bias pre-folded in), broadcast over images
    x = (x.reshape(BB, N, D) + pos_ref[...]).reshape(T, D)

    # Static unrolled layer loop (tiny L, all weights resident in VMEM).
    # TODO(synk): at real SigLIP scale (27 layers, hidden 1152) this must become
    # an "arbitrary" layer grid axis streaming per-layer weight blocks (v7x VMEM).
    for l in range(num_layers):
        # ---- LayerNorm1 + fused QKV projection (scale pre-folded into Wq/bq)
        h = _layernorm(x, ln1_g_ref[l], ln1_b_ref[l], eps)
        qkv = jnp.dot(h.astype(jnp.bfloat16), w_qkv_ref[l],
                      preferred_element_type=jnp.float32) + b_qkv_ref[l]
        qkv = qkv.astype(jnp.bfloat16).reshape(BB, N, 3 * D)      # (BB, N, 3D)

        # ---- multi-head attention via static lane slices (no relayouts)
        attn = jnp.zeros((T, D), jnp.float32)
        for hh in range(num_heads):
            q = qkv[:, :, hh * head_dim:(hh + 1) * head_dim]              # (BB,N,hd)
            k = qkv[:, :, D + hh * head_dim:D + (hh + 1) * head_dim]
            v = qkv[:, :, 2 * D + hh * head_dim:2 * D + (hh + 1) * head_dim]

            s = jnp.einsum('bqd,bkd->bqk', q, k,
                           preferred_element_type=jnp.float32)            # (BB,N,N)
            s = s - jnp.max(s, axis=-1, keepdims=True)
            e = jnp.exp(s)
            denom = jnp.sum(e, axis=-1, keepdims=True)

            o = jnp.einsum('bqk,bkd->bqd', e.astype(jnp.bfloat16), v,
                           preferred_element_type=jnp.float32)            # (BB,N,hd)
            # fold softmax normalisation into the output (EUP reciprocal)
            o = o * pl.reciprocal(denom, approx=True)

            # head merge + out-projection fused: attn = sum_h o_h @ Wo[h]
            attn = attn + jnp.dot(
                o.reshape(T, head_dim).astype(jnp.bfloat16), wo_ref[l, hh],
                preferred_element_type=jnp.float32)
        x = x + attn + bo_ref[l]

        # ---- LayerNorm2 + MLP (tanh GELU) + residual
        h2 = _layernorm(x, ln2_g_ref[l], ln2_b_ref[l], eps)
        m = jnp.dot(h2.astype(jnp.bfloat16), w1_ref[l],
                    preferred_element_type=jnp.float32) + b1_ref[l]
        m = _gelu_tanh(m)
        m = jnp.dot(m.astype(jnp.bfloat16), w2_ref[l],
                    preferred_element_type=jnp.float32) + b2_ref[l]
        x = x + m

    # ---- post LayerNorm
    y = _layernorm(x, post_g_ref[...], post_b_ref[...], eps)
    out_ref[...] = y.reshape(BB, N, D).astype(out_ref.dtype)


# ------------------------------------------------------------- pallas wrapper
def _wspec(arr):
    # Whole-array weight block, constant block index across the grid.
    # NOTE: default batch_block=B gives a single grid step, so weight
    # double-buffering is a non-issue; with >1 grid steps these constant-index
    # blocks would be marked pipeline_mode=pl.Buffered(1) to halve weight VMEM.
    nd = arr.ndim
    return pl.BlockSpec(arr.shape, lambda g, _n=nd: (0,) * _n)


def siglip_vision_forward(pixel_values, fused, *, batch_block=None):
    # pixel_values: (B, C, H, W) NCHW, same as the PyTorch module
    B, C, H, W = pixel_values.shape
    ps = PATCH_SIZE
    gh, gw = H // ps, W // ps
    N, K, D = gh * gw, C * ps * ps, HIDDEN

    # Non-overlapping patch extraction; each patch flattened in (C, p, p)
    # row-major order to match torch Conv2d weight.reshape(D, -1).T ordering.
    xp = pixel_values.reshape(B, C, gh, ps, gw, ps).transpose(0, 2, 4, 1, 3, 5)
    patches = xp.reshape(B, N, K)

    if batch_block is None:
        batch_block = B        # single grid step: best on single-TC v5e / v6e
    assert B % batch_block == 0
    grid = (B // batch_block,)  # on v7x, pass batch_block=B//2 -> 2-way parallel

    weight_args = (fused["w_patch"], fused["pos"],
                   fused["ln1_g"], fused["ln1_b"],
                   fused["w_qkv"], fused["b_qkv"], fused["wo"], fused["bo"],
                   fused["ln2_g"], fused["ln2_b"],
                   fused["w1"], fused["b1"], fused["w2"], fused["b2"],
                   fused["post_g"], fused["post_b"])

    kern = partial(siglip_fused_kernel, num_layers=NUM_LAYERS,
                   num_heads=NUM_HEADS, head_dim=HEAD_DIM, eps=EPS)

    in_specs = [pl.BlockSpec((batch_block, N, K), lambda g: (g, 0, 0))]
    in_specs += [_wspec(w) for w in weight_args]

    return pl.pallas_call(
        kern,
        out_shape=jax.ShapeDtypeStruct((B, N, D), jnp.float32),
        grid=grid,
        in_specs=in_specs,
        out_specs=pl.BlockSpec((batch_block, N, D), lambda g: (g, 0, 0)),
        compiler_params=pltpu.CompilerParams(
            dimension_semantics=("parallel",)),
    )(patches, *weight_args)


# ------------------------------------------------------------- parameters
def init_params(key):
    """Module-style parameters (separate q/k/v/out, conv bias, pos emb), f32."""
    def nxt():
        nonlocal key
        key, sub = jax.random.split(key)
        return sub

    def mat(shape):
        return jax.random.normal(nxt(), shape, jnp.float32) * 0.02

    def gamma(shape):
        return jnp.ones(shape, jnp.float32) + mat(shape)

    L, Dh, Di = NUM_LAYERS, HIDDEN, INTER
    p = {}
    # patch_embedding: torch Conv2d weight (D,C,p,p).reshape(D,-1).T -> (K, D)
    p["w_patch"] = mat((PATCH_DIM, Dh))
    p["b_patch"] = mat((1, Dh))
    p["pos_emb"] = mat((NUM_PATCHES, Dh))
    p["ln1_g"] = gamma((L, 1, Dh)); p["ln1_b"] = mat((L, 1, Dh))
    p["wq"] = mat((L, Dh, Dh)); p["bq"] = mat((L, 1, Dh))
    p["wk"] = mat((L, Dh, Dh)); p["bk"] = mat((L, 1, Dh))
    p["wv"] = mat((L, Dh, Dh)); p["bv"] = mat((L, 1, Dh))
    p["wo"] = mat((L, Dh, Dh)); p["bo"] = mat((L, 1, Dh))
    p["ln2_g"] = gamma((L, 1, Dh)); p["ln2_b"] = mat((L, 1, Dh))
    p["w1"] = mat((L, Dh, Di)); p["b1"] = mat((L, 1, Di))
    p["w2"] = mat((L, Di, Dh)); p["b2"] = mat((L, 1, Dh))
    p["post_g"] = gamma((1, Dh)); p["post_b"] = mat((1, Dh))
    return p


def prepare_params(p):
    """One-time weight transforms (perf review): fuse QKV, fold attention scale
    into Wq/bq, fold the patch-embed bias into the positional embedding,
    pre-split the out-projection per head, cast matmul weights to bf16."""
    bf16 = jnp.bfloat16
    f = {}
    f["w_patch"] = p["w_patch"].astype(bf16)
    f["pos"] = p["pos_emb"] + p["b_patch"]                              # (N, D)
    f["ln1_g"], f["ln1_b"] = p["ln1_g"], p["ln1_b"]
    f["w_qkv"] = jnp.concatenate(
        [p["wq"] * SCALE, p["wk"], p["wv"]], axis=-1).astype(bf16)      # (L,D,3D)
    f["b_qkv"] = jnp.concatenate(
        [p["bq"] * SCALE, p["bk"], p["bv"]], axis=-1)                   # (L,1,3D)
    f["wo"] = p["wo"].reshape(
        NUM_LAYERS, NUM_HEADS, HEAD_DIM, HIDDEN).astype(bf16)           # (L,H,hd,D)
    f["bo"] = p["bo"]
    f["ln2_g"], f["ln2_b"] = p["ln2_g"], p["ln2_b"]
    f["w1"] = p["w1"].astype(bf16); f["b1"] = p["b1"]
    f["w2"] = p["w2"].astype(bf16); f["b2"] = p["b2"]
    f["post_g"], f["post_b"] = p["post_g"], p["post_b"]
    return f


# ------------------------------------------------------------- main
if __name__ == "__main__":
    key = jax.random.PRNGKey(0)
    key, pk = jax.random.split(key)
    params = prepare_params(init_params(key))

    # pixel_values in NCHW, same as the PyTorch module expects
    pixel_values = jax.random.normal(
        pk, (BATCH, NUM_CHANNELS, IMAGE_SIZE, IMAGE_SIZE), jnp.float32)

    out = siglip_vision_forward(pixel_values, params)
    out = jax.block_until_ready(out)

    assert out.shape == (BATCH, NUM_PATCHES, HIDDEN), out.shape
    assert bool(jnp.all(jnp.isfinite(out)))
    print("KERNEL_OK")
</pallas_src>

<mosaic_0001>
module attributes {stable_mosaic.version = 11 : i64} {
  func.func @siglip_fused_kernel(%arg0: i32, %arg1: memref<2x16x192xf32, #tpu.memory_space<vmem>>, %arg2: memref<192x64xbf16, #tpu.memory_space<vmem>>, %arg3: memref<16x64xf32, #tpu.memory_space<vmem>>, %arg4: memref<2x1x64xf32, #tpu.memory_space<vmem>>, %arg5: memref<2x1x64xf32, #tpu.memory_space<vmem>>, %arg6: memref<2x64x192xbf16, #tpu.memory_space<vmem>>, %arg7: memref<2x1x192xf32, #tpu.memory_space<vmem>>, %arg8: memref<2x4x16x64xbf16, #tpu.memory_space<vmem>>, %arg9: memref<2x1x64xf32, #tpu.memory_space<vmem>>, %arg10: memref<2x1x64xf32, #tpu.memory_space<vmem>>, %arg11: memref<2x1x64xf32, #tpu.memory_space<vmem>>, %arg12: memref<2x64x128xbf16, #tpu.memory_space<vmem>>, %arg13: memref<2x1x128xf32, #tpu.memory_space<vmem>>, %arg14: memref<2x128x64xbf16, #tpu.memory_space<vmem>>, %arg15: memref<2x1x64xf32, #tpu.memory_space<vmem>>, %arg16: memref<1x64xf32, #tpu.memory_space<vmem>>, %arg17: memref<1x64xf32, #tpu.memory_space<vmem>>, %arg18: memref<2x16x64xf32, #tpu.memory_space<vmem>>) attributes {dimension_semantics = [#tpu.dimension_semantics<parallel>], iteration_bounds = array<i64: 1>, scalar_prefetch = 0 : i64, scratch_operands = 0 : i64, tpu.core_type = #tpu.core_type<tc>, window_params = [{transform_indices = @transform_0, window_bounds = array<i64: 2, 16, 192>}, {pipeline_mode = #tpu.pipeline_mode<synchronous>, transform_indices = @transform_1, window_bounds = array<i64: 192, 64>}, {pipeline_mode = #tpu.pipeline_mode<synchronous>, transform_indices = @transform_2, window_bounds = array<i64: 16, 64>}, {pipeline_mode = #tpu.pipeline_mode<synchronous>, transform_indices = @transform_3, window_bounds = array<i64: 2, 1, 64>}, {pipeline_mode = #tpu.pipeline_mode<synchronous>, transform_indices = @transform_4, window_bounds = array<i64: 2, 1, 64>}, {pipeline_mode = #tpu.pipeline_mode<synchronous>, transform_indices = @transform_5, window_bounds = array<i64: 2, 64, 192>}, {pipeline_mode = #tpu.pipeline_mode<synchronous>, transform_indices = @transform_6, window_bounds = array<i64: 2, 1, 192>}, {pipeline_mode = #tpu.pipeline_mode<synchronous>, transform_indices = @transform_7, window_bounds = array<i64: 2, 4, 16, 64>}, {pipeline_mode = #tpu.pipeline_mode<synchronous>, transform_indices = @transform_8, window_bounds = array<i64: 2, 1, 64>}, {pipeline_mode = #tpu.pipeline_mode<synchronous>, transform_indices = @transform_9, window_bounds = array<i64: 2, 1, 64>}, {pipeline_mode = #tpu.pipeline_mode<synchronous>, transform_indices = @transform_10, window_bounds = array<i64: 2, 1, 64>}, {pipeline_mode = #tpu.pipeline_mode<synchronous>, transform_indices = @transform_11, window_bounds = array<i64: 2, 64, 128>}, {pipeline_mode = #tpu.pipeline_mode<synchronous>, transform_indices = @transform_12, window_bounds = array<i64: 2, 1, 128>}, {pipeline_mode = #tpu.pipeline_mode<synchronous>, transform_indices = @transform_13, window_bounds = array<i64: 2, 128, 64>}, {pipeline_mode = #tpu.pipeline_mode<synchronous>, transform_indices = @transform_14, window_bounds = array<i64: 2, 1, 64>}, {pipeline_mode = #tpu.pipeline_mode<synchronous>, transform_indices = @transform_15, window_bounds = array<i64: 1, 64>}, {pipeline_mode = #tpu.pipeline_mode<synchronous>, transform_indices = @transform_16, window_bounds = array<i64: 1, 64>}, {transform_indices = @transform_17, window_bounds = array<i64: 2, 16, 64>}]} {
    %c0 = arith.constant 0 : index
    %c0_0 = arith.constant 0 : index
    %c0_1 = arith.constant 0 : index
    %0 = vector.load %arg1[%c0, %c0_0, %c0_1] : memref<2x16x192xf32, #tpu.memory_space<vmem>>, vector<2x16x192xf32>
    %1 = vector.shape_cast %0 : vector<2x16x192xf32> to vector<32x192xf32>
    %2 = arith.truncf %1 : vector<32x192xf32> to vector<32x192xbf16>
    %c0_2 = arith.constant 0 : index
    %c0_3 = arith.constant 0 : index
    %3 = vector.load %arg2[%c0_2, %c0_3] : memref<192x64xbf16, #tpu.memory_space<vmem>>, vector<192x64xbf16>
    %cst = arith.constant dense<0.000000e+00> : vector<32x64xf32>
    %4 = tpu.matmul %2, %3, %cst {dimension_numbers = #tpu.dot_dimension_numbers<[1], [0], [0], [1], [0, 0, 1, 1], [], []>} : vector<32x192xbf16>, vector<192x64xbf16>, vector<32x64xf32> -> vector<32x64xf32>
    %5 = vector.shape_cast %4 : vector<32x64xf32> to vector<2x16x64xf32>
    %c0_4 = arith.constant 0 : index
    %c0_5 = arith.constant 0 : index
    %6 = vector.load %arg3[%c0_4, %c0_5] : memref<16x64xf32, #tpu.memory_space<vmem>>, vector<16x64xf32>
    %7 = vector.shape_cast %6 : vector<16x64xf32> to vector<1x16x64xf32>
    %8 = vector.broadcast %7 : vector<1x16x64xf32> to vector<2x16x64xf32>
    %9 = arith.addf %5, %8 : vector<2x16x64xf32>
    %10 = vector.shape_cast %9 : vector<2x16x64xf32> to vector<32x64xf32>
    %c0_6 = arith.constant 0 : index
    %c0_7 = arith.constant 0 : index
    %c0_8 = arith.constant 0 : index
    %11 = vector.load %arg4[%c0_6, %c0_7, %c0_8] : memref<2x1x64xf32, #tpu.memory_space<vmem>>, vector<1x1x64xf32>
    %12 = vector.shape_cast %11 : vector<1x1x64xf32> to vector<1x64xf32>
    %c0_9 = arith.constant 0 : index
    %c0_10 = arith.constant 0 : index
    %c0_11 = arith.constant 0 : index
    %13 = vector.load %arg5[%c0_9, %c0_10, %c0_11] : memref<2x1x64xf32, #tpu.memory_space<vmem>>, vector<1x1x64xf32>
    %14 = vector.shape_cast %13 : vector<1x1x64xf32> to vector<1x64xf32>
    %cst_12 = arith.constant dense<0.000000e+00> : vector<32xf32>
    %15 = vector.multi_reduction <add>, %10, %cst_12 [1] : vector<32x64xf32> to vector<32xf32>
    %16 = vector.shape_cast %15 : vector<32xf32> to vector<32x1xf32>
    %cst_13 = arith.constant 6.400000e+01 : f32
    %17 = vector.broadcast %cst_13 : f32 to vector<32x1xf32>
    %18 = arith.divf %16, %17 : vector<32x1xf32>
    %19 = vector.broadcast %18 : vector<32x1xf32> to vector<32x64xf32>
    %20 = arith.subf %10, %19 : vector<32x64xf32>
    %21 = arith.mulf %20, %20 : vector<32x64xf32>
    %cst_14 = arith.constant dense<0.000000e+00> : vector<32xf32>
    %22 = vector.multi_reduction <add>, %21, %cst_14 [1] : vector<32x64xf32> to vector<32xf32>
    %23 = vector.shape_cast %22 : vector<32xf32> to vector<32x1xf32>
    %cst_15 = arith.constant 6.400000e+01 : f32
    %24 = vector.broadcast %cst_15 : f32 to vector<32x1xf32>
    %25 = arith.divf %23, %24 : vector<32x1xf32>
    %26 = vector.broadcast %18 : vector<32x1xf32> to vector<32x64xf32>
    %27 = arith.subf %10, %26 : vector<32x64xf32>
    %cst_16 = arith.constant 9.99999997E-7 : f32
    %28 = vector.broadcast %cst_16 : f32 to vector<32x1xf32>
    %29 = arith.addf %25, %28 : vector<32x1xf32>
    %30 = math.rsqrt %29 : vector<32x1xf32>
    %31 = vector.broadcast %30 : vector<32x1xf32> to vector<32x64xf32>
    %32 = arith.mulf %27, %31 : vector<32x64xf32>
    %33 = vector.broadcast %12 : vector<1x64xf32> to vector<32x64xf32>
    %34 = arith.mulf %32, %33 : vector<32x64xf32>
    %35 = vector.broadcast %14 : vector<1x64xf32> to vector<32x64xf32>
    %36 = arith.addf %34, %35 : vector<32x64xf32>
    %37 = arith.truncf %36 : vector<32x64xf32> to vector<32x64xbf16>
    %c0_17 = arith.constant 0 : index
    %c0_18 = arith.constant 0 : index
    %c0_19 = arith.constant 0 : index
    %38 = vector.load %arg6[%c0_17, %c0_18, %c0_19] : memref<2x64x192xbf16, #tpu.memory_space<vmem>>, vector<1x64x192xbf16>
    %39 = vector.shape_cast %38 : vector<1x64x192xbf16> to vector<64x192xbf16>
    %cst_20 = arith.constant dense<0.000000e+00> : vector<32x192xf32>
    %40 = tpu.matmul %37, %39, %cst_20 {dimension_numbers = #tpu.dot_dimension_numbers<[1], [0], [0], [1], [0, 0, 1, 1], [], []>} : vector<32x64xbf16>, vector<64x192xbf16>, vector<32x192xf32> -> vector<32x192xf32>
    %c0_21 = arith.constant 0 : index
    %c0_22 = arith.constant 0 : index
    %c0_23 = arith.constant 0 : index
    %41 = vector.load %arg7[%c0_21, %c0_22, %c0_23] : memref<2x1x192xf32, #tpu.memory_space<vmem>>, vector<1x1x192xf32>
    %42 = vector.shape_cast %41 : vector<1x1x192xf32> to vector<1x192xf32>
    %43 = vector.broadcast %42 : vector<1x192xf32> to vector<32x192xf32>
    %44 = arith.addf %40, %43 : vector<32x192xf32>
    %45 = arith.truncf %44 : vector<32x192xf32> to vector<32x192xbf16>
    %46 = vector.shape_cast %45 : vector<32x192xbf16> to vector<2x16x192xbf16>
    %cst_24 = arith.constant 0.000000e+00 : f32
    %47 = vector.broadcast %cst_24 : f32 to vector<32x64xf32>
    %48 = vector.extract_strided_slice %46 {offsets = [0, 0, 0], sizes = [2, 16, 16], strides = [1, 1, 1]} : vector<2x16x192xbf16> to vector<2x16x16xbf16>
    %49 = vector.extract_strided_slice %46 {offsets = [0, 0, 64], sizes = [2, 16, 16], strides = [1, 1, 1]} : vector<2x16x192xbf16> to vector<2x16x16xbf16>
    %50 = vector.extract_strided_slice %46 {offsets = [0, 0, 128], sizes = [2, 16, 16], strides = [1, 1, 1]} : vector<2x16x192xbf16> to vector<2x16x16xbf16>
    "tpu.trace_start"() <{level = 10 : i32, message = "bqd,bkd->bqk"}> : () -> ()
    %cst_25 = arith.constant dense<0.000000e+00> : vector<2x16x16xf32>
    %51 = tpu.matmul %48, %49, %cst_25 {dimension_numbers = #tpu.dot_dimension_numbers<[2], [2], [1], [1], [0, 0, 0, 1, 1, 1], [0], [0]>} : vector<2x16x16xbf16>, vector<2x16x16xbf16>, vector<2x16x16xf32> -> vector<2x16x16xf32>
    "tpu.trace_stop"() : () -> ()
    %cst_26 = arith.constant dense<0xFF800000> : vector<2x16xf32>
    %52 = vector.multi_reduction <maximumf>, %51, %cst_26 [2] : vector<2x16x16xf32> to vector<2x16xf32>
    %53 = vector.shape_cast %52 : vector<2x16xf32> to vector<2x16x1xf32>
    %54 = vector.broadcast %53 : vector<2x16x1xf32> to vector<2x16x16xf32>
    %55 = arith.subf %51, %54 : vector<2x16x16xf32>
    %56 = math.exp %55 : vector<2x16x16xf32>
    %cst_27 = arith.constant dense<0.000000e+00> : vector<2x16xf32>
    %57 = vector.multi_reduction <add>, %56, %cst_27 [2] : vector<2x16x16xf32> to vector<2x16xf32>
    %58 = vector.shape_cast %57 : vector<2x16xf32> to vector<2x16x1xf32>
    %59 = arith.truncf %56 : vector<2x16x16xf32> to vector<2x16x16xbf16>
    "tpu.trace_start"() <{level = 10 : i32, message = "bqk,bkd->bqd"}> : () -> ()
    %cst_28 = arith.constant dense<0.000000e+00> : vector<2x16x16xf32>
    %60 = tpu.matmul %59, %50, %cst_28 {dimension_numbers = #tpu.dot_dimension_numbers<[2], [1], [1], [2], [0, 0, 0, 1, 1, 2], [0], [0]>} : vector<2x16x16xbf16>, vector<2x16x16xbf16>, vector<2x16x16xf32> -> vector<2x16x16xf32>
    "tpu.trace_stop"() : () -> ()
    %61 = tpu.reciprocal %58 {approx = true} : vector<2x16x1xf32> -> vector<2x16x1xf32>
    %62 = vector.broadcast %61 : vector<2x16x1xf32> to vector<2x16x16xf32>
    %63 = arith.mulf %60, %62 : vector<2x16x16xf32>
    %64 = vector.shape_cast %63 : vector<2x16x16xf32> to vector<32x16xf32>
    %65 = arith.truncf %64 : vector<32x16xf32> to vector<32x16xbf16>
    %c0_29 = arith.constant 0 : index
    %c0_30 = arith.constant 0 : index
    %c0_31 = arith.constant 0 : index
    %c0_32 = arith.constant 0 : index
    %66 = vector.load %arg8[%c0_29, %c0_30, %c0_31, %c0_32] : memref<2x4x16x64xbf16, #tpu.memory_space<vmem>>, vector<1x1x16x64xbf16>
    %67 = vector.shape_cast %66 : vector<1x1x16x64xbf16> to vector<16x64xbf16>
    %cst_33 = arith.constant dense<0.000000e+00> : vector<32x64xf32>
    %68 = tpu.matmul %65, %67, %cst_33 {dimension_numbers = #tpu.dot_dimension_numbers<[1], [0], [0], [1], [0, 0, 1, 1], [], []>} : vector<32x16xbf16>, vector<16x64xbf16>, vector<32x64xf32> -> vector<32x64xf32>
    %69 = arith.addf %47, %68 : vector<32x64xf32>
    %70 = vector.extract_strided_slice %46 {offsets = [0, 0, 16], sizes = [2, 16, 16], strides = [1, 1, 1]} : vector<2x16x192xbf16> to vector<2x16x16xbf16>
    %71 = vector.extract_strided_slice %46 {offsets = [0, 0, 80], sizes = [2, 16, 16], strides = [1, 1, 1]} : vector<2x16x192xbf16> to vector<2x16x16xbf16>
    %72 = vector.extract_strided_slice %46 {offsets = [0, 0, 144], sizes = [2, 16, 16], strides = [1, 1, 1]} : vector<2x16x192xbf16> to vector<2x16x16xbf16>
    "tpu.trace_start"() <{level = 10 : i32, message = "bqd,bkd->bqk"}> : () -> ()
    %cst_34 = arith.constant dense<0.000000e+00> : vector<2x16x16xf32>
    %73 = tpu.matmul %70, %71, %cst_34 {dimension_numbers = #tpu.dot_dimension_numbers<[2], [2], [1], [1], [0, 0, 0, 1, 1, 1], [0], [0]>} : vector<2x16x16xbf16>, vector<2x16x16xbf16>, vector<2x16x16xf32> -> vector<2x16x16xf32>
    "tpu.trace_stop"() : () -> ()
    %cst_35 = arith.constant dense<0xFF800000> : vector<2x16xf32>
    %74 = vector.multi_reduction <maximumf>, %73, %cst_35 [2] : vector<2x16x16xf32> to vector<2x16xf32>
    %75 = vector.shape_cast %74 : vector<2x16xf32> to vector<2x16x1xf32>
    %76 = vector.broadcast %75 : vector<2x16x1xf32> to vector<2x16x16xf32>
    %77 = arith.subf %73, %76 : vector<2x16x16xf32>
    %78 = math.exp %77 : vector<2x16x16xf32>
    %cst_36 = arith.constant dense<0.000000e+00> : vector<2x16xf32>
    %79 = vector.multi_reduction <add>, %78, %cst_36 [2] : vector<2x16x16xf32> to vector<2x16xf32>
    %80 = vector.shape_cast %79 : vector<2x16xf32> to vector<2x16x1xf32>
    %81 = arith.truncf %78 : vector<2x16x16xf32> to vector<2x16x16xbf16>
    "tpu.trace_start"() <{level = 10 : i32, message = "bqk,bkd->bqd"}> : () -> ()
    %cst_37 = arith.constant dense<0.000000e+00> : vector<2x16x16xf32>
    %82 = tpu.matmul %81, %72, %cst_37 {dimension_numbers = #tpu.dot_dimension_numbers<[2], [1], [1], [2], [0, 0, 0, 1, 1, 2], [0], [0]>} : vector<2x16x16xbf16>, vector<2x16x16xbf16>, vector<2x16x16xf32> -> vector<2x16x16xf32>
    "tpu.trace_stop"() : () -> ()
    %83 = tpu.reciprocal %80 {approx = true} : vector<2x16x1xf32> -> vector<2x16x1xf32>
    %84 = vector.broadcast %83 : vector<2x16x1xf32> to vector<2x16x16xf32>
    %85 = arith.mulf %82, %84 : vector<2x16x16xf32>
    %86 = vector.shape_cast %85 : vector<2x16x16xf32> to vector<32x16xf32>
    %87 = arith.truncf %86 : vector<32x16xf32> to vector<32x16xbf16>
    %c0_38 = arith.constant 0 : index
    %c1 = arith.constant 1 : index
    %c0_39 = arith.constant 0 : index
    %c0_40 = arith.constant 0 : index
    %88 = vector.load %arg8[%c0_38, %c1, %c0_39, %c0_40] : memref<2x4x16x64xbf16, #tpu.memory_space<vmem>>, vector<1x1x16x64xbf16>
    %89 = vector.shape_cast %88 : vector<1x1x16x64xbf16> to vector<16x64xbf16>
    %cst_41 = arith.constant dense<0.000000e+00> : vector<32x64xf32>
    %90 = tpu.matmul %87, %89, %cst_41 {dimension_numbers = #tpu.dot_dimension_numbers<[1], [0], [0], [1], [0, 0, 1, 1], [], []>} : vector<32x16xbf16>, vector<16x64xbf16>, vector<32x64xf32> -> vector<32x64xf32>
    %91 = arith.addf %69, %90 : vector<32x64xf32>
    %92 = vector.extract_strided_slice %46 {offsets = [0, 0, 32], sizes = [2, 16, 16], strides = [1, 1, 1]} : vector<2x16x192xbf16> to vector<2x16x16xbf16>
    %93 = vector.extract_strided_slice %46 {offsets = [0, 0, 96], sizes = [2, 16, 16], strides = [1, 1, 1]} : vector<2x16x192xbf16> to vector<2x16x16xbf16>
    %94 = vector.extract_strided_slice %46 {offsets = [0, 0, 160], sizes = [2, 16, 16], strides = [1, 1, 1]} : vector<2x16x192xbf16> to vector<2x16x16xbf16>
    "tpu.trace_start"() <{level = 10 : i32, message = "bqd,bkd->bqk"}> : () -> ()
    %cst_42 = arith.constant dense<0.000000e+00> : vector<2x16x16xf32>
    %95 = tpu.matmul %92, %93, %cst_42 {dimension_numbers = #tpu.dot_dimension_numbers<[2], [2], [1], [1], [0, 0, 0, 1, 1, 1], [0], [0]>} : vector<2x16x16xbf16>, vector<2x16x16xbf16>, vector<2x16x16xf32> -> vector<2x16x16xf32>
    "tpu.trace_stop"() : () -> ()
    %cst_43 = arith.constant dense<0xFF800000> : vector<2x16xf32>
    %96 = vector.multi_reduction <maximumf>, %95, %cst_43 [2] : vector<2x16x16xf32> to vector<2x16xf32>
    %97 = vector.shape_cast %96 : vector<2x16xf32> to vector<2x16x1xf32>
    %98 = vector.broadcast %97 : vector<2x16x1xf32> to vector<2x16x16xf32>
    %99 = arith.subf %95, %98 : vector<2x16x16xf32>
    %100 = math.exp %99 : vector<2x16x16xf32>
    %cst_44 = arith.constant dense<0.000000e+00> : vector<2x16xf32>
    %101 = vector.multi_reduction <add>, %100, %cst_44 [2] : vector<2x16x16xf32> to vector<2x16xf32>
    %102 = vector.shape_cast %101 : vector<2x16xf32> to vector<2x16x1xf32>
    %103 = arith.truncf %100 : vector<2x16x16xf32> to vector<2x16x16xbf16>
    "tpu.trace_start"() <{level = 10 : i32, message = "bqk,bkd->bqd"}> : () -> ()
    %cst_45 = arith.constant dense<0.000000e+00> : vector<2x16x16xf32>
    %104 = tpu.matmul %103, %94, %cst_45 {dimension_numbers = #tpu.dot_dimension_numbers<[2], [1], [1], [2], [0, 0, 0, 1, 1, 2], [0], [0]>} : vector<2x16x16xbf16>, vector<2x16x16xbf16>, vector<2x16x16xf32> -> vector<2x16x16xf32>
    "tpu.trace_stop"() : () -> ()
    %105 = tpu.reciprocal %102 {approx = true} : vector<2x16x1xf32> -> vector<2x16x1xf32>
    %106 = vector.broadcast %105 : vector<2x16x1xf32> to vector<2x16x16xf32>
    %107 = arith.mulf %104, %106 : vector<2x16x16xf32>
    %108 = vector.shape_cast %107 : vector<2x16x16xf32> to vector<32x16xf32>
    %109 = arith.truncf %108 : vector<32x16xf32> to vector<32x16xbf16>
    %c0_46 = arith.constant 0 : index
    %c2 = arith.constant 2 : index
    %c0_47 = arith.constant 0 : index
    %c0_48 = arith.constant 0 : index
    %110 = vector.load %arg8[%c0_46, %c2, %c0_47, %c0_48] : memref<2x4x16x64xbf16, #tpu.memory_space<vmem>>, vector<1x1x16x64xbf16>
    %111 = vector.shape_cast %110 : vector<1x1x16x64xbf16> to vector<16x64xbf16>
    %cst_49 = arith.constant dense<0.000000e+00> : vector<32x64xf32>
    %112 = tpu.matmul %109, %111, %cst_49 {dimension_numbers = #tpu.dot_dimension_numbers<[1], [0], [0], [1], [0, 0, 1, 1], [], []>} : vector<32x16xbf16>, vector<16x64xbf16>, vector<32x64xf32> -> vector<32x64xf32>
    %113 = arith.addf %91, %112 : vector<32x64xf32>
    %114 = vector.extract_strided_slice %46 {offsets = [0, 0, 48], sizes = [2, 16, 16], strides = [1, 1, 1]} : vector<2x16x192xbf16> to vector<2x16x16xbf16>
    %115 = vector.extract_strided_slice %46 {offsets = [0, 0, 112], sizes = [2, 16, 16], strides = [1, 1, 1]} : vector<2x16x192xbf16> to vector<2x16x16xbf16>
    %116 = vector.extract_strided_slice %46 {offsets = [0, 0, 176], sizes = [2, 16, 16], strides = [1, 1, 1]} : vector<2x16x192xbf16> to vector<2x16x16xbf16>
    "tpu.trace_start"() <{level = 10 : i32, message = "bqd,bkd->bqk"}> : () -> ()
    %cst_50 = arith.constant dense<0.000000e+00> : vector<2x16x16xf32>
    %117 = tpu.matmul %114, %115, %cst_50 {dimension_numbers = #tpu.dot_dimension_numbers<[2], [2], [1], [1], [0, 0, 0, 1, 1, 1], [0], [0]>} : vector<2x16x16xbf16>, vector<2x16x16xbf16>, vector<2x16x16xf32> -> vector<2x16x16xf32>
    "tpu.trace_stop"() : () -> ()
    %cst_51 = arith.constant dense<0xFF800000> : vector<2x16xf32>
    %118 = vector.multi_reduction <maximumf>, %117, %cst_51 [2] : vector<2x16x16xf32> to vector<2x16xf32>
    %119 = vector.shape_cast %118 : vector<2x16xf32> to vector<2x16x1xf32>
    %120 = vector.broadcast %119 : vector<2x16x1xf32> to vector<2x16x16xf32>
    %121 = arith.subf %117, %120 : vector<2x16x16xf32>
    %122 = math.exp %121 : vector<2x16x16xf32>
    %cst_52 = arith.constant dense<0.000000e+00> : vector<2x16xf32>
    %123 = vector.multi_reduction <add>, %122, %cst_52 [2] : vector<2x16x16xf32> to vector<2x16xf32>
    %124 = vector.shape_cast %123 : vector<2x16xf32> to vector<2x16x1xf32>
    %125 = arith.truncf %122 : vector<2x16x16xf32> to vector<2x16x16xbf16>
    "tpu.trace_start"() <{level = 10 : i32, message = "bqk,bkd->bqd"}> : () -> ()
    %cst_53 = arith.constant dense<0.000000e+00> : vector<2x16x16xf32>
    %126 = tpu.matmul %125, %116, %cst_53 {dimension_numbers = #tpu.dot_dimension_numbers<[2], [1], [1], [2], [0, 0, 0, 1, 1, 2], [0], [0]>} : vector<2x16x16xbf16>, vector<2x16x16xbf16>, vector<2x16x16xf32> -> vector<2x16x16xf32>
    "tpu.trace_stop"() : () -> ()
    %127 = tpu.reciprocal %124 {approx = true} : vector<2x16x1xf32> -> vector<2x16x1xf32>
    %128 = vector.broadcast %127 : vector<2x16x1xf32> to vector<2x16x16xf32>
    %129 = arith.mulf %126, %128 : vector<2x16x16xf32>
    %130 = vector.shape_cast %129 : vector<2x16x16xf32> to vector<32x16xf32>
    %131 = arith.truncf %130 : vector<32x16xf32> to vector<32x16xbf16>
    %c0_54 = arith.constant 0 : index
    %c3 = arith.constant 3 : index
    %c0_55 = arith.constant 0 : index
    %c0_56 = arith.constant 0 : index
    %132 = vector.load %arg8[%c0_54, %c3, %c0_55, %c0_56] : memref<2x4x16x64xbf16, #tpu.memory_space<vmem>>, vector<1x1x16x64xbf16>
    %133 = vector.shape_cast %132 : vector<1x1x16x64xbf16> to vector<16x64xbf16>
    %cst_57 = arith.constant dense<0.000000e+00> : vector<32x64xf32>
    %134 = tpu.matmul %131, %133, %cst_57 {dimension_numbers = #tpu.dot_dimension_numbers<[1], [0], [0], [1], [0, 0, 1, 1], [], []>} : vector<32x16xbf16>, vector<16x64xbf16>, vector<32x64xf32> -> vector<32x64xf32>
    %135 = arith.addf %113, %134 : vector<32x64xf32>
    %136 = arith.addf %10, %135 : vector<32x64xf32>
    %c0_58 = arith.constant 0 : index
    %c0_59 = arith.constant 0 : index
    %c0_60 = arith.constant 0 : index
    %137 = vector.load %arg9[%c0_58, %c0_59, %c0_60] : memref<2x1x64xf32, #tpu.memory_space<vmem>>, vector<1x1x64xf32>
    %138 = vector.shape_cast %137 : vector<1x1x64xf32> to vector<1x64xf32>
    %139 = vector.broadcast %138 : vector<1x64xf32> to vector<32x64xf32>
    %140 = arith.addf %136, %139 : vector<32x64xf32>
    %c0_61 = arith.constant 0 : index
    %c0_62 = arith.constant 0 : index
    %c0_63 = arith.constant 0 : index
    %141 = vector.load %arg10[%c0_61, %c0_62, %c0_63] : memref<2x1x64xf32, #tpu.memory_space<vmem>>, vector<1x1x64xf32>
    %142 = vector.shape_cast %141 : vector<1x1x64xf32> to vector<1x64xf32>
    %c0_64 = arith.constant 0 : index
    %c0_65 = arith.constant 0 : index
    %c0_66 = arith.constant 0 : index
    %143 = vector.load %arg11[%c0_64, %c0_65, %c0_66] : memref<2x1x64xf32, #tpu.memory_space<vmem>>, vector<1x1x64xf32>
    %144 = vector.shape_cast %143 : vector<1x1x64xf32> to vector<1x64xf32>
    %cst_67 = arith.constant dense<0.000000e+00> : vector<32xf32>
    %145 = vector.multi_reduction <add>, %140, %cst_67 [1] : vector<32x64xf32> to vector<32xf32>
    %146 = vector.shape_cast %145 : vector<32xf32> to vector<32x1xf32>
    %cst_68 = arith.constant 6.400000e+01 : f32
    %147 = vector.broadcast %cst_68 : f32 to vector<32x1xf32>
    %148 = arith.divf %146, %147 : vector<32x1xf32>
    %149 = vector.broadcast %148 : vector<32x1xf32> to vector<32x64xf32>
    %150 = arith.subf %140, %149 : vector<32x64xf32>
    %151 = arith.mulf %150, %150 : vector<32x64xf32>
    %cst_69 = arith.constant dense<0.000000e+00> : vector<32xf32>
    %152 = vector.multi_reduction <add>, %151, %cst_69 [1] : vector<32x64xf32> to vector<32xf32>
    %153 = vector.shape_cast %152 : vector<32xf32> to vector<32x1xf32>
    %cst_70 = arith.constant 6.400000e+01 : f32
    %154 = vector.broadcast %cst_70 : f32 to vector<32x1xf32>
    %155 = arith.divf %153, %154 : vector<32x1xf32>
    %156 = vector.broadcast %148 : vector<32x1xf32> to vector<32x64xf32>
    %157 = arith.subf %140, %156 : vector<32x64xf32>
    %cst_71 = arith.constant 9.99999997E-7 : f32
    %158 = vector.broadcast %cst_71 : f32 to vector<32x1xf32>
    %159 = arith.addf %155, %158 : vector<32x1xf32>
    %160 = math.rsqrt %159 : vector<32x1xf32>
    %161 = vector.broadcast %160 : vector<32x1xf32> to vector<32x64xf32>
    %162 = arith.mulf %157, %161 : vector<32x64xf32>
    %163 = vector.broadcast %142 : vector<1x64xf32> to vector<32x64xf32>
    %164 = arith.mulf %162, %163 : vector<32x64xf32>
    %165 = vector.broadcast %144 : vector<1x64xf32> to vector<32x64xf32>
    %166 = arith.addf %164, %165 : vector<32x64xf32>
    %167 = arith.truncf %166 : vector<32x64xf32> to vector<32x64xbf16>
    %c0_72 = arith.constant 0 : index
    %c0_73 = arith.constant 0 : index
    %c0_74 = arith.constant 0 : index
    %168 = vector.load %arg12[%c0_72, %c0_73, %c0_74] : memref<2x64x128xbf16, #tpu.memory_space<vmem>>, vector<1x64x128xbf16>
    %169 = vector.shape_cast %168 : vector<1x64x128xbf16> to vector<64x128xbf16>
    %cst_75 = arith.constant dense<0.000000e+00> : vector<32x128xf32>
    %170 = tpu.matmul %167, %169, %cst_75 {dimension_numbers = #tpu.dot_dimension_numbers<[1], [0], [0], [1], [0, 0, 1, 1], [], []>} : vector<32x64xbf16>, vector<64x128xbf16>, vector<32x128xf32> -> vector<32x128xf32>
    %c0_76 = arith.constant 0 : index
    %c0_77 = arith.constant 0 : index
    %c0_78 = arith.constant 0 : index
    %171 = vector.load %arg13[%c0_76, %c0_77, %c0_78] : memref<2x1x128xf32, #tpu.memory_space<vmem>>, vector<1x1x128xf32>
    %172 = vector.shape_cast %171 : vector<1x1x128xf32> to vector<1x128xf32>
    %173 = vector.broadcast %172 : vector<1x128xf32> to vector<32x128xf32>
    %174 = arith.addf %170, %173 : vector<32x128xf32>
    %cst_79 = arith.constant 5.000000e-01 : f32
    %175 = vector.broadcast %cst_79 : f32 to vector<32x128xf32>
    %176 = arith.mulf %175, %174 : vector<32x128xf32>
    %cst_80 = arith.constant 4.471500e-02 : f32
    %177 = vector.broadcast %cst_80 : f32 to vector<32x128xf32>
    %178 = arith.mulf %177, %174 : vector<32x128xf32>
    %179 = arith.mulf %178, %174 : vector<32x128xf32>
    %180 = arith.mulf %179, %174 : vector<32x128xf32>
    %181 = arith.addf %174, %180 : vector<32x128xf32>
    %cst_81 = arith.constant 0.797884583 : f32
    %182 = vector.broadcast %cst_81 : f32 to vector<32x128xf32>
    %183 = arith.mulf %182, %181 : vector<32x128xf32>
    %184 = math.tanh %183 : vector<32x128xf32>
    %cst_82 = arith.constant 1.000000e+00 : f32
    %185 = vector.broadcast %cst_82 : f32 to vector<32x128xf32>
    %186 = arith.addf %185, %184 : vector<32x128xf32>
    %187 = arith.mulf %176, %186 : vector<32x128xf32>
    %188 = arith.truncf %187 : vector<32x128xf32> to vector<32x128xbf16>
    %c0_83 = arith.constant 0 : index
    %c0_84 = arith.constant 0 : index
    %c0_85 = arith.constant 0 : index
    %189 = vector.load %arg14[%c0_83, %c0_84, %c0_85] : memref<2x128x64xbf16, #tpu.memory_space<vmem>>, vector<1x128x64xbf16>
    %190 = vector.shape_cast %189 : vector<1x128x64xbf16> to vector<128x64xbf16>
    %cst_86 = arith.constant dense<0.000000e+00> : vector<32x64xf32>
    %191 = tpu.matmul %188, %190, %cst_86 {dimension_numbers = #tpu.dot_dimension_numbers<[1], [0], [0], [1], [0, 0, 1, 1], [], []>} : vector<32x128xbf16>, vector<128x64xbf16>, vector<32x64xf32> -> vector<32x64xf32>
    %c0_87 = arith.constant 0 : index
    %c0_88 = arith.constant 0 : index
    %c0_89 = arith.constant 0 : index
    %192 = vector.load %arg15[%c0_87, %c0_88, %c0_89] : memref<2x1x64xf32, #tpu.memory_space<vmem>>, vector<1x1x64xf32>
    %193 = vector.shape_cast %192 : vector<1x1x64xf32> to vector<1x64xf32>
    %194 = vector.broadcast %193 : vector<1x64xf32> to vector<32x64xf32>
    %195 = arith.addf %191, %194 : vector<32x64xf32>
    %196 = arith.addf %140, %195 : vector<32x64xf32>
    %c1_90 = arith.constant 1 : index
    %c0_91 = arith.constant 0 : index
    %c0_92 = arith.constant 0 : index
    %197 = vector.load %arg4[%c1_90, %c0_91, %c0_92] : memref<2x1x64xf32, #tpu.memory_space<vmem>>, vector<1x1x64xf32>
    %198 = vector.shape_cast %197 : vector<1x1x64xf32> to vector<1x64xf32>
    %c1_93 = arith.constant 1 : index
    %c0_94 = arith.constant 0 : index
    %c0_95 = arith.constant 0 : index
    %199 = vector.load %arg5[%c1_93, %c0_94, %c0_95] : memref<2x1x64xf32, #tpu.memory_space<vmem>>, vector<1x1x64xf32>
    %200 = vector.shape_cast %199 : vector<1x1x64xf32> to vector<1x64xf32>
    %cst_96 = arith.constant dense<0.000000e+00> : vector<32xf32>
    %201 = vector.multi_reduction <add>, %196, %cst_96 [1] : vector<32x64xf32> to vector<32xf32>
    %202 = vector.shape_cast %201 : vector<32xf32> to vector<32x1xf32>
    %cst_97 = arith.constant 6.400000e+01 : f32
    %203 = vector.broadcast %cst_97 : f32 to vector<32x1xf32>
    %204 = arith.divf %202, %203 : vector<32x1xf32>
    %205 = vector.broadcast %204 : vector<32x1xf32> to vector<32x64xf32>
    %206 = arith.subf %196, %205 : vector<32x64xf32>
    %207 = arith.mulf %206, %206 : vector<32x64xf32>
    %cst_98 = arith.constant dense<0.000000e+00> : vector<32xf32>
    %208 = vector.multi_reduction <add>, %207, %cst_98 [1] : vector<32x64xf32> to vector<32xf32>
    %209 = vector.shape_cast %208 : vector<32xf32> to vector<32x1xf32>
    %cst_99 = arith.constant 6.400000e+01 : f32
    %210 = vector.broadcast %cst_99 : f32 to vector<32x1xf32>
    %211 = arith.divf %209, %210 : vector<32x1xf32>
    %212 = vector.broadcast %204 : vector<32x1xf32> to vector<32x64xf32>
    %213 = arith.subf %196, %212 : vector<32x64xf32>
    %cst_100 = arith.constant 9.99999997E-7 : f32
    %214 = vector.broadcast %cst_100 : f32 to vector<32x1xf32>
    %215 = arith.addf %211, %214 : vector<32x1xf32>
    %216 = math.rsqrt %215 : vector<32x1xf32>
    %217 = vector.broadcast %216 : vector<32x1xf32> to vector<32x64xf32>
    %218 = arith.mulf %213, %217 : vector<32x64xf32>
    %219 = vector.broadcast %198 : vector<1x64xf32> to vector<32x64xf32>
    %220 = arith.mulf %218, %219 : vector<32x64xf32>
    %221 = vector.broadcast %200 : vector<1x64xf32> to vector<32x64xf32>
    %222 = arith.addf %220, %221 : vector<32x64xf32>
    %223 = arith.truncf %222 : vector<32x64xf32> to vector<32x64xbf16>
    %c1_101 = arith.constant 1 : index
    %c0_102 = arith.constant 0 : index
    %c0_103 = arith.constant 0 : index
    %224 = vector.load %arg6[%c1_101, %c0_102, %c0_103] : memref<2x64x192xbf16, #tpu.memory_space<vmem>>, vector<1x64x192xbf16>
    %225 = vector.shape_cast %224 : vector<1x64x192xbf16> to vector<64x192xbf16>
    %cst_104 = arith.constant dense<0.000000e+00> : vector<32x192xf32>
    %226 = tpu.matmul %223, %225, %cst_104 {dimension_numbers = #tpu.dot_dimension_numbers<[1], [0], [0], [1], [0, 0, 1, 1], [], []>} : vector<32x64xbf16>, vector<64x192xbf16>, vector<32x192xf32> -> vector<32x192xf32>
    %c1_105 = arith.constant 1 : index
    %c0_106 = arith.constant 0 : index
    %c0_107 = arith.constant 0 : index
    %227 = vector.load %arg7[%c1_105, %c0_106, %c0_107] : memref<2x1x192xf32, #tpu.memory_space<vmem>>, vector<1x1x192xf32>
    %228 = vector.shape_cast %227 : vector<1x1x192xf32> to vector<1x192xf32>
    %229 = vector.broadcast %228 : vector<1x192xf32> to vector<32x192xf32>
    %230 = arith.addf %226, %229 : vector<32x192xf32>
    %231 = arith.truncf %230 : vector<32x192xf32> to vector<32x192xbf16>
    %232 = vector.shape_cast %231 : vector<32x192xbf16> to vector<2x16x192xbf16>
    %cst_108 = arith.constant 0.000000e+00 : f32
    %233 = vector.broadcast %cst_108 : f32 to vector<32x64xf32>
    %234 = vector.extract_strided_slice %232 {offsets = [0, 0, 0], sizes = [2, 16, 16], strides = [1, 1, 1]} : vector<2x16x192xbf16> to vector<2x16x16xbf16>
    %235 = vector.extract_strided_slice %232 {offsets = [0, 0, 64], sizes = [2, 16, 16], strides = [1, 1, 1]} : vector<2x16x192xbf16> to vector<2x16x16xbf16>
    %236 = vector.extract_strided_slice %232 {offsets = [0, 0, 128], sizes = [2, 16, 16], strides = [1, 1, 1]} : vector<2x16x192xbf16> to vector<2x16x16xbf16>
    "tpu.trace_start"() <{level = 10 : i32, message = "bqd,bkd->bqk"}> : () -> ()
    %cst_109 = arith.constant dense<0.000000e+00> : vector<2x16x16xf32>
    %237 = tpu.matmul %234, %235, %cst_109 {dimension_numbers = #tpu.dot_dimension_numbers<[2], [2], [1], [1], [0, 0, 0, 1, 1, 1], [0], [0]>} : vector<2x16x16xbf16>, vector<2x16x16xbf16>, vector<2x16x16xf32> -> vector<2x16x16xf32>
    "tpu.trace_stop"() : () -> ()
    %cst_110 = arith.constant dense<0xFF800000> : vector<2x16xf32>
    %238 = vector.multi_reduction <maximumf>, %237, %cst_110 [2] : vector<2x16x16xf32> to vector<2x16xf32>
    %239 = vector.shape_cast %238 : vector<2x16xf32> to vector<2x16x1xf32>
    %240 = vector.broadcast %239 : vector<2x16x1xf32> to vector<2x16x16xf32>
    %241 = arith.subf %237, %240 : vector<2x16x16xf32>
    %242 = math.exp %241 : vector<2x16x16xf32>
    %cst_111 = arith.constant dense<0.000000e+00> : vector<2x16xf32>
    %243 = vector.multi_reduction <add>, %242, %cst_111 [2] : vector<2x16x16xf32> to vector<2x16xf32>
    %244 = vector.shape_cast %243 : vector<2x16xf32> to vector<2x16x1xf32>
    %245 = arith.truncf %242 : vector<2x16x16xf32> to vector<2x16x16xbf16>
    "tpu.trace_start"() <{level = 10 : i32, message = "bqk,bkd->bqd"}> : () -> ()
    %cst_112 = arith.constant dense<0.000000e+00> : vector<2x16x16xf32>
    %246 = tpu.matmul %245, %236, %cst_112 {dimension_numbers = #tpu.dot_dimension_numbers<[2], [1], [1], [2], [0, 0, 0, 1, 1, 2], [0], [0]>} : vector<2x16x16xbf16>, vector<2x16x16xbf16>, vector<2x16x16xf32> -> vector<2x16x16xf32>
    "tpu.trace_stop"() : () -> ()
    %247 = tpu.reciprocal %244 {approx = true} : vector<2x16x1xf32> -> vector<2x16x1xf32>
    %248 = vector.broadcast %247 : vector<2x16x1xf32> to vector<2x16x16xf32>
    %249 = arith.mulf %246, %248 : vector<2x16x16xf32>
    %250 = vector.shape_cast %249 : vector<2x16x16xf32> to vector<32x16xf32>
    %251 = arith.truncf %250 : vector<32x16xf32> to vector<32x16xbf16>
    %c1_113 = arith.constant 1 : index
    %c0_114 = arith.constant 0 : index
    %c0_115 = arith.constant 0 : index
    %c0_116 = arith.constant 0 : index
    %252 = vector.load %arg8[%c1_113, %c0_114, %c0_115, %c0_116] : memref<2x4x16x64xbf16, #tpu.memory_space<vmem>>, vector<1x1x16x64xbf16>
    %253 = vector.shape_cast %252 : vector<1x1x16x64xbf16> to vector<16x64xbf16>
    %cst_117 = arith.constant dense<0.000000e+00> : vector<32x64xf32>
    %254 = tpu.matmul %251, %253, %cst_117 {dimension_numbers = #tpu.dot_dimension_numbers<[1], [0], [0], [1], [0, 0, 1, 1], [], []>} : vector<32x16xbf16>, vector<16x64xbf16>, vector<32x64xf32> -> vector<32x64xf32>
    %255 = arith.addf %233, %254 : vector<32x64xf32>
    %256 = vector.extract_strided_slice %232 {offsets = [0, 0, 16], sizes = [2, 16, 16], strides = [1, 1, 1]} : vector<2x16x192xbf16> to vector<2x16x16xbf16>
    %257 = vector.extract_strided_slice %232 {offsets = [0, 0, 80], sizes = [2, 16, 16], strides = [1, 1, 1]} : vector<2x16x192xbf16> to vector<2x16x16xbf16>
    %258 = vector.extract_strided_slice %232 {offsets = [0, 0, 144], sizes = [2, 16, 16], strides = [1, 1, 1]} : vector<2x16x192xbf16> to vector<2x16x16xbf16>
    "tpu.trace_start"() <{level = 10 : i32, message = "bqd,bkd->bqk"}> : () -> ()
    %cst_118 = arith.constant dense<0.000000e+00> : vector<2x16x16xf32>
    %259 = tpu.matmul %256, %257, %cst_118 {dimension_numbers = #tpu.dot_dimension_numbers<[2], [2], [1], [1], [0, 0, 0, 1, 1, 1], [0], [0]>} : vector<2x16x16xbf16>, vector<2x16x16xbf16>, vector<2x16x16xf32> -> vector<2x16x16xf32>
    "tpu.trace_stop"() : () -> ()
    %cst_119 = arith.constant dense<0xFF800000> : vector<2x16xf32>
    %260 = vector.multi_reduction <maximumf>, %259, %cst_119 [2] : vector<2x16x16xf32> to vector<2x16xf32>
    %261 = vector.shape_cast %260 : vector<2x16xf32> to vector<2x16x1xf32>
    %262 = vector.broadcast %261 : vector<2x16x1xf32> to vector<2x16x16xf32>
    %263 = arith.subf %259, %262 : vector<2x16x16xf32>
    %264 = math.exp %263 : vector<2x16x16xf32>
    %cst_120 = arith.constant dense<0.000000e+00> : vector<2x16xf32>
    %265 = vector.multi_reduction <add>, %264, %cst_120 [2] : vector<2x16x16xf32> to vector<2x16xf32>
    %266 = vector.shape_cast %265 : vector<2x16xf32> to vector<2x16x1xf32>
    %267 = arith.truncf %264 : vector<2x16x16xf32> to vector<2x16x16xbf16>
    "tpu.trace_start"() <{level = 10 : i32, message = "bqk,bkd->bqd"}> : () -> ()
    %cst_121 = arith.constant dense<0.000000e+00> : vector<2x16x16xf32>
    %268 = tpu.matmul %267, %258, %cst_121 {dimension_numbers = #tpu.dot_dimension_numbers<[2], [1], [1], [2], [0, 0, 0, 1, 1, 2], [0], [0]>} : vector<2x16x16xbf16>, vector<2x16x16xbf16>, vector<2x16x16xf32> -> vector<2x16x16xf32>
    "tpu.trace_stop"() : () -> ()
    %269 = tpu.reciprocal %266 {approx = true} : vector<2x16x1xf32> -> vector<2x16x1xf32>
    %270 = vector.broadcast %269 : vector<2x16x1xf32> to vector<2x16x16xf32>
    %271 = arith.mulf %268, %270 : vector<2x16x16xf32>
    %272 = vector.shape_cast %271 : vector<2x16x16xf32> to vector<32x16xf32>
    %273 = arith.truncf %272 : vector<32x16xf32> to vector<32x16xbf16>
    %c1_122 = arith.constant 1 : index
    %c1_123 = arith.constant 1 : index
    %c0_124 = arith.constant 0 : index
    %c0_125 = arith.constant 0 : index
    %274 = vector.load %arg8[%c1_122, %c1_123, %c0_124, %c0_125] : memref<2x4x16x64xbf16, #tpu.memory_space<vmem>>, vector<1x1x16x64xbf16>
    %275 = vector.shape_cast %274 : vector<1x1x16x64xbf16> to vector<16x64xbf16>
    %cst_126 = arith.constant dense<0.000000e+00> : vector<32x64xf32>
    %276 = tpu.matmul %273, %275, %cst_126 {dimension_numbers = #tpu.dot_dimension_numbers<[1], [0], [0], [1], [0, 0, 1, 1], [], []>} : vector<32x16xbf16>, vector<16x64xbf16>, vector<32x64xf32> -> vector<32x64xf32>
    %277 = arith.addf %255, %276 : vector<32x64xf32>
    %278 = vector.extract_strided_slice %232 {offsets = [0, 0, 32], sizes = [2, 16, 16], strides = [1, 1, 1]} : vector<2x16x192xbf16> to vector<2x16x16xbf16>
    %279 = vector.extract_strided_slice %232 {offsets = [0, 0, 96], sizes = [2, 16, 16], strides = [1, 1, 1]} : vector<2x16x192xbf16> to vector<2x16x16xbf16>
    %280 = vector.extract_strided_slice %232 {offsets = [0, 0, 160], sizes = [2, 16, 16], strides = [1, 1, 1]} : vector<2x16x192xbf16> to vector<2x16x16xbf16>
    "tpu.trace_start"() <{level = 10 : i32, message = "bqd,bkd->bqk"}> : () -> ()
    %cst_127 = arith.constant dense<0.000000e+00> : vector<2x16x16xf32>
    %281 = tpu.matmul %278, %279, %cst_127 {dimension_numbers = #tpu.dot_dimension_numbers<[2], [2], [1], [1], [0, 0, 0, 1, 1, 1], [0], [0]>} : vector<2x16x16xbf16>, vector<2x16x16xbf16>, vector<2x16x16xf32> -> vector<2x16x16xf32>
    "tpu.trace_stop"() : () -> ()
    %cst_128 = arith.constant dense<0xFF800000> : vector<2x16xf32>
    %282 = vector.multi_reduction <maximumf>, %281, %cst_128 [2] : vector<2x16x16xf32> to vector<2x16xf32>
    %283 = vector.shape_cast %282 : vector<2x16xf32> to vector<2x16x1xf32>
    %284 = vector.broadcast %283 : vector<2x16x1xf32> to vector<2x16x16xf32>
    %285 = arith.subf %281, %284 : vector<2x16x16xf32>
    %286 = math.exp %285 : vector<2x16x16xf32>
    %cst_129 = arith.constant dense<0.000000e+00> : vector<2x16xf32>
    %287 = vector.multi_reduction <add>, %286, %cst_129 [2] : vector<2x16x16xf32> to vector<2x16xf32>
    %288 = vector.shape_cast %287 : vector<2x16xf32> to vector<2x16x1xf32>
    %289 = arith.truncf %286 : vector<2x16x16xf32> to vector<2x16x16xbf16>
    "tpu.trace_start"() <{level = 10 : i32, message = "bqk,bkd->bqd"}> : () -> ()
    %cst_130 = arith.constant dense<0.000000e+00> : vector<2x16x16xf32>
    %290 = tpu.matmul %289, %280, %cst_130 {dimension_numbers = #tpu.dot_dimension_numbers<[2], [1], [1], [2], [0, 0, 0, 1, 1, 2], [0], [0]>} : vector<2x16x16xbf16>, vector<2x16x16xbf16>, vector<2x16x16xf32> -> vector<2x16x16xf32>
    "tpu.trace_stop"() : () -> ()
    %291 = tpu.reciprocal %288 {approx = true} : vector<2x16x1xf32> -> vector<2x16x1xf32>
    %292 = vector.broadcast %291 : vector<2x16x1xf32> to vector<2x16x16xf32>
    %293 = arith.mulf %290, %292 : vector<2x16x16xf32>
    %294 = vector.shape_cast %293 : vector<2x16x16xf32> to vector<32x16xf32>
    %295 = arith.truncf %294 : vector<32x16xf32> to vector<32x16xbf16>
    %c1_131 = arith.constant 1 : index
    %c2_132 = arith.constant 2 : index
    %c0_133 = arith.constant 0 : index
    %c0_134 = arith.constant 0 : index
    %296 = vector.load %arg8[%c1_131, %c2_132, %c0_133, %c0_134] : memref<2x4x16x64xbf16, #tpu.memory_space<vmem>>, vector<1x1x16x64xbf16>
    %297 = vector.shape_cast %296 : vector<1x1x16x64xbf16> to vector<16x64xbf16>
    %cst_135 = arith.constant dense<0.000000e+00> : vector<32x64xf32>
    %298 = tpu.matmul %295, %297, %cst_135 {dimension_numbers = #tpu.dot_dimension_numbers<[1], [0], [0], [1], [0, 0, 1, 1], [], []>} : vector<32x16xbf16>, vector<16x64xbf16>, vector<32x64xf32> -> vector<32x64xf32>
    %299 = arith.addf %277, %298 : vector<32x64xf32>
    %300 = vector.extract_strided_slice %232 {offsets = [0, 0, 48], sizes = [2, 16, 16], strides = [1, 1, 1]} : vector<2x16x192xbf16> to vector<2x16x16xbf16>
    %301 = vector.extract_strided_slice %232 {offsets = [0, 0, 112], sizes = [2, 16, 16], strides = [1, 1, 1]} : vector<2x16x192xbf16> to vector<2x16x16xbf16>
    %302 = vector.extract_strided_slice %232 {offsets = [0, 0, 176], sizes = [2, 16, 16], strides = [1, 1, 1]} : vector<2x16x192xbf16> to vector<2x16x16xbf16>
    "tpu.trace_start"() <{level = 10 : i32, message = "bqd,bkd->bqk"}> : () -> ()
    %cst_136 = arith.constant dense<0.000000e+00> : vector<2x16x16xf32>
    %303 = tpu.matmul %300, %301, %cst_136 {dimension_numbers = #tpu.dot_dimension_numbers<[2], [2], [1], [1], [0, 0, 0, 1, 1, 1], [0], [0]>} : vector<2x16x16xbf16>, vector<2x16x16xbf16>, vector<2x16x16xf32> -> vector<2x16x16xf32>
    "tpu.trace_stop"() : () -> ()
    %cst_137 = arith.constant dense<0xFF800000> : vector<2x16xf32>
    %304 = vector.multi_reduction <maximumf>, %303, %cst_137 [2] : vector<2x16x16xf32> to vector<2x16xf32>
    %305 = vector.shape_cast %304 : vector<2x16xf32> to vector<2x16x1xf32>
    %306 = vector.broadcast %305 : vector<2x16x1xf32> to vector<2x16x16xf32>
    %307 = arith.subf %303, %306 : vector<2x16x16xf32>
    %308 = math.exp %307 : vector<2x16x16xf32>
    %cst_138 = arith.constant dense<0.000000e+00> : vector<2x16xf32>
    %309 = vector.multi_reduction <add>, %308, %cst_138 [2] : vector<2x16x16xf32> to vector<2x16xf32>
    %310 = vector.shape_cast %309 : vector<2x16xf32> to vector<2x16x1xf32>
    %311 = arith.truncf %308 : vector<2x16x16xf32> to vector<2x16x16xbf16>
    "tpu.trace_start"() <{level = 10 : i32, message = "bqk,bkd->bqd"}> : () -> ()
    %cst_139 = arith.constant dense<0.000000e+00> : vector<2x16x16xf32>
    %312 = tpu.matmul %311, %302, %cst_139 {dimension_numbers = #tpu.dot_dimension_numbers<[2], [1], [1], [2], [0, 0, 0, 1, 1, 2], [0], [0]>} : vector<2x16x16xbf16>, vector<2x16x16xbf16>, vector<2x16x16xf32> -> vector<2x16x16xf32>
    "tpu.trace_stop"() : () -> ()
    %313 = tpu.reciprocal %310 {approx = true} : vector<2x16x1xf32> -> vector<2x16x1xf32>
    %314 = vector.broadcast %313 : vector<2x16x1xf32> to vector<2x16x16xf32>
    %315 = arith.mulf %312, %314 : vector<2x16x16xf32>
    %316 = vector.shape_cast %315 : vector<2x16x16xf32> to vector<32x16xf32>
    %317 = arith.truncf %316 : vector<32x16xf32> to vector<32x16xbf16>
    %c1_140 = arith.constant 1 : index
    %c3_141 = arith.constant 3 : index
    %c0_142 = arith.constant 0 : index
    %c0_143 = arith.constant 0 : index
    %318 = vector.load %arg8[%c1_140, %c3_141, %c0_142, %c0_143] : memref<2x4x16x64xbf16, #tpu.memory_space<vmem>>, vector<1x1x16x64xbf16>
    %319 = vector.shape_cast %318 : vector<1x1x16x64xbf16> to vector<16x64xbf16>
    %cst_144 = arith.constant dense<0.000000e+00> : vector<32x64xf32>
    %320 = tpu.matmul %317, %319, %cst_144 {dimension_numbers = #tpu.dot_dimension_numbers<[1], [0], [0], [1], [0, 0, 1, 1], [], []>} : vector<32x16xbf16>, vector<16x64xbf16>, vector<32x64xf32> -> vector<32x64xf32>
    %321 = arith.addf %299, %320 : vector<32x64xf32>
    %322 = arith.addf %196, %321 : vector<32x64xf32>
    %c1_145 = arith.constant 1 : index
    %c0_146 = arith.constant 0 : index
    %c0_147 = arith.constant 0 : index
    %323 = vector.load %arg9[%c1_145, %c0_146, %c0_147] : memref<2x1x64xf32, #tpu.memory_space<vmem>>, vector<1x1x64xf32>
    %324 = vector.shape_cast %323 : vector<1x1x64xf32> to vector<1x64xf32>
    %325 = vector.broadcast %324 : vector<1x64xf32> to vector<32x64xf32>
    %326 = arith.addf %322, %325 : vector<32x64xf32>
    %c1_148 = arith.constant 1 : index
    %c0_149 = arith.constant 0 : index
    %c0_150 = arith.constant 0 : index
    %327 = vector.load %arg10[%c1_148, %c0_149, %c0_150] : memref<2x1x64xf32, #tpu.memory_space<vmem>>, vector<1x1x64xf32>
    %328 = vector.shape_cast %327 : vector<1x1x64xf32> to vector<1x64xf32>
    %c1_151 = arith.constant 1 : index
    %c0_152 = arith.constant 0 : index
    %c0_153 = arith.constant 0 : index
    %329 = vector.load %arg11[%c1_151, %c0_152, %c0_153] : memref<2x1x64xf32, #tpu.memory_space<vmem>>, vector<1x1x64xf32>
    %330 = vector.shape_cast %329 : vector<1x1x64xf32> to vector<1x64xf32>
    %cst_154 = arith.constant dense<0.000000e+00> : vector<32xf32>
    %331 = vector.multi_reduction <add>, %326, %cst_154 [1] : vector<32x64xf32> to vector<32xf32>
    %332 = vector.shape_cast %331 : vector<32xf32> to vector<32x1xf32>
    %cst_155 = arith.constant 6.400000e+01 : f32
    %333 = vector.broadcast %cst_155 : f32 to vector<32x1xf32>
    %334 = arith.divf %332, %333 : vector<32x1xf32>
    %335 = vector.broadcast %334 : vector<32x1xf32> to vector<32x64xf32>
    %336 = arith.subf %326, %335 : vector<32x64xf32>
    %337 = arith.mulf %336, %336 : vector<32x64xf32>
    %cst_156 = arith.constant dense<0.000000e+00> : vector<32xf32>
    %338 = vector.multi_reduction <add>, %337, %cst_156 [1] : vector<32x64xf32> to vector<32xf32>
    %339 = vector.shape_cast %338 : vector<32xf32> to vector<32x1xf32>
    %cst_157 = arith.constant 6.400000e+01 : f32
    %340 = vector.broadcast %cst_157 : f32 to vector<32x1xf32>
    %341 = arith.divf %339, %340 : vector<32x1xf32>
    %342 = vector.broadcast %334 : vector<32x1xf32> to vector<32x64xf32>
    %343 = arith.subf %326, %342 : vector<32x64xf32>
    %cst_158 = arith.constant 9.99999997E-7 : f32
    %344 = vector.broadcast %cst_158 : f32 to vector<32x1xf32>
    %345 = arith.addf %341, %344 : vector<32x1xf32>
    %346 = math.rsqrt %345 : vector<32x1xf32>
    %347 = vector.broadcast %346 : vector<32x1xf32> to vector<32x64xf32>
    %348 = arith.mulf %343, %347 : vector<32x64xf32>
    %349 = vector.broadcast %328 : vector<1x64xf32> to vector<32x64xf32>
    %350 = arith.mulf %348, %349 : vector<32x64xf32>
    %351 = vector.broadcast %330 : vector<1x64xf32> to vector<32x64xf32>
    %352 = arith.addf %350, %351 : vector<32x64xf32>
    %353 = arith.truncf %352 : vector<32x64xf32> to vector<32x64xbf16>
    %c1_159 = arith.constant 1 : index
    %c0_160 = arith.constant 0 : index
    %c0_161 = arith.constant 0 : index
    %354 = vector.load %arg12[%c1_159, %c0_160, %c0_161] : memref<2x64x128xbf16, #tpu.memory_space<vmem>>, vector<1x64x128xbf16>
    %355 = vector.shape_cast %354 : vector<1x64x128xbf16> to vector<64x128xbf16>
    %cst_162 = arith.constant dense<0.000000e+00> : vector<32x128xf32>
    %356 = tpu.matmul %353, %355, %cst_162 {dimension_numbers = #tpu.dot_dimension_numbers<[1], [0], [0], [1], [0, 0, 1, 1], [], []>} : vector<32x64xbf16>, vector<64x128xbf16>, vector<32x128xf32> -> vector<32x128xf32>
    %c1_163 = arith.constant 1 : index
    %c0_164 = arith.constant 0 : index
    %c0_165 = arith.constant 0 : index
    %357 = vector.load %arg13[%c1_163, %c0_164, %c0_165] : memref<2x1x128xf32, #tpu.memory_space<vmem>>, vector<1x1x128xf32>
    %358 = vector.shape_cast %357 : vector<1x1x128xf32> to vector<1x128xf32>
    %359 = vector.broadcast %358 : vector<1x128xf32> to vector<32x128xf32>
    %360 = arith.addf %356, %359 : vector<32x128xf32>
    %cst_166 = arith.constant 5.000000e-01 : f32
    %361 = vector.broadcast %cst_166 : f32 to vector<32x128xf32>
    %362 = arith.mulf %361, %360 : vector<32x128xf32>
    %cst_167 = arith.constant 4.471500e-02 : f32
    %363 = vector.broadcast %cst_167 : f32 to vector<32x128xf32>
    %364 = arith.mulf %363, %360 : vector<32x128xf32>
    %365 = arith.mulf %364, %360 : vector<32x128xf32>
    %366 = arith.mulf %365, %360 : vector<32x128xf32>
    %367 = arith.addf %360, %366 : vector<32x128xf32>
    %cst_168 = arith.constant 0.797884583 : f32
    %368 = vector.broadcast %cst_168 : f32 to vector<32x128xf32>
    %369 = arith.mulf %368, %367 : vector<32x128xf32>
    %370 = math.tanh %369 : vector<32x128xf32>
    %cst_169 = arith.constant 1.000000e+00 : f32
    %371 = vector.broadcast %cst_169 : f32 to vector<32x128xf32>
    %372 = arith.addf %371, %370 : vector<32x128xf32>
    %373 = arith.mulf %362, %372 : vector<32x128xf32>
    %374 = arith.truncf %373 : vector<32x128xf32> to vector<32x128xbf16>
    %c1_170 = arith.constant 1 : index
    %c0_171 = arith.constant 0 : index
    %c0_172 = arith.constant 0 : index
    %375 = vector.load %arg14[%c1_170, %c0_171, %c0_172] : memref<2x128x64xbf16, #tpu.memory_space<vmem>>, vector<1x128x64xbf16>
    %376 = vector.shape_cast %375 : vector<1x128x64xbf16> to vector<128x64xbf16>
    %cst_173 = arith.constant dense<0.000000e+00> : vector<32x64xf32>
    %377 = tpu.matmul %374, %376, %cst_173 {dimension_numbers = #tpu.dot_dimension_numbers<[1], [0], [0], [1], [0, 0, 1, 1], [], []>} : vector<32x128xbf16>, vector<128x64xbf16>, vector<32x64xf32> -> vector<32x64xf32>
    %c1_174 = arith.constant 1 : index
    %c0_175 = arith.constant 0 : index
    %c0_176 = arith.constant 0 : index
    %378 = vector.load %arg15[%c1_174, %c0_175, %c0_176] : memref<2x1x64xf32, #tpu.memory_space<vmem>>, vector<1x1x64xf32>
    %379 = vector.shape_cast %378 : vector<1x1x64xf32> to vector<1x64xf32>
    %380 = vector.broadcast %379 : vector<1x64xf32> to vector<32x64xf32>
    %381 = arith.addf %377, %380 : vector<32x64xf32>
    %382 = arith.addf %326, %381 : vector<32x64xf32>
    %c0_177 = arith.constant 0 : index
    %c0_178 = arith.constant 0 : index
    %383 = vector.load %arg16[%c0_177, %c0_178] : memref<1x64xf32, #tpu.memory_space<vmem>>, vector<1x64xf32>
    %c0_179 = arith.constant 0 : index
    %c0_180 = arith.constant 0 : index
    %384 = vector.load %arg17[%c0_179, %c0_180] : memref<1x64xf32, #tpu.memory_space<vmem>>, vector<1x64xf32>
    %cst_181 = arith.constant dense<0.000000e+00> : vector<32xf32>
    %385 = vector.multi_reduction <add>, %382, %cst_181 [1] : vector<32x64xf32> to vector<32xf32>
    %386 = vector.shape_cast %385 : vector<32xf32> to vector<32x1xf32>
    %cst_182 = arith.constant 6.400000e+01 : f32
    %387 = vector.broadcast %cst_182 : f32 to vector<32x1xf32>
    %388 = arith.divf %386, %387 : vector<32x1xf32>
    %389 = vector.broadcast %388 : vector<32x1xf32> to vector<32x64xf32>
    %390 = arith.subf %382, %389 : vector<32x64xf32>
    %391 = arith.mulf %390, %390 : vector<32x64xf32>
    %cst_183 = arith.constant dense<0.000000e+00> : vector<32xf32>
    %392 = vector.multi_reduction <add>, %391, %cst_183 [1] : vector<32x64xf32> to vector<32xf32>
    %393 = vector.shape_cast %392 : vector<32xf32> to vector<32x1xf32>
    %cst_184 = arith.constant 6.400000e+01 : f32
    %394 = vector.broadcast %cst_184 : f32 to vector<32x1xf32>
    %395 = arith.divf %393, %394 : vector<32x1xf32>
    %396 = vector.broadcast %388 : vector<32x1xf32> to vector<32x64xf32>
    %397 = arith.subf %382, %396 : vector<32x64xf32>
    %cst_185 = arith.constant 9.99999997E-7 : f32
    %398 = vector.broadcast %cst_185 : f32 to vector<32x1xf32>
    %399 = arith.addf %395, %398 : vector<32x1xf32>
    %400 = math.rsqrt %399 : vector<32x1xf32>
    %401 = vector.broadcast %400 : vector<32x1xf32> to vector<32x64xf32>
    %402 = arith.mulf %397, %401 : vector<32x64xf32>
    %403 = vector.broadcast %383 : vector<1x64xf32> to vector<32x64xf32>
    %404 = arith.mulf %402, %403 : vector<32x64xf32>
    %405 = vector.broadcast %384 : vector<1x64xf32> to vector<32x64xf32>
    %406 = arith.addf %404, %405 : vector<32x64xf32>
    %407 = vector.shape_cast %406 : vector<32x64xf32> to vector<2x16x64xf32>
    %c0_186 = arith.constant 0 : index
    %c0_187 = arith.constant 0 : index
    %c0_188 = arith.constant 0 : index
    %408 = vector.load %arg18[%c0_186, %c0_187, %c0_188] : memref<2x16x64xf32, #tpu.memory_space<vmem>>, vector<2x16x64xf32>
    tpu.vector_store %arg18[%c0_186, %c0_187, %c0_188], %407 {strides = array<i32>} : memref<2x16x64xf32, #tpu.memory_space<vmem>>, vector<2x16x64xf32>,
    return
  }
  func.func @transform_0(%arg0: i32) -> (i32, i32, i32) {
    %c0_i32 = arith.constant 0 : i32
    %c0_i32_0 = arith.constant 0 : i32
    %c0_i32_1 = arith.constant 0 : i32
    return %arg0, %c0_i32, %c0_i32_0 : i32, i32, i32
  }
  func.func @transform_1(%arg0: i32) -> (i32, i32) {
    %c0_i32 = arith.constant 0 : i32
    %c0_i32_0 = arith.constant 0 : i32
    %c0_i32_1 = arith.constant 0 : i32
    return %c0_i32, %c0_i32_0 : i32, i32
  }
  func.func @transform_2(%arg0: i32) -> (i32, i32) {
    %c0_i32 = arith.constant 0 : i32
    %c0_i32_0 = arith.constant 0 : i32
    %c0_i32_1 = arith.constant 0 : i32
    return %c0_i32, %c0_i32_0 : i32, i32
  }
  func.func @transform_3(%arg0: i32) -> (i32, i32, i32) {
    %c0_i32 = arith.constant 0 : i32
    %c0_i32_0 = arith.constant 0 : i32
    %c0_i32_1 = arith.constant 0 : i32
    %c0_i32_2 = arith.constant 0 : i32
    return %c0_i32, %c0_i32_0, %c0_i32_1 : i32, i32, i32
  }
  func.func @transform_4(%arg0: i32) -> (i32, i32, i32) {
    %c0_i32 = arith.constant 0 : i32
    %c0_i32_0 = arith.constant 0 : i32
    %c0_i32_1 = arith.constant 0 : i32
    %c0_i32_2 = arith.constant 0 : i32
    return %c0_i32, %c0_i32_0, %c0_i32_1 : i32, i32, i32
  }
  func.func @transform_5(%arg0: i32) -> (i32, i32, i32) {
    %c0_i32 = arith.constant 0 : i32
    %c0_i32_0 = arith.constant 0 : i32
    %c0_i32_1 = arith.constant 0 : i32
    %c0_i32_2 = arith.constant 0 : i32
    return %c0_i32, %c0_i32_0, %c0_i32_1 : i32, i32, i32
  }
  func.func @transform_6(%arg0: i32) -> (i32, i32, i32) {
    %c0_i32 = arith.constant 0 : i32
    %c0_i32_0 = arith.constant 0 : i32
    %c0_i32_1 = arith.constant 0 : i32
    %c0_i32_2 = arith.constant 0 : i32
    return %c0_i32, %c0_i32_0, %c0_i32_1 : i32, i32, i32
  }
  func.func @transform_7(%arg0: i32) -> (i32, i32, i32, i32) {
    %c0_i32 = arith.constant 0 : i32
    %c0_i32_0 = arith.constant 0 : i32
    %c0_i32_1 = arith.constant 0 : i32
    %c0_i32_2 = arith.constant 0 : i32
    %c0_i32_3 = arith.constant 0 : i32
    return %c0_i32, %c0_i32_0, %c0_i32_1, %c0_i32_2 : i32, i32, i32, i32
  }
  func.func @transform_8(%arg0: i32) -> (i32, i32, i32) {
    %c0_i32 = arith.constant 0 : i32
    %c0_i32_0 = arith.constant 0 : i32
    %c0_i32_1 = arith.constant 0 : i32
    %c0_i32_2 = arith.constant 0 : i32
    return %c0_i32, %c0_i32_0, %c0_i32_1 : i32, i32, i32
  }
  func.func @transform_9(%arg0: i32) -> (i32, i32, i32) {
    %c0_i32 = arith.constant 0 : i32
    %c0_i32_0 = arith.constant 0 : i32
    %c0_i32_1 = arith.constant 0 : i32
    %c0_i32_2 = arith.constant 0 : i32
    return %c0_i32, %c0_i32_0, %c0_i32_1 : i32, i32, i32
  }
  func.func @transform_10(%arg0: i32) -> (i32, i32, i32) {
    %c0_i32 = arith.constant 0 : i32
    %c0_i32_0 = arith.constant 0 : i32
    %c0_i32_1 = arith.constant 0 : i32
    %c0_i32_2 = arith.constant 0 : i32
    return %c0_i32, %c0_i32_0, %c0_i32_1 : i32, i32, i32
  }
  func.func @transform_11(%arg0: i32) -> (i32, i32, i32) {
    %c0_i32 = arith.constant 0 : i32
    %c0_i32_0 = arith.constant 0 : i32
    %c0_i32_1 = arith.constant 0 : i32
    %c0_i32_2 = arith.constant 0 : i32
    return %c0_i32, %c0_i32_0, %c0_i32_1 : i32, i32, i32
  }
  func.func @transform_12(%arg0: i32) -> (i32, i32, i32) {
    %c0_i32 = arith.constant 0 : i32
    %c0_i32_0 = arith.constant 0 : i32
    %c0_i32_1 = arith.constant 0 : i32
    %c0_i32_2 = arith.constant 0 : i32
    return %c0_i32, %c0_i32_0, %c0_i32_1 : i32, i32, i32
  }
  func.func @transform_13(%arg0: i32) -> (i32, i32, i32) {
    %c0_i32 = arith.constant 0 : i32
    %c0_i32_0 = arith.constant 0 : i32
    %c0_i32_1 = arith.constant 0 : i32
    %c0_i32_2 = arith.constant 0 : i32
    return %c0_i32, %c0_i32_0, %c0_i32_1 : i32, i32, i32
  }
  func.func @transform_14(%arg0: i32) -> (i32, i32, i32) {
    %c0_i32 = arith.constant 0 : i32
    %c0_i32_0 = arith.constant 0 : i32
    %c0_i32_1 = arith.constant 0 : i32
    %c0_i32_2 = arith.constant 0 : i32
    return %c0_i32, %c0_i32_0, %c0_i32_1 : i32, i32, i32
  }
  func.func @transform_15(%arg0: i32) -> (i32, i32) {
    %c0_i32 = arith.constant 0 : i32
    %c0_i32_0 = arith.constant 0 : i32
    %c0_i32_1 = arith.constant 0 : i32
    return %c0_i32, %c0_i32_0 : i32, i32
  }
  func.func @transform_16(%arg0: i32) -> (i32, i32) {
    %c0_i32 = arith.constant 0 : i32
    %c0_i32_0 = arith.constant 0 : i32
    %c0_i32_1 = arith.constant 0 : i32
    return %c0_i32, %c0_i32_0 : i32, i32
  }
  func.func @transform_17(%arg0: i32) -> (i32, i32, i32) {
    %c0_i32 = arith.constant 0 : i32
    %c0_i32_0 = arith.constant 0 : i32
    %c0_i32_1 = arith.constant 0 : i32
    return %arg0, %c0_i32, %c0_i32_0 : i32, i32, i32
  }
}

</mosaic_0001>

<bundles_post_ra>
// kernel: tpu_custom_call.1
= control target key start
LH: loop header
LB: loop body
LE: loop exit
PB: predicated region body
PF: predicated region fallthrough
CT: control target
= control target key end

     0   :  { %s5743_s0 = inlined_call_operand.vmem [shape: f32[2,16,192], index: 0, kind: input, shape index: {}]   ;;  %s5744_s1 = inlined_call_operand.vmem [shape: bf16[192,64], index: 1, kind: input, shape index: {}]   ;;  %s5745_s2 = inlined_call_operand.vmem [shape: f32[16,64], index: 2, kind: input, shape index: {}]   ;;  %s5746_s3 = inlined_call_operand.vmem [shape: f32[2,1,64], index: 3, kind: input, shape index: {}]   ;;  %s5747_s4 = inlined_call_operand.vmem [shape: f32[2,1,64], index: 4, kind: input, shape index: {}]   ;;  %s5748_s5 = inlined_call_operand.vmem [shape: bf16[2,64,192], index: 5, kind: input, shape index: {}]   ;;  %s5749_s6 = inlined_call_operand.vmem [shape: f32[2,1,192], index: 6, kind: input, shape index: {}]   ;;  %s5750_s7 = inlined_call_operand.vmem [shape: bf16[2,4,16,64], index: 7, kind: input, shape index: {}]   ;;  %s5751_s8 = inlined_call_operand.vmem [shape: f32[2,1,64], index: 8, kind: input, shape index: {}]   ;;  %s5752_s9 = inlined_call_operand.vmem [shape: f32[2,1,64], index: 9, kind: input, shape index: {}]   ;;  %s5753_s10 = inlined_call_operand.vmem [shape: f32[2,1,64], index: 10, kind: input, shape index: {}]   ;;  %s5754_s11 = inlined_call_operand.vmem [shape: bf16[2,64,128], index: 11, kind: input, shape index: {}]   ;;  %s5755_s12 = inlined_call_operand.vmem [shape: f32[2,1,128], index: 12, kind: input, shape index: {}]   ;;  %s5756_s13 = inlined_call_operand.vmem [shape: bf16[2,128,64], index: 13, kind: input, shape index: {}]   ;;  %s5757_s14 = inlined_call_operand.vmem [shape: f32[2,1,64], index: 14, kind: input, shape index: {}]   ;;  %s5758_s15 = inlined_call_operand.vmem [shape: f32[1,64], index: 15, kind: input, shape index: {}]   ;;  %s5759_s16 = inlined_call_operand.vmem [shape: f32[1,64], index: 16, kind: input, shape index: {}]   ;;  %s5760_s17 = inlined_call_operand.hbm [shape: f32[2,16,64], index: 17, kind: output, shape index: {}]  }
   0x1   :  { %5765 = sst [smem:[#allocation5_spill]] %s5743_s0 }
   0x2   :  { %5766 = sst [smem:[#allocation6_spill]] %s5744_s1 }
   0x3   :  { %s5767_s26 = sld [smem:[#allocation6_spill]]  ;;  %v4793_v1 = vmov 0   ;;  %vm166_vm0 = vcmask 523264  }
   0x4   :  { %173 = vmatprep.subr.bf16.mxu0 %v4793_v1  ;;  %403 = vmatprep.mubr.bf16.mxu1 %v4793_v1  ;;  %s5768_s20 = sld [smem:[#allocation5_spill]] }
   0x9   :  { %v4519_v0 = vld [vmem:[%s5767_s26 + $0x38] sm:$0xff]   ;;  %v4520_v2 = vld [vmem:[%s5767_s26 + $0x30] sm:$0xff]   ;;  %v4521_v3 = vld [vmem:[%s5767_s26 + $0x28] sm:$0xff]  }
   0xa   :  { %174 = vmatpush1.bf16.msra.mxu0 %v4519_v0  ;;  %v4522_v4 = vld [vmem:[%s5767_s26 + $0x20] sm:$0xff]   ;;  %v59_v5 = vld [vmem:[%s5768_s20 + $0x8] sm:$0xff]  ;;  %v61_v6 = vld [vmem:[%s5768_s20 + $0x18] sm:$0xff] }
   0xb   :  { %175 = vmatprep.subr.bf16.mxu0 %v4793_v1  ;;  %v67_v7 = vpack.c.bf16 %v61_v6, %v59_v5  ;;  %v4523_v8 = vld [vmem:[%s5767_s26 + $0x18] sm:$0xff]   ;;  %v4524_v9 = vld [vmem:[%s5767_s26 + $0x10] sm:$0xff]   ;;  %v4525_v10 = vld [vmem:[%s5767_s26 + $0x8] sm:$0xff]  }
   0xc   :  { %v4526_v11 = vld [vmem:[%s5767_s26] sm:$0xff]   ;;  %v4527_v12 = vld [vmem:[%s5767_s26 + $0x58] sm:$0xff]   ;;  %v4528_v13 = vld [vmem:[%s5767_s26 + $0x50] sm:$0xff]  }
   0xd   :  { %3906 = vmatprep.mubr.msk.bf16.mxu0 %vm166_vm0, %v67_v7  ;;  %v4529_v14 = vld [vmem:[%s5767_s26 + $0x48] sm:$0xff]  }
   0xe   :  { %176 = vmatpush1.bf16.msra.mxu0 %v4520_v2 }
   0xf   :  { %177 = vmatprep.subr.bf16.mxu0 %v4793_v1 }
  0x12   :  { %178 = vmatpush1.bf16.msra.mxu0 %v4521_v3 }
  0x13   :  { %179 = vmatprep.subr.bf16.mxu0 %v4793_v1 }
  0x16   :  { %180 = vmatpush1.bf16.msra.mxu0 %v4522_v4 }
  0x17   :  { %181 = vmatprep.subr.bf16.mxu0 %v4793_v1 }
  0x1a   :  { %182 = vmatpush1.bf16.msra.mxu0 %v4523_v8 }
  0x1b   :  { %183 = vmatprep.subr.bf16.mxu0 %v4793_v1 }
  0x1e   :  { %184 = vmatpush1.bf16.msra.mxu0 %v4524_v9 }
  0x1f   :  { %185 = vmatprep.subr.bf16.mxu0 %v4793_v1 }
  0x22   :  { %186 = vmatpush1.bf16.msra.mxu0 %v4525_v10 }
  0x23   :  { %187 = vmatprep.subr.bf16.mxu0 %v4793_v1 }
  0x26   :  { %188 = vmatpush1.bf16.msra.mxu0 %v4526_v11 }
  0x27   :  { %197 = vmatprep.subr.bf16.mxu0 %v4793_v1 }
  0x2a   :  { %198 = vmatpush2.bf16.msra.mxu0 %v4527_v12 }
  0x2b   :  { %199 = vmatprep.subr.bf16.mxu0 %v4793_v1 }
  0x2e   :  { %200 = vmatpush2.bf16.msra.mxu0 %v4528_v13 }
  0x2f   :  { %201 = vmatprep.subr.bf16.mxu0 %v4793_v1 }
  0x30   :  { %22 = vsyncpa [#allocation3], 0  ;;  %v4530_v15 = vld [vmem:[%s5767_s26 + $0x40] sm:$0xff]   ;;  %v60_v17 = vld [vmem:[%s5768_s20 + $0x10] sm:$0xff]  ;;  %vm4795_vm1 = vmmov 0   ;;  %s4796_s19 = smov 64  }
  0x31   :  { %v58_v16 = vld [vmem:[%s5768_s20] sm:$0xff]  ;;  %v63_v18 = vld [vmem:[%s5768_s20 + $0x28] sm:$0xff]  ;;  %v65_v19 = vld [vmem:[%s5768_s20 + $0x38] sm:$0xff]  ;;  %vm431_vm2 = vcmask 130048   ;;  %s4797_s1 = smov 112   ;;  %s4798_s26 = smov 48  }
  0x32   :  { %202 = vmatpush2.bf16.msra.mxu0 %v4529_v14  ;;  %v66_v20 = vpack.c.bf16 %v60_v17, %v58_v16  ;;  %v69_v21 = vpack.c.bf16 %v65_v19, %v63_v18  ;;  %v62_v22 = vld [vmem:[%s5768_s20 + $0x20] sm:$0xff]  ;;  %v64_v23 = vld [vmem:[%s5768_s20 + $0x30] sm:$0xff]  ;;  %v223_v29 = vld [vmem:[%s5745_s2 + $0x8] sm:$0xff]  ;;  %s4799_s23 = smov 32   ;;  %s4800_s24 = smov 96  }
  0x33   :  { %203 = vmatprep.subr.bf16.mxu0 %v4793_v1  ;;  %v68_v24 = vpack.c.bf16 %v64_v23, %v62_v22  ;;  %v222_v25 = vld [vmem:[%s5745_s2] sm:$0xff]  ;;  %v4531_v63 = vld [vmem:[%s5748_s5 + $0x34] ss:$8 sps:$4 sm:$0xff]   ;;  %v4533_v0 = vld [vmem:[%s5748_s5 + $0x30] ss:$8 sps:$4 sm:$0xff]   ;;  %s4801_s28 = smov 16  }
  0x34   :  { %379 = vmatprep.subr.bf16.mxu1 %v4531_v63  ;;  %v4534_v2 = vld [vmem:[%s5748_s5 + $0x24] ss:$8 sps:$4 sm:$0xff]   ;;  %v4536_v3 = vld [vmem:[%s5748_s5 + $0x20] ss:$8 sps:$4 sm:$0xff]   ;;  %v4537_v4 = vld [vmem:[%s5748_s5 + $0x14] ss:$8 sps:$4 sm:$0xff]  }
  0x35   :  { %380 = vmatpush1.bf16.msra.mxu1 %v4533_v0  ;;  %v4539_v5 = vld [vmem:[%s5748_s5 + $0x10] ss:$8 sps:$4 sm:$0xff]   ;;  %v4540_v6 = vld [vmem:[%s5748_s5 + $0x4] ss:$8 sps:$4 sm:$0xff]   ;;  %v4542_v7 = vld [vmem:[%s5748_s5] ss:$8 sps:$4 sm:$0xff]  }
  0x36   :  { %204 = vmatpush2.bf16.msra.mxu0 %v4530_v15  ;;  %381 = vmatprep.subr.bf16.mxu1 %v4534_v2  ;;  %v3908_v22 = vld [vmem:[%s5746_s3] ss:$0 sm:$0xff]  ;;  %s5763_s2 = smov 80  }
  0x39   :  { %206 = vmatmul.mubr.bf16.vlgmr.msra.gmra.mxu0 %v66_v20  ;;  %382 = vmatpush1.bf16.msra.mxu1 %v4536_v3 }
  0x3a   :  { %3907 = vmatprep.mubr.msk.bf16.mxu0 %vm166_vm0, %v69_v21  ;;  %383 = vmatprep.subr.bf16.mxu1 %v4537_v4 }
  0x3d   :  { %384 = vmatpush1.bf16.msra.mxu1 %v4539_v5 }
  0x3e   :  { %385 = vmatprep.subr.bf16.mxu1 %v4540_v6 }
  0x41   :  { %214 = vmatmul.mubr.bf16.gmra.mxu0 %v68_v24  ;;  %386 = vmatpush1.bf16.msra.mxu1 %v4542_v7 }
  0xf9   :  { %v207_v26 = vpop.f32.mrf.mxu0 }
  0xfa   :  { %v4974_v27 = vadd.f32 %v222_v25, %v207_v26  ;;  %v3909_v26 = vld [vmem:[%s5747_s4] ss:$0 sm:$0xff] }
  0xfb   :  { %v209_v28 = vpop.f32.mrf.mxu0 }
  0xfc   :  { %v230_v30 = vsel %vm166_vm0, %v4974_v27, 0.0 }
  0xfd   :  { %231 = vadd.xlane.f32.xlu0 %v230_v30  ;;  %v210_v31 = vpop.f32.mrf.mxu0 }
  0xfe   :  { %v4981_v32 = vadd.f32 %v223_v29, %v210_v31 }
  0xff   :  { %v212_v33 = vpop.f32.mrf.mxu0 }
 0x100   :  { %v233_v34 = vsel %vm166_vm0, %v4981_v32, 0.0 }
 0x101   :  { %234 = vadd.xlane.f32.xlu0 %v233_v34  ;;  %v215_v35 = vpop.f32.mrf.mxu0 }
 0x102   :  { %v4985_v36 = vadd.f32 %v222_v25, %v215_v35 }
 0x103   :  { %v217_v37 = vpop.f32.mrf.mxu0 }
 0x104   :  { %v236_v38 = vsel %vm166_vm0, %v4985_v36, 0.0 }
 0x105   :  { %237 = vadd.xlane.f32.xlu1 %v236_v38  ;;  %v218_v39 = vpop.f32.mrf.mxu0 }
 0x106   :  { %v4989_v40 = vadd.f32 %v223_v29, %v218_v39 }
 0x107   :  { %v220_v41 = vpop.f32.mrf.mxu0 }
 0x108   :  { %v239_v42 = vsel %vm166_vm0, %v4989_v40, 0.0 }
 0x109   :  { %240 = vadd.xlane.f32.xlu1 %v239_v42 }
 0x186   :  { %v232_v43 = vpop.xlane.xlu0 %231 }
 0x187   :  { %v243_v44 = vmul.f32 0.015625, %v232_v43 }
 0x189   :  { %v247_v45 = vsub.f32 %v4974_v27, %v243_v44  ;;  %v315_v44 = vlaneseq }
 0x18a   :  { %v235_v46 = vpop.xlane.xlu0 %234 }
 0x18b   :  { %v244_v47 = vmul.f32 0.015625, %v235_v46  ;;  %v251_v48 = vmul.f32 %v247_v45, %v247_v45  ;;  %v4794_v46 = vmov 0.0  }
 0x18c   :  { %4202 = vmatprep.subr.bf16.mxu1 %v4794_v46  ;;  %4238 = vmatprep.subr.bf16.mxu0 %v4794_v46 }
 0x18d   :  { %v248_v49 = vsub.f32 %v4981_v32, %v244_v47  ;;  %v255_v50 = vsel %vm166_vm0, %v251_v48, 0.0  ;;  %v313_v48 = vld [vmem:[%s5749_s6] sm:$0x3]  ;;  %4240 = vmatprep.mubr.msk.bf16.mxu0 %vm4795_vm1, %v4794_v46 }
 0x18e   :  { %256 = vadd.xlane.f32.xlu0 %v255_v50  ;;  %v238_v51 = vpop.xlane.xlu1 %237 }
 0x18f   :  { %v245_v52 = vmul.f32 0.015625, %v238_v51  ;;  %v252_v53 = vmul.f32 %v248_v49, %v248_v49 }
 0x191   :  { %v249_v54 = vsub.f32 %v4985_v36, %v245_v52  ;;  %v258_v55 = vsel %vm166_vm0, %v252_v53, 0.0 }
 0x192   :  { %259 = vadd.xlane.f32.xlu1 %v258_v55  ;;  %v241_v56 = vpop.xlane.xlu1 %240 }
 0x193   :  { %v246_v57 = vmul.f32 0.015625, %v241_v56  ;;  %v253_v58 = vmul.f32 %v249_v54, %v249_v54 }
 0x195   :  { %v250_v59 = vsub.f32 %v4989_v40, %v246_v57  ;;  %v261_v60 = vsel %vm166_vm0, %v253_v58, 0.0 }
 0x196   :  { %262 = vadd.xlane.f32.xlu0 %v261_v60 }
 0x197   :  { %v254_v61 = vmul.f32 %v250_v59, %v250_v59 }
 0x199   :  { %v264_v62 = vsel %vm166_vm0, %v254_v61, 0.0 }
 0x19a   :  { %265 = vadd.xlane.f32.xlu1 %v264_v62 }
 0x217   :  { %v257_v8 = vpop.xlane.xlu0 %256 }
 0x218   :  { %v267_v9 = vmul.f32 0.015625, %v257_v8 }
 0x21a   :  { %v271_v10 = vadd.f32 1e-06, %v267_v9 }
 0x21b   :  { %v260_v11 = vpop.xlane.xlu1 %259 }
 0x21c   :  { %4587 = vrsqrt.f32 %v271_v10  ;;  %v268_v12 = vmul.f32 0.015625, %v260_v11 }
 0x21e   :  { %v272_v13 = vadd.f32 1e-06, %v268_v12 }
 0x21f   :  { %v263_v14 = vpop.xlane.xlu0 %262 }
 0x220   :  { %4589 = vrsqrt.f32 %v272_v13  ;;  %v269_v15 = vmul.f32 0.015625, %v263_v14 }
 0x222   :  { %v273_v16 = vadd.f32 1e-06, %v269_v15 }
 0x223   :  { %v266_v17 = vpop.xlane.xlu1 %265 }
 0x224   :  { %4591 = vrsqrt.f32 %v273_v16  ;;  %v270_v18 = vmul.f32 0.015625, %v266_v17 }
 0x226   :  { %v274_v19 = vadd.f32 1e-06, %v270_v18 }
 0x228   :  { %4593 = vrsqrt.f32 %v274_v19 }
 0x229   :  { %v4588_v20 = vpop.eup %4587 }
 0x22a   :  { %v279_v21 = vmul.f32 %v4588_v20, %v247_v45  ;;  %v5034_v45 = vshrl.u32 %v315_v44, 7 }
 0x22c   :  { %v289_v25 = vmul.f32 %v3908_v22, %v279_v21  ;;  %v317_v47 = vsub.s32 0, %v5034_v45 }
 0x22d   :  { %v4590_v23 = vpop.eup %4589 }
 0x22e   :  { %v280_v24 = vmul.f32 %v4590_v23, %v248_v49  ;;  %v299_v30 = vadd.f32 %v3909_v26, %v289_v25  ;;  %v321_v49 = vsub.s32 1, %v5034_v45  ;;  %v318_v51 = vrot.slane %v313_v48, %v317_v47 }
 0x230   :  { %v290_v28 = vmul.f32 %v3908_v22, %v280_v24  ;;  %v322_v53 = vrot.slane %v313_v48, %v321_v49 }
 0x231   :  { %v4592_v29 = vpop.eup %4591 }
 0x232   :  { %v300_v31 = vadd.f32 %v3909_v26, %v290_v28  ;;  %v281_v33 = vmul.f32 %v4592_v29, %v249_v54 }
 0x234   :  { %v303_v34 = vpack.c.bf16 %v300_v31, %v299_v30  ;;  %v291_v38 = vmul.f32 %v3908_v22, %v281_v33 }
 0x235   :  { %v4594_v35 = vpop.eup %4593 }
 0x236   :  { %3918 = vmatmul.mubr.msk.bf16.vlgmr.msra.gmra.mxu1 %vm166_vm0, %v303_v34  ;;  %v282_v37 = vmul.f32 %v4594_v35, %v250_v59  ;;  %v301_v41 = vadd.f32 %v3909_v26, %v291_v38 }
 0x237   :  { %413 = vmatprep.mubr.bf16.mxu1 %v4793_v1 }
 0x238   :  { %v292_v39 = vmul.f32 %v3908_v22, %v282_v37 }
 0x23a   :  { %v302_v42 = vadd.f32 %v3909_v26, %v292_v39 }
 0x23c   :  { %v304_v43 = vpack.c.bf16 %v302_v42, %v301_v41 }
 0x23e   :  { %3919 = vmatmul.mubr.msk.bf16.gmra.mxu1 %vm166_vm0, %v304_v43 }
 0x23f   :  { %4204 = vmatprep.mubr.msk.bf16.mxu1 %vm4795_vm1, %v4794_v46 }
 0x2f6   :  { %v405_v50 = vpop.f32.mrf.mxu1 }
 0x2f7   :  { %v406_v55 = vadd.f32 %v405_v50, %v318_v51 }
 0x2f8   :  { %v407_v52 = vpop.f32.mrf.mxu1 }
 0x2f9   :  { %v408_v58 = vadd.f32 %v407_v52, %v322_v53 }
 0x2fa   :  { %v409_v54 = vpop.f32.mrf.mxu1 }
 0x2fb   :  { %v410_v56 = vadd.f32 %v409_v54, %v318_v51 }
 0x2fc   :  { %v411_v57 = vpop.f32.mrf.mxu1 }
 0x2fd   :  { %v5051_v59 = vpack.c.bf16 %v410_v56, %v406_v55  ;;  %v412_v60 = vadd.f32 %v411_v57, %v322_v53 }
 0x2fe   :  { %v415_v61 = vpop.f32.mrf.mxu1 }
 0x2ff   :  { %v5053_v62 = vpack.c.bf16 %v412_v60, %v408_v58  ;;  %429 = vrot.lane.b32.xlu0 %v5051_v59, %s4796_s19  ;;  %v416_v3 = vadd.f32 %v415_v61, %v318_v51 }
 0x300   :  { %v417_v63 = vpop.f32.mrf.mxu1 }
 0x301   :  { %v418_v0 = vadd.f32 %v417_v63, %v322_v53 }
 0x302   :  { %v419_v2 = vpop.f32.mrf.mxu1 }
 0x303   :  { %v420_v4 = vadd.f32 %v419_v2, %v318_v51 }
 0x304   :  { %v421_v5 = vpop.f32.mrf.mxu1 }
 0x305   :  { %v5057_v6 = vpack.c.bf16 %v420_v4, %v416_v3  ;;  %v422_v7 = vadd.f32 %v421_v5, %v322_v53 }
 0x307   :  { %v5059_v8 = vpack.c.bf16 %v422_v7, %v418_v0  ;;  %480 = vrot.lane.b32.xlu1 %v5057_v6, %s4796_s19 }
 0x371   :  { %v430_v9 = vpop.permute.xlu0 %429 }
 0x372   :  { %v436_v10 = vsel %vm431_vm2, %v430_v9, 0 }
 0x373   :  { %4203 = vmatpush3.bf16.xpose.msra.mxu1 %v436_v10 }
 0x374   :  { %4208 = vmatprep.subr.bf16.mxu1 %v4794_v46 }
 0x379   :  { %v481_v11 = vpop.permute.xlu1 %480 }
 0x37a   :  { %v486_v12 = vsel %vm431_vm2, %v481_v11, 0  ;;  %4205 = vmatmul.mubr.msk.bf16.vlgmr.msra.gmra.mxu1 %vm431_vm2, %v5051_v59 }
 0x37b   :  { %4209 = vmatpush3.bf16.xpose.msra.mxu1 %v486_v12  ;;  %4210 = vmatprep.mubr.msk.bf16.mxu1 %vm4795_vm1, %v4794_v46 }
 0x37c   :  { %4214 = vmatprep.subr.bf16.mxu1 %v4794_v46 }
 0x382   :  { %4211 = vmatmul.mubr.msk.bf16.vlgmr.msra.gmra.mxu1 %vm431_vm2, %v5057_v6 }
 0x383   :  { %4215 = vmatpush3.bf16.msra.mxu1 %v5053_v62  ;;  %4216 = vmatprep.mubr.msk.bf16.mxu1 %vm4795_vm1, %v4794_v46 }
 0x384   :  { %4220 = vmatprep.subr.bf16.mxu1 %v4794_v46 }
 0x43a   :  { %v472_v13 = vpop.f32.mrf.mxu1 }
 0x43b   :  { %v529_v14 = vsel %vm431_vm2, %v472_v13, -inf }
 0x43c   :  { %v4206_v15 = vpop.f32.mrf.mxu1  ;;  %530 = vmax.xlane.f32.xlu1 %v529_v14 }
 0x43e   :  { %v475_v16 = vpop.f32.mrf.mxu1 }
 0x43f   :  { %v532_v17 = vsel %vm431_vm2, %v475_v16, -inf }
 0x440   :  { %533 = vmax.xlane.f32.xlu0 %v532_v17  ;;  %v4207_v18 = vpop.f32.mrf.mxu1 }
 0x442   :  { %v522_v19 = vpop.f32.mrf.mxu1 }
 0x443   :  { %v535_v20 = vsel %vm431_vm2, %v522_v19, -inf }
 0x444   :  { %536 = vmax.xlane.f32.xlu0 %v535_v20  ;;  %v4212_v21 = vpop.f32.mrf.mxu1 }
 0x446   :  { %v525_v22 = vpop.f32.mrf.mxu1 }
 0x447   :  { %v538_v23 = vsel %vm431_vm2, %v525_v22, -inf }
 0x448   :  { %539 = vmax.xlane.f32.xlu1 %v538_v23  ;;  %v4213_v24 = vpop.f32.mrf.mxu1 }
 0x459   :  { %667 = vrot.lane.b32.xlu1 %v5051_v59, %s4797_s1 }
 0x45a   :  { %669 = vrot.lane.b32.xlu0 %v5051_v59, %s4798_s26 }
 0x45d   :  { %720 = vrot.lane.b32.xlu1 %v5057_v6, %s4798_s26 }
 0x461   :  { %718 = vrot.lane.b32.xlu1 %v5057_v6, %s4797_s1 }
 0x4c5   :  { %v531_v25 = vpop.xlane.xlu1 %530 }
 0x4c6   :  { %v541_v26 = vsub.f32 %v472_v13, %v531_v25 }
 0x4c8   :  { %v545_v28 = vmul.f32 1.442695, %v541_v26 }
 0x4c9   :  { %v534_v29 = vpop.xlane.xlu0 %533 }
 0x4ca   :  { %v542_v30 = vsub.f32 %v475_v16, %v534_v29  ;;  %4595 = vpow2.f32 %v545_v28  ;;  %v4543_v28 = vld [vmem:[%s5750_s7] sm:$0xff]  }
 0x4cc   :  { %v547_v31 = vmul.f32 1.442695, %v542_v30 }
 0x4cd   :  { %v537_v33 = vpop.xlane.xlu0 %536 }
 0x4ce   :  { %4597 = vpow2.f32 %v547_v31  ;;  %v543_v34 = vsub.f32 %v522_v19, %v537_v33 }
 0x4d0   :  { %v549_v35 = vmul.f32 1.442695, %v543_v34 }
 0x4d1   :  { %v540_v37 = vpop.xlane.xlu1 %539  ;;  %v670_v50 = vpop.permute.xlu0 %669 }
 0x4d2   :  { %v544_v38 = vsub.f32 %v525_v22, %v540_v37  ;;  %4599 = vpow2.f32 %v549_v35  ;;  %v675_v53 = vsel %vm431_vm2, %v670_v50, 0 }
 0x4d4   :  { %v551_v39 = vmul.f32 1.442695, %v544_v38 }
 0x4d5   :  { %v668_v52 = vpop.permute.xlu1 %667 }
 0x4d6   :  { %4601 = vpow2.f32 %v551_v39 }
 0x4d7   :  { %v4596_v41 = vpop.eup %4595 }
 0x4d8   :  { %v553_v20 = vsel %vm431_vm2, %v4596_v41, 0.0 }
 0x4d9   :  { %v721_v54 = vpop.permute.xlu1 %720 }
 0x4da   :  { %v726_v55 = vsel %vm431_vm2, %v721_v54, 0 }
 0x4db   :  { %v4598_v42 = vpop.eup %4597 }
 0x4dc   :  { %v565_v43 = vpack.c.bf16 %v4598_v42, %v4596_v41  ;;  %v556_v18 = vsel %vm431_vm2, %v4598_v42, 0.0 }
 0x4dd   :  { %v719_v56 = vpop.permute.xlu1 %718 }
 0x4de   :  { %4217 = vmatmul.mubr.msk.bf16.vlgmr.msra.gmra.mxu1 %vm431_vm2, %v565_v43 }
 0x4df   :  { %4221 = vmatpush3.bf16.msra.mxu1 %v5059_v8  ;;  %4222 = vmatprep.mubr.msk.bf16.mxu1 %vm4795_vm1, %v4794_v46  ;;  %v4600_v44 = vpop.eup %4599 }
 0x4e0   :  { %4226 = vmatprep.subr.bf16.mxu1 %v4794_v46  ;;  %v559_v21 = vsel %vm431_vm2, %v4600_v44, 0.0 }
 0x4e3   :  { %v4602_v48 = vpop.eup %4601 }
 0x4e4   :  { %v566_v51 = vpack.c.bf16 %v4602_v48, %v4600_v44  ;;  %v562_v19 = vsel %vm431_vm2, %v4602_v48, 0.0 }
 0x4e6   :  { %4223 = vmatmul.mubr.msk.bf16.vlgmr.msra.gmra.mxu1 %vm431_vm2, %v566_v51 }
 0x4e7   :  { %4227 = vmatpush3.bf16.xpose.msra.mxu1 %v675_v53  ;;  %4228 = vmatprep.mubr.msk.bf16.mxu1 %vm4795_vm1, %v4794_v46 }
 0x4e8   :  { %4232 = vmatprep.subr.bf16.mxu1 %v4794_v46 }
 0x4ee   :  { %4229 = vmatmul.mubr.msk.bf16.vlgmr.msra.gmra.mxu1 %vm431_vm2, %v668_v52 }
 0x4ef   :  { %4233 = vmatpush3.bf16.xpose.msra.mxu1 %v726_v55  ;;  %4234 = vmatprep.mubr.msk.bf16.mxu1 %vm4795_vm1, %v4794_v46 }
 0x4f0   :  { %4244 = vmatprep.subr.bf16.mxu1 %v4794_v46 }
 0x4f6   :  { %4235 = vmatmul.mubr.msk.bf16.vlgmr.msra.gmra.mxu1 %vm431_vm2, %v719_v56 }
 0x4f7   :  { %4246 = vmatprep.mubr.msk.bf16.mxu1 %vm4795_vm1, %v4794_v46 }
 0x59e   :  { %v5107_v57 = vpop.f32.mrf.mxu1 }
 0x5a0   :  { %v4218_v58 = vpop.f32.mrf.mxu1 }
 0x5a2   :  { %v5109_v60 = vpop.f32.mrf.mxu1 }
 0x5a4   :  { %v4219_v61 = vpop.f32.mrf.mxu1 }
 0x5a6   :  { %v5111_v63 = vpop.f32.mrf.mxu1 }
 0x5a8   :  { %v4224_v0 = vpop.f32.mrf.mxu1 }
 0x5aa   :  { %v5113_v2 = vpop.f32.mrf.mxu1 }
 0x5ac   :  { %v4225_v3 = vpop.f32.mrf.mxu1 }
 0x5ae   :  { %v711_v4 = vpop.f32.mrf.mxu1 }
 0x5af   :  { %v769_v5 = vsel %vm431_vm2, %v711_v4, -inf }
 0x5b0   :  { %770 = vmax.xlane.f32.xlu0 %v769_v5  ;;  %v4230_v7 = vpop.f32.mrf.mxu1 }
 0x5b2   :  { %v714_v9 = vpop.f32.mrf.mxu1 }
 0x5b3   :  { %v772_v10 = vsel %vm431_vm2, %v714_v9, -inf }
 0x5b4   :  { %773 = vmax.xlane.f32.xlu1 %v772_v10  ;;  %v4231_v11 = vpop.f32.mrf.mxu1 }
 0x5b6   :  { %v762_v12 = vpop.f32.mrf.mxu1 }
 0x5b7   :  { %v775_v13 = vsel %vm431_vm2, %v762_v12, -inf }
 0x5b8   :  { %776 = vmax.xlane.f32.xlu0 %v775_v13  ;;  %v4236_v14 = vpop.f32.mrf.mxu1 }
 0x5ba   :  { %v765_v15 = vpop.f32.mrf.mxu1 }
 0x5bb   :  { %v778_v16 = vsel %vm431_vm2, %v765_v15, -inf }
 0x5bc   :  { %779 = vmax.xlane.f32.xlu0 %v778_v16  ;;  %v4237_v17 = vpop.f32.mrf.mxu1 }
 0x5c5   :  { %856 = vrot.lane.b32.xlu1 %v5059_v8, %s4797_s1 }
 0x5d2   :  { %808 = vrot.lane.b32.xlu0 %v5053_v62, %s4797_s1 }
 0x5e9   :  { %557 = vadd.xlane.f32.xlu1 %v556_v18 }
 0x5ed   :  { %563 = vadd.xlane.f32.xlu1 %v562_v19 }
 0x5f1   :  { %554 = vadd.xlane.f32.xlu0 %v553_v20 }
 0x5f5   :  { %560 = vadd.xlane.f32.xlu0 %v559_v21 }
 0x639   :  { %v771_v22 = vpop.xlane.xlu0 %770 }
 0x63a   :  { %v781_v23 = vsub.f32 %v711_v4, %v771_v22 }
 0x63c   :  { %v785_v24 = vmul.f32 1.442695, %v781_v23 }
 0x63d   :  { %v774_v25 = vpop.xlane.xlu1 %773 }
 0x63e   :  { %4603 = vpow2.f32 %v785_v24  ;;  %v782_v26 = vsub.f32 %v714_v9, %v774_v25 }
 0x640   :  { %v787_v29 = vmul.f32 1.442695, %v782_v26 }
 0x641   :  { %v777_v30 = vpop.xlane.xlu0 %776  ;;  %v857_v31 = vpop.permute.xlu1 %856 }
 0x642   :  { %4605 = vpow2.f32 %v787_v29  ;;  %v783_v33 = vsub.f32 %v762_v12, %v777_v30  ;;  %4245 = vmatpush3.bf16.msra.mxu1 %v857_v31 }
 0x643   :  { %4256 = vmatprep.subr.bf16.mxu1 %v4543_v28 }
 0x644   :  { %v789_v34 = vmul.f32 1.442695, %v783_v33 }
 0x645   :  { %v780_v35 = vpop.xlane.xlu0 %779 }
 0x646   :  { %4607 = vpow2.f32 %v789_v34  ;;  %v784_v37 = vsub.f32 %v765_v15, %v780_v35 }
 0x648   :  { %v791_v38 = vmul.f32 1.442695, %v784_v37 }
 0x649   :  { %v809_v39 = vpop.permute.xlu0 %808 }
 0x64a   :  { %4609 = vpow2.f32 %v791_v38  ;;  %4239 = vmatpush3.bf16.msra.mxu0 %v809_v39 }
 0x64b   :  { %v4604_v41 = vpop.eup %4603 }
 0x64c   :  { %v793_v42 = vsel %vm431_vm2, %v4604_v41, 0.0 }
 0x64d   :  { %794 = vadd.xlane.f32.xlu1 %v793_v42 }
 0x64f   :  { %v4606_v43 = vpop.eup %4605 }
 0x650   :  { %v805_v44 = vpack.c.bf16 %v4606_v43, %v4604_v41  ;;  %v796_v48 = vsel %vm431_vm2, %v4606_v43, 0.0 }
 0x651   :  { %797 = vadd.xlane.f32.xlu0 %v796_v48 }
 0x652   :  { %4241 = vmatmul.mubr.msk.bf16.vlgmr.msra.gmra.mxu0 %vm431_vm2, %v805_v44 }
 0x653   :  { %v4608_v50 = vpop.eup %4607 }
 0x654   :  { %v799_v51 = vsel %vm431_vm2, %v4608_v50, 0.0 }
 0x655   :  { %800 = vadd.xlane.f32.xlu0 %v799_v51 }
 0x657   :  { %v4610_v52 = vpop.eup %4609 }
 0x658   :  { %v806_v53 = vpack.c.bf16 %v4610_v52, %v4608_v50  ;;  %v802_v61 = vsel %vm431_vm2, %v4610_v52, 0.0 }
 0x65a   :  { %4247 = vmatmul.mubr.msk.bf16.vlgmr.msra.gmra.mxu1 %vm431_vm2, %v806_v53 }
 0x65b   :  { %4257 = vmatpush3.bf16.msra.mxu1 %v4543_v28 }
 0x65c   :  { %4268 = vmatprep.subr.bf16.mxu1 %v4794_v46 }
 0x65e   :  { %1091 = vrot.lane.b32.xlu1 %v5057_v6, %s4799_s23 }
 0x66b   :  { %1040 = vrot.lane.b32.xlu0 %v5051_v59, %s4799_s23 }
 0x672   :  { %v558_v54 = vpop.xlane.xlu1 %557 }
 0x673   :  { %4611 = vrcp.f32 %v558_v54 }
 0x676   :  { %v564_v55 = vpop.xlane.xlu1 %563 }
 0x67a   :  { %v555_v56 = vpop.xlane.xlu0 %554 }
 0x67b   :  { %4613 = vrcp.f32 %v555_v56 }
 0x67c   :  { %4615 = vrcp.f32 %v564_v55 }
 0x67e   :  { %v561_v58 = vpop.xlane.xlu0 %560 }
 0x67f   :  { %4617 = vrcp.f32 %v561_v58 }
 0x680   :  { %v4612_v0 = vpop.eup %4611 }
 0x681   :  { %v660_v5 = vmul.f32 %v4612_v0, %v5109_v60 }
 0x682   :  { %803 = vadd.xlane.f32.xlu1 %v802_v61 }
 0x688   :  { %v4614_v3 = vpop.eup %4613 }
 0x689   :  { %v659_v4 = vmul.f32 %v4614_v3, %v5107_v57  ;;  %v4616_v7 = vpop.eup %4615  ;;  %v4544_v57 = vld [vmem:[%s5750_s7 + $0x8] sm:$0xff]  }
 0x68a   :  { %v662_v12 = vmul.f32 %v4616_v7, %v5113_v2  ;;  %4250 = vmatprep.subr.bf16.mxu0 %v4544_v57 }
 0x68b   :  { %v663_v9 = vpack.c.bf16 %v660_v5, %v659_v4  ;;  %4251 = vmatpush3.bf16.msra.mxu0 %v4544_v57 }
 0x68c   :  { %v4618_v10 = vpop.eup %4617  ;;  %4262 = vmatprep.subr.bf16.mxu0 %v4794_v46 }
 0x68d   :  { %4258 = vmatprep.mubr.msk.bf16.mxu1 %vm431_vm2, %v663_v9  ;;  %v661_v11 = vmul.f32 %v4618_v10, %v5111_v63 }
 0x68f   :  { %v664_v13 = vpack.c.bf16 %v662_v12, %v661_v11 }
 0x691   :  { %4259 = vmatmul.mubr.msk.bf16.vlgmr.msra.gmra.mxu1 %vm431_vm2, %v664_v13 }
 0x692   :  { %4270 = vmatprep.mubr.msk.bf16.mxu1 %vm4795_vm1, %v4794_v46 }
 0x693   :  { %1038 = vrot.lane.b32.xlu1 %v5051_v59, %s4800_s24 }
 0x697   :  { %1089 = vrot.lane.b32.xlu1 %v5057_v6, %s4800_s24 }
 0x6d6   :  { %v795_v60 = vpop.xlane.xlu1 %794 }
 0x6d7   :  { %4619 = vrcp.f32 %v795_v60 }
 0x6da   :  { %v1092_v63 = vpop.permute.xlu1 %1091  ;;  %v798_v14 = vpop.xlane.xlu0 %797 }
 0x6db   :  { %v1097_v2 = vsel %vm431_vm2, %v1092_v63, 0  ;;  %4621 = vrcp.f32 %v798_v14 }
 0x6dc   :  { %4269 = vmatpush3.bf16.xpose.msra.mxu1 %v1097_v2 }
 0x6dd   :  { %4280 = vmatprep.subr.bf16.mxu1 %v4794_v46 }
 0x6de   :  { %v801_v16 = vpop.xlane.xlu0 %800 }
 0x6df   :  { %4623 = vrcp.f32 %v801_v16 }
 0x6e2   :  { %v1041_v38 = vpop.permute.xlu0 %1040 }
 0x6e3   :  { %v1046_v42 = vsel %vm431_vm2, %v1041_v38, 0 }
 0x6e4   :  { %v4620_v21 = vpop.eup %4619 }
 0x6e8   :  { %v4622_v22 = vpop.eup %4621 }
 0x6ec   :  { %v4624_v31 = vpop.eup %4623 }
 0x70b   :  { %v804_v15 = vpop.xlane.xlu1 %803 }
 0x70c   :  { %4625 = vrcp.f32 %v804_v15 }
 0x70f   :  { %v1039_v17 = vpop.permute.xlu1 %1038 }
 0x712   :  { %v848_v18 = vpop.f32.mrf.mxu0 }
 0x713   :  { %v1090_v19 = vpop.permute.xlu1 %1089  ;;  %v907_v24 = vmul.f32 %v4620_v21, %v848_v18 }
 0x714   :  { %v4242_v20 = vpop.f32.mrf.mxu0  ;;  %4271 = vmatmul.mubr.msk.bf16.vlgmr.msra.gmra.mxu1 %vm431_vm2, %v1090_v19 }
 0x715   :  { %4282 = vmatprep.mubr.msk.bf16.mxu1 %vm4795_vm1, %v4794_v46 }
 0x716   :  { %v851_v23 = vpop.f32.mrf.mxu0 }
 0x717   :  { %v908_v25 = vmul.f32 %v4622_v22, %v851_v23 }
 0x718   :  { %v4243_v26 = vpop.f32.mrf.mxu0 }
 0x719   :  { %v911_v28 = vpack.c.bf16 %v908_v25, %v907_v24  ;;  %v4626_v33 = vpop.eup %4625 }
 0x71a   :  { %v896_v29 = vpop.f32.mrf.mxu1 }
 0x71b   :  { %4252 = vmatprep.mubr.msk.bf16.mxu0 %vm431_vm2, %v911_v28  ;;  %v909_v35 = vmul.f32 %v4624_v31, %v896_v29 }
 0x71c   :  { %v4248_v30 = vpop.f32.mrf.mxu1 }
 0x71e   :  { %v899_v34 = vpop.f32.mrf.mxu1 }
 0x71f   :  { %v910_v37 = vmul.f32 %v4626_v33, %v899_v34 }
 0x720   :  { %v4249_v39 = vpop.f32.mrf.mxu1 }
 0x721   :  { %v912_v41 = vpack.c.bf16 %v910_v37, %v909_v35  ;;  %v4545_v35 = vld [vmem:[%s5750_s7 + $0x10] sm:$0xff]  }
 0x723   :  { %4253 = vmatmul.mubr.msk.bf16.vlgmr.msra.gmra.mxu0 %vm431_vm2, %v912_v41 }
 0x724   :  { %4263 = vmatpush3.bf16.xpose.msra.mxu0 %v1046_v42  ;;  %4264 = vmatprep.mubr.msk.bf16.mxu0 %vm4795_vm1, %v4794_v46 }
 0x725   :  { %4274 = vmatprep.subr.bf16.mxu0 %v4794_v46 }
 0x72b   :  { %4265 = vmatmul.mubr.msk.bf16.vlgmr.msra.gmra.mxu0 %vm431_vm2, %v1039_v17 }
 0x72c   :  { %4276 = vmatprep.mubr.msk.bf16.mxu0 %vm4795_vm1, %v4794_v46 }
 0x751   :  { %v5171_v43 = vpop.f32.mrf.mxu1 }
 0x753   :  { %v5173_v44 = vpop.f32.mrf.mxu1 }
 0x755   :  { %v5175_v48 = vpop.f32.mrf.mxu1 }
 0x757   :  { %v1026_v50 = vpop.f32.mrf.mxu1 }
 0x7d4   :  { %v1133_v51 = vpop.f32.mrf.mxu1 }
 0x7d5   :  { %v1146_v52 = vsel %vm431_vm2, %v1133_v51, -inf }
 0x7d6   :  { %1147 = vmax.xlane.f32.xlu0 %v1146_v52  ;;  %v4272_v53 = vpop.f32.mrf.mxu1 }
 0x7d8   :  { %v1136_v54 = vpop.f32.mrf.mxu1 }
 0x7d9   :  { %v1149_v55 = vsel %vm431_vm2, %v1136_v54, -inf }
 0x7da   :  { %1150 = vmax.xlane.f32.xlu0 %v1149_v55  ;;  %v4273_v56 = vpop.f32.mrf.mxu1 }
 0x7e3   :  { %v5179_v58 = vpop.f32.mrf.mxu0 }
 0x7e5   :  { %v5181_v61 = vpop.f32.mrf.mxu0 }
 0x7e7   :  { %v5183_v0 = vpop.f32.mrf.mxu0 }
 0x7e9   :  { %v965_v3 = vpop.f32.mrf.mxu0 }
 0x7ea   :  { %v5185_v4 = vadd.f32 %v1026_v50, %v965_v3 }
 0x7eb   :  { %v1082_v5 = vpop.f32.mrf.mxu0 }
 0x7ec   :  { %v1140_v7 = vsel %vm431_vm2, %v1082_v5, -inf }
 0x7ed   :  { %1141 = vmax.xlane.f32.xlu0 %v1140_v7  ;;  %v4266_v9 = vpop.f32.mrf.mxu0 }
 0x7ef   :  { %v1085_v10 = vpop.f32.mrf.mxu0 }
 0x7f0   :  { %v1143_v11 = vsel %vm431_vm2, %v1085_v10, -inf }
 0x7f1   :  { %1144 = vmax.xlane.f32.xlu1 %v1143_v11  ;;  %v4267_v12 = vpop.f32.mrf.mxu0 }
 0x802   :  { %1225 = vrot.lane.b32.xlu1 %v5059_v8, %s4800_s24 }
 0x803   :  { %1178 = vrot.lane.b32.xlu0 %v5053_v62, %s4800_s24 }
 0x85f   :  { %v1148_v13 = vpop.xlane.xlu0 %1147 }
 0x860   :  { %v1154_v57 = vsub.f32 %v1133_v51, %v1148_v13 }
 0x862   :  { %v1160_v60 = vmul.f32 1.442695, %v1154_v57 }
 0x863   :  { %v1151_v63 = vpop.xlane.xlu0 %1150 }
 0x864   :  { %4627 = vpow2.f32 %v1160_v60  ;;  %v1155_v2 = vsub.f32 %v1136_v54, %v1151_v63 }
 0x866   :  { %v1162_v14 = vmul.f32 1.442695, %v1155_v2 }
 0x868   :  { %4629 = vpow2.f32 %v1162_v14 }
 0x871   :  { %v4628_v15 = vpop.eup %4627 }
 0x872   :  { %v1170_v16 = vsel %vm431_vm2, %v4628_v15, 0.0 }
 0x873   :  { %1171 = vadd.xlane.f32.xlu0 %v1170_v16 }
 0x875   :  { %v4630_v17 = vpop.eup %4629 }
 0x876   :  { %v1142_v18 = vpop.xlane.xlu0 %1141  ;;  %v1173_v19 = vsel %vm431_vm2, %v4630_v17, 0.0  ;;  %v1177_v28 = vpack.c.bf16 %v4630_v17, %v4628_v15 }
 0x877   :  { %v1152_v20 = vsub.f32 %v1082_v5, %v1142_v18  ;;  %1174 = vadd.xlane.f32.xlu1 %v1173_v19 }
 0x879   :  { %v1156_v21 = vmul.f32 1.442695, %v1152_v20 }
 0x87a   :  { %v1179_v22 = vpop.permute.xlu0 %1178  ;;  %v1145_v23 = vpop.xlane.xlu1 %1144 }
 0x87b   :  { %4631 = vpow2.f32 %v1156_v21  ;;  %v1153_v24 = vsub.f32 %v1085_v10, %v1145_v23  ;;  %4275 = vmatpush3.bf16.msra.mxu0 %v1179_v22  ;;  %v1032_v22 = vadd.f32 %v5171_v43, %v5179_v58 }
 0x87c   :  { %4286 = vmatprep.subr.bf16.mxu0 %v4545_v35 }
 0x87d   :  { %v1158_v25 = vmul.f32 1.442695, %v1153_v24  ;;  %v1024_v24 = vadd.f32 %v5173_v44, %v5181_v61 }
 0x87e   :  { %v1226_v26 = vpop.permute.xlu1 %1225 }
 0x87f   :  { %4633 = vpow2.f32 %v1158_v25  ;;  %4281 = vmatpush3.bf16.msra.mxu1 %v1226_v26 }
 0x880   :  { %4292 = vmatprep.subr.bf16.mxu1 %v4794_v46 }
 0x882   :  { %4283 = vmatmul.mubr.msk.bf16.vlgmr.msra.gmra.mxu1 %vm431_vm2, %v1177_v28  ;;  %v1035_v28 = vadd.f32 %v5175_v48, %v5183_v0 }
 0x883   :  { %4294 = vmatprep.mubr.msk.bf16.mxu1 %vm4795_vm1, %v4794_v46 }
 0x888   :  { %v4632_v29 = vpop.eup %4631 }
 0x889   :  { %v1164_v30 = vsel %vm431_vm2, %v4632_v29, 0.0 }
 0x88a   :  { %1165 = vadd.xlane.f32.xlu1 %v1164_v30 }
 0x88c   :  { %v4634_v31 = vpop.eup %4633 }
 0x88d   :  { %v1167_v33 = vsel %vm431_vm2, %v4634_v31, 0.0  ;;  %v1176_v34 = vpack.c.bf16 %v4634_v31, %v4632_v29 }
 0x88e   :  { %1168 = vadd.xlane.f32.xlu0 %v1167_v33 }
 0x88f   :  { %4277 = vmatmul.mubr.msk.bf16.vlgmr.msra.gmra.mxu0 %vm431_vm2, %v1176_v34 }
 0x890   :  { %4287 = vmatpush3.bf16.msra.mxu0 %v4545_v35 }
 0x891   :  { %4298 = vmatprep.subr.bf16.mxu0 %v4794_v46 }
 0x89b   :  { %1403 = vrot.lane.b32.xlu1 %v5057_v6, %s4801_s28 }
 0x89f   :  { %1350 = vrot.lane.b32.xlu1 %v5051_v59, %s5763_s2 }
 0x8a3   :  { %1401 = vrot.lane.b32.xlu1 %v5057_v6, %s5763_s2 }
 0x8a4   :  { %1352 = vrot.lane.b32.xlu0 %v5051_v59, %s4801_s28 }
 0x8fc   :  { %v1172_v37 = vpop.xlane.xlu0 %1171 }
 0x900   :  { %v1175_v38 = vpop.xlane.xlu1 %1174 }
 0x901   :  { %4635 = vrcp.f32 %v1175_v38 }
 0x90e   :  { %v4636_v56 = vpop.eup %4635 }
 0x913   :  { %v1166_v39 = vpop.xlane.xlu1 %1165 }
 0x914   :  { %4637 = vrcp.f32 %v1166_v39 }
 0x917   :  { %v1169_v41 = vpop.xlane.xlu0 %1168  ;;  %v1404_v51 = vpop.permute.xlu1 %1403 }
 0x918   :  { %4639 = vrcp.f32 %v1169_v41  ;;  %v1409_v14 = vsel %vm431_vm2, %v1404_v51, 0 }
 0x919   :  { %4641 = vrcp.f32 %v1172_v37 }
 0x91b   :  { %v1353_v42 = vpop.permute.xlu0 %1352  ;;  %v1351_v59 = vpop.permute.xlu1 %1350 }
 0x91c   :  { %v1358_v50 = vsel %vm431_vm2, %v1353_v42, 0 }
 0x91d   :  { %4293 = vmatpush3.bf16.xpose.msra.mxu1 %v1358_v50 }
 0x91e   :  { %4304 = vmatprep.subr.bf16.mxu1 %v4794_v46 }
 0x91f   :  { %v1402_v15 = vpop.permute.xlu1 %1401 }
 0x921   :  { %v4638_v5 = vpop.eup %4637 }
 0x924   :  { %4295 = vmatmul.mubr.msk.bf16.vlgmr.msra.gmra.mxu1 %vm431_vm2, %v1351_v59 }
 0x925   :  { %4306 = vmatprep.mubr.msk.bf16.mxu1 %vm4795_vm1, %v4794_v46  ;;  %v4640_v7 = vpop.eup %4639 }
 0x926   :  { %v4642_v11 = vpop.eup %4641 }
 0x942   :  { %v1265_v6 = vpop.f32.mrf.mxu1 }
 0x943   :  { %v1278_v57 = vmul.f32 %v4642_v11, %v1265_v6 }
 0x944   :  { %v4284_v52 = vpop.f32.mrf.mxu1 }
 0x946   :  { %v1268_v53 = vpop.f32.mrf.mxu1 }
 0x947   :  { %v1279_v9 = vmul.f32 %v4636_v56, %v1268_v53 }
 0x948   :  { %v4285_v54 = vpop.f32.mrf.mxu1 }
 0x949   :  { %v1281_v2 = vpack.c.bf16 %v1279_v9, %v1278_v57 }
 0x94f   :  { %v1218_v55 = vpop.f32.mrf.mxu0 }
 0x950   :  { %v1276_v12 = vmul.f32 %v4638_v5, %v1218_v55 }
 0x951   :  { %v4278_v3 = vpop.f32.mrf.mxu0 }
 0x953   :  { %v1221_v10 = vpop.f32.mrf.mxu0 }
 0x954   :  { %v1277_v13 = vmul.f32 %v4640_v7, %v1221_v10 }
 0x955   :  { %v4279_v60 = vpop.f32.mrf.mxu0 }
 0x956   :  { %v1280_v63 = vpack.c.bf16 %v1277_v13, %v1276_v12  ;;  %v4546_v12 = vld [vmem:[%s5750_s7 + $0x18] sm:$0xff]  }
 0x958   :  { %4288 = vmatprep.mubr.msk.bf16.mxu0 %vm431_vm2, %v1280_v63 }
 0x959   :  { %4289 = vmatmul.mubr.msk.bf16.vlgmr.msra.gmra.mxu0 %vm431_vm2, %v1281_v2 }
 0x95a   :  { %4299 = vmatpush3.bf16.xpose.msra.mxu0 %v1409_v14  ;;  %4300 = vmatprep.mubr.msk.bf16.mxu0 %vm4795_vm1, %v4794_v46 }
 0x95b   :  { %4310 = vmatprep.subr.bf16.mxu0 %v4794_v46 }
 0x961   :  { %4301 = vmatmul.mubr.msk.bf16.vlgmr.msra.gmra.mxu0 %vm431_vm2, %v1402_v15 }
 0x962   :  { %4312 = vmatprep.mubr.msk.bf16.mxu0 %vm4795_vm1, %v4794_v46 }
 0x9e4   :  { %v1394_v16 = vpop.f32.mrf.mxu1 }
 0x9e5   :  { %v1452_v17 = vsel %vm431_vm2, %v1394_v16, -inf }
 0x9e6   :  { %1453 = vmax.xlane.f32.xlu0 %v1452_v17  ;;  %v4296_v18 = vpop.f32.mrf.mxu1 }
 0x9e8   :  { %v1397_v19 = vpop.f32.mrf.mxu1 }
 0x9e9   :  { %v1455_v20 = vsel %vm431_vm2, %v1397_v19, -inf }
 0x9ea   :  { %1456 = vmax.xlane.f32.xlu1 %v1455_v20  ;;  %v4297_v21 = vpop.f32.mrf.mxu1 }
 0x9fb   :  { %1537 = vrot.lane.b32.xlu1 %v5059_v8, %s5763_s2 }
 0xa19   :  { %v4290_v23 = vpop.f32.mrf.mxu0 }
 0xa1a   :  { %v5236_v25 = vadd.f32 %v4290_v23, %v1032_v22 }
 0xa1b   :  { %v1331_v26 = vpop.f32.mrf.mxu0 }
 0xa1c   :  { %v5240_v29 = vadd.f32 %v1331_v26, %v1024_v24 }
 0xa1d   :  { %v4291_v30 = vpop.f32.mrf.mxu0 }
 0xa1e   :  { %v5242_v31 = vadd.f32 %v4291_v30, %v1035_v28 }
 0xa1f   :  { %v1334_v33 = vpop.f32.mrf.mxu0 }
 0xa20   :  { %v5245_v8 = vadd.f32 %v1334_v33, %v5185_v4 }
 0xa21   :  { %v1445_v43 = vpop.f32.mrf.mxu0 }
 0xa22   :  { %v1458_v58 = vsel %vm431_vm2, %v1445_v43, -inf }
 0xa23   :  { %1459 = vmax.xlane.f32.xlu0 %v1458_v58  ;;  %v4302_v44 = vpop.f32.mrf.mxu0 }
 0xa25   :  { %v1448_v61 = vpop.f32.mrf.mxu0 }
 0xa26   :  { %v1461_v34 = vsel %vm431_vm2, %v1448_v61, -inf }
 0xa27   :  { %1462 = vmax.xlane.f32.xlu0 %v1461_v34  ;;  %v4303_v35 = vpop.f32.mrf.mxu0 }
 0xa3d   :  { %1490 = vrot.lane.b32.xlu0 %v5053_v62, %s5763_s2 }
 0xa6f   :  { %v1454_v48 = vpop.xlane.xlu0 %1453 }
 0xa70   :  { %v1464_v0 = vsub.f32 %v1394_v16, %v1454_v48 }
 0xa72   :  { %v1468_v37 = vmul.f32 1.442695, %v1464_v0 }
 0xa73   :  { %v1457_v38 = vpop.xlane.xlu1 %1456 }
 0xa74   :  { %4643 = vpow2.f32 %v1468_v37  ;;  %v1465_v4 = vsub.f32 %v1397_v19, %v1457_v38 }
 0xa76   :  { %v1470_v39 = vmul.f32 1.442695, %v1465_v4  ;;  %v3954_v4 = vld [vmem:[%s5751_s8] ss:$0 sm:$0xff] }
 0xa77   :  { %v1538_v41 = vpop.permute.xlu1 %1537 }
 0xa78   :  { %4645 = vpow2.f32 %v1470_v39  ;;  %4311 = vmatpush3.bf16.msra.mxu0 %v1538_v41 }
 0xa81   :  { %v4644_v42 = vpop.eup %4643 }
 0xa82   :  { %v1476_v50 = vsel %vm431_vm2, %v4644_v42, 0.0 }
 0xa83   :  { %1477 = vadd.xlane.f32.xlu1 %v1476_v50 }
 0xa85   :  { %v4646_v51 = vpop.eup %4645 }
 0xa86   :  { %v1479_v59 = vsel %vm431_vm2, %v4646_v51, 0.0  ;;  %v1488_v3 = vpack.c.bf16 %v4646_v51, %v4644_v42 }
 0xa87   :  { %1480 = vadd.xlane.f32.xlu0 %v1479_v59 }
 0xaac   :  { %v1460_v6 = vpop.xlane.xlu0 %1459 }
 0xaad   :  { %v1466_v62 = vsub.f32 %v1445_v43, %v1460_v6 }
 0xaaf   :  { %v1472_v52 = vmul.f32 1.442695, %v1466_v62 }
 0xab0   :  { %v1463_v53 = vpop.xlane.xlu0 %1462 }
 0xab1   :  { %4647 = vpow2.f32 %v1472_v52  ;;  %v1467_v54 = vsub.f32 %v1448_v61, %v1463_v53 }
 0xab3   :  { %v1474_v55 = vmul.f32 1.442695, %v1467_v54 }
 0xab4   :  { %v1491_v56 = vpop.permute.xlu0 %1490 }
 0xab5   :  { %4649 = vpow2.f32 %v1474_v55  ;;  %4305 = vmatpush3.bf16.msra.mxu1 %v1491_v56 }
 0xab6   :  { %4316 = vmatprep.subr.bf16.mxu1 %v4546_v12 }
 0xab8   :  { %4307 = vmatmul.mubr.msk.bf16.vlgmr.msra.gmra.mxu1 %vm431_vm2, %v1488_v3 }
 0xab9   :  { %4317 = vmatpush3.bf16.msra.mxu1 %v4546_v12 }
 0xabe   :  { %v4648_v5 = vpop.eup %4647 }
 0xabf   :  { %v1482_v7 = vsel %vm431_vm2, %v4648_v5, 0.0 }
 0xac0   :  { %1483 = vadd.xlane.f32.xlu0 %v1482_v7 }
 0xac2   :  { %v4650_v9 = vpop.eup %4649 }
 0xac3   :  { %v1485_v10 = vsel %vm431_vm2, %v4650_v9, 0.0  ;;  %v1489_v11 = vpack.c.bf16 %v4650_v9, %v4648_v5 }
 0xac4   :  { %1486 = vadd.xlane.f32.xlu1 %v1485_v10 }
 0xac5   :  { %4313 = vmatmul.mubr.msk.bf16.vlgmr.msra.gmra.mxu0 %vm431_vm2, %v1489_v11 }
 0xb0c   :  { %v1478_v13 = vpop.xlane.xlu1 %1477 }
 0xb0d   :  { %4651 = vrcp.f32 %v1478_v13 }
 0xb10   :  { %v1481_v57 = vpop.xlane.xlu0 %1480 }
 0xb11   :  { %4653 = vrcp.f32 %v1481_v57 }
 0xb1a   :  { %v4652_v15 = vpop.eup %4651 }
 0xb1e   :  { %v4654_v16 = vpop.eup %4653 }
 0xb49   :  { %v1484_v60 = vpop.xlane.xlu0 %1483 }
 0xb4a   :  { %4655 = vrcp.f32 %v1484_v60 }
 0xb4d   :  { %v1487_v2 = vpop.xlane.xlu1 %1486 }
 0xb4e   :  { %4657 = vrcp.f32 %v1487_v2  ;;  %v4547_v2 = vld [vmem:[%s5754_s11 + $0x18] sm:$0xff]  }
 0xb4f   :  { %4322 = vmatprep.subr.bf16.mxu0 %v4547_v2 }
 0xb50   :  { %4323 = vmatpush3.bf16.msra.mxu0 %v4547_v2 }
 0xb57   :  { %v4656_v24 = vpop.eup %4655 }
 0xb5b   :  { %v4658_v26 = vpop.eup %4657 }
 0xb78   :  { %v1530_v63 = vpop.f32.mrf.mxu1 }
 0xb79   :  { %v1588_v18 = vmul.f32 %v4652_v15, %v1530_v63  ;;  %v4549_v15 = vld [vmem:[%s5754_s11 + $0x8] sm:$0xff]  }
 0xb7a   :  { %v4308_v14 = vpop.f32.mrf.mxu1 }
 0xb7b   :  { %v4548_v14 = vld [vmem:[%s5754_s11 + $0x10] sm:$0xff]  }
 0xb7c   :  { %v1533_v17 = vpop.f32.mrf.mxu1  ;;  %4324 = vmatprep.subr.bf16.mxu0 %v4548_v14 }
 0xb7d   :  { %v1589_v19 = vmul.f32 %v4654_v16, %v1533_v17  ;;  %4325 = vmatpush3.bf16.msra.mxu0 %v4548_v14  ;;  %v4550_v16 = vld [vmem:[%s5754_s11] sm:$0xff]  }
 0xb7e   :  { %v4309_v20 = vpop.f32.mrf.mxu1  ;;  %4326 = vmatprep.subr.bf16.mxu0 %v4549_v15 }
 0xb7f   :  { %v1592_v21 = vpack.c.bf16 %v1589_v19, %v1588_v18 }
 0xb81   :  { %4318 = vmatprep.mubr.msk.bf16.mxu1 %vm431_vm2, %v1592_v21  ;;  %4327 = vmatpush3.bf16.msra.mxu0 %v4549_v15 }
 0xb82   :  { %4328 = vmatprep.subr.bf16.mxu0 %v4550_v16 }
 0xb85   :  { %v1577_v22 = vpop.f32.mrf.mxu0  ;;  %4329 = vmatpush3.bf16.msra.mxu0 %v4550_v16 }
 0xb86   :  { %v1590_v30 = vmul.f32 %v4656_v24, %v1577_v22 }
 0xb87   :  { %v4314_v23 = vpop.f32.mrf.mxu0 }
 0xb89   :  { %v1580_v28 = vpop.f32.mrf.mxu0 }
 0xb8a   :  { %v1591_v33 = vmul.f32 %v4658_v26, %v1580_v28 }
 0xb8b   :  { %v4315_v43 = vpop.f32.mrf.mxu0 }
 0xb8c   :  { %v1593_v58 = vpack.c.bf16 %v1591_v33, %v1590_v30 }
 0xb8e   :  { %4319 = vmatmul.mubr.msk.bf16.vlgmr.msra.gmra.mxu1 %vm431_vm2, %v1593_v58 }
 0xc4e   :  { %v4320_v44 = vpop.f32.mrf.mxu1 }
 0xc4f   :  { %v1660_v61 = vadd.f32 %v4320_v44, %v5236_v25  ;;  %v3955_v44 = vld [vmem:[%s5752_s9] ss:$0 sm:$0xff] }
 0xc50   :  { %v1643_v34 = vpop.f32.mrf.mxu1 }
 0xc51   :  { %v1658_v35 = vadd.f32 %v1643_v34, %v5240_v29  ;;  %v1664_v0 = vadd.f32 %v1660_v61, %v4985_v36 }
 0xc52   :  { %v4321_v48 = vpop.f32.mrf.mxu1 }
 0xc53   :  { %v1662_v37 = vadd.f32 %v1658_v35, %v4974_v27  ;;  %v1661_v38 = vadd.f32 %v4321_v48, %v5242_v31  ;;  %v5273_v25 = vadd.f32 %v3954_v4, %v1664_v0 }
 0xc54   :  { %v1646_v39 = vpop.f32.mrf.mxu1 }
 0xc55   :  { %v5270_v41 = vadd.f32 %v3954_v4, %v1662_v37  ;;  %v1659_v42 = vadd.f32 %v1646_v39, %v5245_v8  ;;  %v1665_v29 = vadd.f32 %v1661_v38, %v4989_v40  ;;  %v1685_v51 = vsel %vm166_vm0, %v5273_v25, 0.0  ;;  %v3956_v37 = vld [vmem:[%s5753_s10] ss:$0 sm:$0xff] }
 0xc57   :  { %v1663_v50 = vadd.f32 %v1659_v42, %v4981_v32  ;;  %v1679_v27 = vsel %vm166_vm0, %v5270_v41, 0.0  ;;  %v5281_v31 = vadd.f32 %v3954_v4, %v1665_v29 }
 0xc58   :  { %1680 = vadd.xlane.f32.xlu0 %v1679_v27 }
 0xc59   :  { %v5279_v36 = vadd.f32 %v3954_v4, %v1663_v50  ;;  %v1688_v40 = vsel %vm166_vm0, %v5281_v31, 0.0 }
 0xc5b   :  { %v1682_v8 = vsel %vm166_vm0, %v5279_v36, 0.0 }
 0xc5c   :  { %1686 = vadd.xlane.f32.xlu0 %v1685_v51  ;;  %1683 = vadd.xlane.f32.xlu1 %v1682_v8 }
 0xc60   :  { %1689 = vadd.xlane.f32.xlu1 %v1688_v40 }
 0xce1   :  { %v1681_v32 = vpop.xlane.xlu0 %1680 }
 0xce2   :  { %v1691_v59 = vmul.f32 0.015625, %v1681_v32 }
 0xce4   :  { %v1695_v6 = vsub.f32 %v5270_v41, %v1691_v59  ;;  %v4551_v59 = vld [vmem:[%s5756_s13 + $0x38] sm:$0xff]  }
 0xce5   :  { %v1687_v62 = vpop.xlane.xlu0 %1686  ;;  %v1684_v52 = vpop.xlane.xlu1 %1683  ;;  %4334 = vmatprep.subr.bf16.mxu1 %v4551_v59 }
 0xce6   :  { %v1693_v53 = vmul.f32 0.015625, %v1687_v62  ;;  %v1692_v54 = vmul.f32 0.015625, %v1684_v52  ;;  %v1699_v55 = vmul.f32 %v1695_v6, %v1695_v6  ;;  %4335 = vmatpush3.bf16.msra.mxu1 %v4551_v59  ;;  %v4553_v62 = vld [vmem:[%s5756_s13 + $0x28] sm:$0xff]   ;;  %v4554_v52 = vld [vmem:[%s5756_s13 + $0x20] sm:$0xff]  }
 0xce8   :  { %v1697_v56 = vsub.f32 %v5273_v25, %v1693_v53  ;;  %v1696_v3 = vsub.f32 %v5279_v36, %v1692_v54  ;;  %v1703_v5 = vsel %vm166_vm0, %v1699_v55, 0.0  ;;  %v4555_v53 = vld [vmem:[%s5756_s13 + $0x18] sm:$0xff]   ;;  %v4556_v54 = vld [vmem:[%s5756_s13 + $0x10] sm:$0xff]   ;;  %v4557_v55 = vld [vmem:[%s5756_s13 + $0x8] sm:$0xff]  }
 0xce9   :  { %1704 = vadd.xlane.f32.xlu0 %v1703_v5  ;;  %v1690_v7 = vpop.xlane.xlu1 %1689 }
 0xcea   :  { %v1694_v9 = vmul.f32 0.015625, %v1690_v7  ;;  %v1701_v10 = vmul.f32 %v1697_v56, %v1697_v56  ;;  %v1700_v11 = vmul.f32 %v1696_v3, %v1696_v3 }
 0xcec   :  { %v1698_v12 = vsub.f32 %v5281_v31, %v1694_v9  ;;  %v1709_v13 = vsel %vm166_vm0, %v1701_v10, 0.0  ;;  %v1706_v57 = vsel %vm166_vm0, %v1700_v11, 0.0 }
 0xced   :  { %1710 = vadd.xlane.f32.xlu0 %v1709_v13  ;;  %1707 = vadd.xlane.f32.xlu1 %v1706_v57 }
 0xcee   :  { %v1702_v60 = vmul.f32 %v1698_v12, %v1698_v12 }
 0xcf0   :  { %v1712_v63 = vsel %vm166_vm0, %v1702_v60, 0.0 }
 0xcf1   :  { %1713 = vadd.xlane.f32.xlu1 %v1712_v63 }
 0xd72   :  { %v1705_v17 = vpop.xlane.xlu0 %1704 }
 0xd73   :  { %v1715_v18 = vmul.f32 0.015625, %v1705_v17 }
 0xd75   :  { %v1719_v19 = vadd.f32 1e-06, %v1715_v18 }
 0xd76   :  { %v1711_v20 = vpop.xlane.xlu0 %1710  ;;  %v1708_v21 = vpop.xlane.xlu1 %1707 }
 0xd77   :  { %4659 = vrsqrt.f32 %v1719_v19  ;;  %v1717_v22 = vmul.f32 0.015625, %v1711_v20  ;;  %v1716_v23 = vmul.f32 0.015625, %v1708_v21 }
 0xd79   :  { %v1721_v24 = vadd.f32 1e-06, %v1717_v22  ;;  %v1720_v26 = vadd.f32 1e-06, %v1716_v23 }
 0xd7a   :  { %v1714_v28 = vpop.xlane.xlu1 %1713 }
 0xd7b   :  { %4661 = vrsqrt.f32 %v1721_v24  ;;  %v1718_v30 = vmul.f32 0.015625, %v1714_v28 }
 0xd7c   :  { %4663 = vrsqrt.f32 %v1720_v26 }
 0xd7d   :  { %v1722_v33 = vadd.f32 1e-06, %v1718_v30 }
 0xd7f   :  { %4665 = vrsqrt.f32 %v1722_v33 }
 0xd84   :  { %v4660_v43 = vpop.eup %4659 }
 0xd85   :  { %v1727_v58 = vmul.f32 %v4660_v43, %v1695_v6  ;;  %v4552_v6 = vld [vmem:[%s5756_s13 + $0x30] sm:$0xff]  }
 0xd86   :  { %4336 = vmatprep.subr.bf16.mxu1 %v4552_v6 }
 0xd87   :  { %v1737_v0 = vmul.f32 %v3955_v44, %v1727_v58  ;;  %4337 = vmatpush3.bf16.msra.mxu1 %v4552_v6  ;;  %v3964_v6 = vld [vmem:[%s5757_s14] ss:$0 sm:$0xff] }
 0xd88   :  { %v4662_v61 = vpop.eup %4661  ;;  %4338 = vmatprep.subr.bf16.mxu1 %v4553_v62 }
 0xd89   :  { %v4664_v34 = vpop.eup %4663  ;;  %v1729_v35 = vmul.f32 %v4662_v61, %v1697_v56  ;;  %v1747_v29 = vadd.f32 %v3956_v37, %v1737_v0  ;;  %v4558_v56 = vld [vmem:[%s5756_s13] sm:$0xff]  }
 0xd8a   :  { %v1728_v48 = vmul.f32 %v4664_v34, %v1696_v3  ;;  %v3957_v3 = vld [vmem:[%s5755_s12] ss:$0 sm:$0xff] }
 0xd8b   :  { %v1739_v42 = vmul.f32 %v3955_v44, %v1729_v35  ;;  %4339 = vmatpush3.bf16.msra.mxu1 %v4553_v62 }
 0xd8c   :  { %v4666_v38 = vpop.eup %4665  ;;  %v1738_v4 = vmul.f32 %v3955_v44, %v1728_v48  ;;  %4340 = vmatprep.subr.bf16.mxu1 %v4554_v52 }
 0xd8d   :  { %v1730_v39 = vmul.f32 %v4666_v38, %v1698_v12  ;;  %v1749_v8 = vadd.f32 %v3956_v37, %v1739_v42 }
 0xd8e   :  { %v1748_v50 = vadd.f32 %v3956_v37, %v1738_v4 }
 0xd8f   :  { %v1740_v27 = vmul.f32 %v3955_v44, %v1730_v39  ;;  %4341 = vmatpush3.bf16.msra.mxu1 %v4554_v52 }
 0xd90   :  { %v1751_v51 = vpack.c.bf16 %v1748_v50, %v1747_v29  ;;  %4342 = vmatprep.subr.bf16.mxu1 %v4555_v53 }
 0xd91   :  { %v1750_v40 = vadd.f32 %v3956_v37, %v1740_v27 }
 0xd92   :  { %4330 = vmatprep.mubr.msk.bf16.mxu0 %vm166_vm0, %v1751_v51 }
 0xd93   :  { %v1752_v32 = vpack.c.bf16 %v1750_v40, %v1749_v8  ;;  %4343 = vmatpush3.bf16.msra.mxu1 %v4555_v53 }
 0xd94   :  { %4344 = vmatprep.subr.bf16.mxu1 %v4556_v54 }
 0xd95   :  { %4331 = vmatmul.mubr.msk.bf16.vlgmr.msra.gmra.mxu0 %vm166_vm0, %v1752_v32 }
 0xd96   :  { %2187 = vmatprep.mubr.bf16.mxu0 %v4793_v1 }
 0xd97   :  { %4345 = vmatpush3.bf16.msra.mxu1 %v4556_v54 }
 0xd98   :  { %4346 = vmatprep.subr.bf16.mxu1 %v4557_v55 }
 0xd9b   :  { %4347 = vmatpush3.bf16.msra.mxu1 %v4557_v55 }
 0xd9c   :  { %4348 = vmatprep.subr.bf16.mxu1 %v4558_v56 }
 0xd9f   :  { %4349 = vmatpush3.bf16.msra.mxu1 %v4558_v56 }
 0xda0   :  { %4354 = vmatprep.subr.bf16.mxu1 %v4794_v46 }
 0xe55   :  { %v4332_v5 = vpop.f32.mrf.mxu0 }
 0xe56   :  { %v1841_v7 = vadd.f32 %v4332_v5, %v3957_v3 }
 0xe57   :  { %v1832_v9 = vpop.f32.mrf.mxu0 }
 0xe58   :  { %v1853_v10 = vmul.f32 0.044715, %v1841_v7  ;;  %v1833_v11 = vadd.f32 %v3957_v3, %v1832_v9  ;;  %v1849_v29 = vmul.f32 0.5, %v1841_v7 }
 0xe59   :  { %v4333_v12 = vpop.f32.mrf.mxu0 }
 0xe5a   :  { %v1857_v13 = vmul.f32 %v1853_v10, %v1841_v7  ;;  %v1851_v57 = vmul.f32 0.044715, %v1833_v11  ;;  %v1844_v60 = vadd.f32 %v4333_v12, %v3957_v3  ;;  %v1847_v4 = vmul.f32 0.5, %v1833_v11 }
 0xe5b   :  { %v1835_v63 = vpop.f32.mrf.mxu0 }
 0xe5c   :  { %v1861_v2 = vmul.f32 %v1857_v13, %v1841_v7  ;;  %v1855_v14 = vmul.f32 %v1851_v57, %v1833_v11  ;;  %v1854_v15 = vmul.f32 0.044715, %v1844_v60  ;;  %v1836_v16 = vadd.f32 %v3957_v3, %v1835_v63 }
 0xe5d   :  { %v1850_v37 = vmul.f32 0.5, %v1844_v60 }
 0xe5e   :  { %v1865_v17 = vadd.f32 %v1861_v2, %v1841_v7  ;;  %v1859_v18 = vmul.f32 %v1855_v14, %v1833_v11  ;;  %v1858_v19 = vmul.f32 %v1854_v15, %v1844_v60  ;;  %v1852_v20 = vmul.f32 0.044715, %v1836_v16 }
 0xe5f   :  { %v1848_v39 = vmul.f32 0.5, %v1836_v16 }
 0xe60   :  { %v1862_v21 = vmul.f32 %v1858_v19, %v1844_v60  ;;  %v1856_v22 = vmul.f32 %v1852_v20, %v1836_v16  ;;  %v1863_v23 = vadd.f32 %v1859_v18, %v1833_v11  ;;  %v1869_v24 = vmul.f32 0.7978846, %v1865_v17 }
 0xe62   :  { %v1866_v26 = vadd.f32 %v1862_v21, %v1844_v60  ;;  %v1860_v28 = vmul.f32 %v1856_v22, %v1836_v16  ;;  %v1867_v30 = vmul.f32 0.7978846, %v1863_v23 }
 0xe64   :  { %v1870_v33 = vmul.f32 0.7978846, %v1866_v26  ;;  %v1864_v43 = vadd.f32 %v1860_v28, %v1836_v16  ;;  %4667 = vtanh.f32 %v1867_v30  ;;  %v4561_v30 = vld [vmem:[%s5748_s5 + $0x74] ss:$8 sps:$4 sm:$0xff]  }
 0xe65   :  { %4669 = vtanh.f32 %v1869_v24  ;;  %2163 = vmatprep.subr.bf16.mxu0 %v4561_v30 }
 0xe66   :  { %4671 = vtanh.f32 %v1870_v33  ;;  %v1868_v58 = vmul.f32 0.7978846, %v1864_v43  ;;  %v4559_v33 = vld [vmem:[%s5748_s5 + $0x70] ss:$8 sps:$4 sm:$0xff]   ;;  %v4564_v43 = vld [vmem:[%s5748_s5 + $0x64] ss:$8 sps:$4 sm:$0xff]  }
 0xe67   :  { %2164 = vmatpush1.bf16.msra.mxu0 %v4559_v33 }
 0xe68   :  { %4673 = vtanh.f32 %v1868_v58  ;;  %v4562_v58 = vld [vmem:[%s5748_s5 + $0x60] ss:$8 sps:$4 sm:$0xff]   ;;  %2165 = vmatprep.subr.bf16.mxu0 %v4564_v43 }
 0xe6b   :  { %2166 = vmatpush1.bf16.msra.mxu0 %v4562_v58 }
 0xe71   :  { %v4668_v44 = vpop.eup %4667 }
 0xe72   :  { %v4670_v61 = vpop.eup %4669  ;;  %v1875_v35 = vadd.f32 1.0, %v4668_v44  ;;  %v4567_v44 = vld [vmem:[%s5748_s5 + $0x54] ss:$8 sps:$4 sm:$0xff]  }
 0xe73   :  { %v4672_v34 = vpop.eup %4671  ;;  %v1877_v38 = vadd.f32 1.0, %v4670_v61  ;;  %v4565_v61 = vld [vmem:[%s5748_s5 + $0x50] ss:$8 sps:$4 sm:$0xff]   ;;  %2167 = vmatprep.subr.bf16.mxu0 %v4567_v44 }
 0xe74   :  { %v1878_v48 = vadd.f32 1.0, %v4672_v34  ;;  %v1879_v27 = vmul.f32 %v1875_v35, %v1847_v4  ;;  %v4570_v34 = vld [vmem:[%s5748_s5 + $0x44] ss:$8 sps:$4 sm:$0xff]   ;;  %2168 = vmatpush1.bf16.msra.mxu0 %v4565_v61  ;;  %v4568_v35 = vld [vmem:[%s5748_s5 + $0x40] ss:$8 sps:$4 sm:$0xff]  }
 0xe75   :  { %v4674_v0 = vpop.eup %4673  ;;  %v1881_v8 = vmul.f32 %v1877_v38, %v1849_v29  ;;  %2169 = vmatprep.subr.bf16.mxu0 %v4570_v34 }
 0xe76   :  { %v1876_v42 = vadd.f32 1.0, %v4674_v0  ;;  %v1882_v50 = vmul.f32 %v1878_v48, %v1850_v37 }
 0xe78   :  { %v1880_v51 = vmul.f32 %v1876_v42, %v1848_v39  ;;  %v1884_v32 = vpack.c.bf16 %v1882_v50, %v1881_v8  ;;  %2170 = vmatpush1.bf16.msra.mxu0 %v4568_v35 }
 0xe79   :  { %4360 = vmatprep.subr.bf16.mxu0 %v4794_v46 }
 0xe7a   :  { %v1883_v40 = vpack.c.bf16 %v1880_v51, %v1879_v27 }
 0xe7c   :  { %4350 = vmatprep.mubr.bf16.mxu1 %v1883_v40 }
 0xe7d   :  { %4351 = vmatmul.mubr.bf16.vlgmr.msra.gmra.mxu1 %v1884_v32 }
 0xe7e   :  { %4356 = vmatprep.mubr.msk.bf16.mxu1 %vm4795_vm1, %v4794_v46 }
 0xf3d   :  { %v4352_v59 = vpop.f32.mrf.mxu1 }
 0xf3e   :  { %v1999_v52 = vadd.f32 %v4352_v59, %v3964_v6  ;;  %v3975_v59 = vld [vmem:[%s5746_s3 + $0x1] ss:$0 sm:$0xff] }
 0xf3f   :  { %v1990_v62 = vpop.f32.mrf.mxu1 }
 0xf40   :  { %v1991_v53 = vadd.f32 %v3964_v6, %v1990_v62  ;;  %v5355_v3 = vadd.f32 %v1999_v52, %v5273_v25 }
 0xf41   :  { %v4353_v54 = vpop.f32.mrf.mxu1 }
 0xf42   :  { %v5352_v55 = vadd.f32 %v1991_v53, %v5270_v41  ;;  %v2002_v5 = vadd.f32 %v4353_v54, %v3964_v6  ;;  %v2019_v12 = vsel %vm166_vm0, %v5355_v3, 0.0  ;;  %v3976_v54 = vld [vmem:[%s5747_s4 + $0x1] ss:$0 sm:$0xff] }
 0xf43   :  { %v1993_v56 = vpop.f32.mrf.mxu1 }
 0xf44   :  { %v1994_v7 = vadd.f32 %v3964_v6, %v1993_v56  ;;  %v2013_v9 = vsel %vm166_vm0, %v5352_v55, 0.0  ;;  %v5363_v11 = vadd.f32 %v2002_v5, %v5281_v31 }
 0xf45   :  { %2014 = vadd.xlane.f32.xlu0 %v2013_v9 }
 0xf46   :  { %v5360_v10 = vadd.f32 %v1994_v7, %v5279_v36  ;;  %v2022_v25 = vsel %vm166_vm0, %v5363_v11, 0.0 }
 0xf48   :  { %v2016_v41 = vsel %vm166_vm0, %v5360_v10, 0.0 }
 0xf49   :  { %2017 = vadd.xlane.f32.xlu1 %v2016_v41  ;;  %2020 = vadd.xlane.f32.xlu0 %v2019_v12 }
 0xf4d   :  { %2023 = vadd.xlane.f32.xlu1 %v2022_v25 }
 0xfce   :  { %v2015_v13 = vpop.xlane.xlu0 %2014 }
 0xfcf   :  { %v2025_v57 = vmul.f32 0.015625, %v2015_v13 }
 0xfd1   :  { %v2029_v36 = vsub.f32 %v5352_v55, %v2025_v57 }
 0xfd2   :  { %v2018_v60 = vpop.xlane.xlu1 %2017  ;;  %v2021_v63 = vpop.xlane.xlu0 %2020 }
 0xfd3   :  { %v2026_v31 = vmul.f32 0.015625, %v2018_v60  ;;  %v2027_v2 = vmul.f32 0.015625, %v2021_v63  ;;  %v2033_v14 = vmul.f32 %v2029_v36, %v2029_v36 }
 0xfd5   :  { %v2030_v15 = vsub.f32 %v5360_v10, %v2026_v31  ;;  %v2031_v16 = vsub.f32 %v5355_v3, %v2027_v2  ;;  %v2037_v17 = vsel %vm166_vm0, %v2033_v14, 0.0  ;;  %v3985_v31 = vld [vmem:[%s5749_s6 + $0x2] sm:$0x3] }
 0xfd6   :  { %v2024_v18 = vpop.xlane.xlu1 %2023  ;;  %2038 = vadd.xlane.f32.xlu0 %v2037_v17  ;;  %v2102_v14 = vrot.slane %v3985_v31, %v317_v47 }
 0xfd7   :  { %v2028_v19 = vmul.f32 0.015625, %v2024_v18  ;;  %v2034_v20 = vmul.f32 %v2030_v15, %v2030_v15  ;;  %v2035_v21 = vmul.f32 %v2031_v16, %v2031_v16 }
 0xfd9   :  { %v2032_v22 = vsub.f32 %v5363_v11, %v2028_v19  ;;  %v2040_v23 = vsel %vm166_vm0, %v2034_v20, 0.0  ;;  %v2043_v24 = vsel %vm166_vm0, %v2035_v21, 0.0 }
 0xfda   :  { %2041 = vadd.xlane.f32.xlu1 %v2040_v23  ;;  %2044 = vadd.xlane.f32.xlu0 %v2043_v24 }
 0xfdb   :  { %v2036_v26 = vmul.f32 %v2032_v22, %v2032_v22 }
 0xfdd   :  { %v2046_v28 = vsel %vm166_vm0, %v2036_v26, 0.0 }
 0xfde   :  { %2047 = vadd.xlane.f32.xlu1 %v2046_v28 }
0x105f   :  { %v2039_v48 = vpop.xlane.xlu0 %2038 }
0x1060   :  { %v2049_v0 = vmul.f32 0.015625, %v2039_v48 }
0x1062   :  { %v2053_v37 = vadd.f32 1e-06, %v2049_v0 }
0x1063   :  { %v2042_v38 = vpop.xlane.xlu1 %2041  ;;  %v2045_v4 = vpop.xlane.xlu0 %2044 }
0x1064   :  { %4675 = vrsqrt.f32 %v2053_v37  ;;  %v2050_v39 = vmul.f32 0.015625, %v2042_v38  ;;  %v2051_v42 = vmul.f32 0.015625, %v2045_v4 }
0x1066   :  { %v2054_v29 = vadd.f32 1e-06, %v2050_v39  ;;  %v2055_v50 = vadd.f32 1e-06, %v2051_v42 }
0x1067   :  { %v2048_v27 = vpop.xlane.xlu1 %2047 }
0x1068   :  { %4677 = vrsqrt.f32 %v2054_v29  ;;  %v2052_v51 = vmul.f32 0.015625, %v2048_v27 }
0x1069   :  { %4679 = vrsqrt.f32 %v2055_v50 }
0x106a   :  { %v2056_v8 = vadd.f32 1e-06, %v2052_v51 }
0x106c   :  { %4681 = vrsqrt.f32 %v2056_v8 }
0x1071   :  { %v4676_v40 = vpop.eup %4675 }
0x1072   :  { %v2061_v32 = vmul.f32 %v4676_v40, %v2029_v36 }
0x1074   :  { %v2071_v52 = vmul.f32 %v3975_v59, %v2061_v32 }
0x1075   :  { %v4678_v6 = vpop.eup %4677 }
0x1076   :  { %v2062_v62 = vmul.f32 %v4678_v6, %v2030_v15  ;;  %v4680_v53 = vpop.eup %4679  ;;  %v2081_v7 = vadd.f32 %v3976_v54, %v2071_v52 }
0x1077   :  { %v2063_v41 = vmul.f32 %v4680_v53, %v2031_v16 }
0x1078   :  { %v2072_v56 = vmul.f32 %v3975_v59, %v2062_v62 }
0x1079   :  { %v4682_v5 = vpop.eup %4681  ;;  %v2073_v57 = vmul.f32 %v3975_v59, %v2063_v41 }
0x107a   :  { %v2082_v9 = vadd.f32 %v3976_v54, %v2072_v56  ;;  %v2064_v12 = vmul.f32 %v4682_v5, %v2032_v22 }
0x107b   :  { %v2083_v60 = vadd.f32 %v3976_v54, %v2073_v57 }
0x107c   :  { %v2085_v25 = vpack.c.bf16 %v2082_v9, %v2081_v7  ;;  %v2074_v13 = vmul.f32 %v3975_v59, %v2064_v12 }
0x107e   :  { %3994 = vmatmul.mubr.msk.bf16.vlgmr.msra.gmra.mxu0 %vm166_vm0, %v2085_v25  ;;  %v2084_v36 = vadd.f32 %v3976_v54, %v2074_v13 }
0x107f   :  { %2197 = vmatprep.mubr.bf16.mxu0 %v4793_v1  ;;  %v2106_v1 = vrot.slane %v3985_v31, %v321_v49 }
0x1080   :  { %v2086_v63 = vpack.c.bf16 %v2084_v36, %v2083_v60 }
0x1086   :  { %3995 = vmatmul.mubr.msk.bf16.gmra.mxu0 %vm166_vm0, %v2086_v63 }
0x1087   :  { %4362 = vmatprep.mubr.msk.bf16.mxu0 %vm4795_vm1, %v4794_v46 }
0x113e   :  { %v2189_v2 = vpop.f32.mrf.mxu0 }
0x113f   :  { %v2190_v17 = vadd.f32 %v2189_v2, %v2102_v14 }
0x1140   :  { %v2191_v15 = vpop.f32.mrf.mxu0 }
0x1141   :  { %v2192_v20 = vadd.f32 %v2191_v15, %v2106_v1 }
0x1142   :  { %v2193_v16 = vpop.f32.mrf.mxu0 }
0x1143   :  { %v2194_v18 = vadd.f32 %v2193_v16, %v2102_v14 }
0x1144   :  { %v2195_v19 = vpop.f32.mrf.mxu0 }
0x1145   :  { %v5422_v21 = vpack.c.bf16 %v2194_v18, %v2190_v17  ;;  %v2196_v22 = vadd.f32 %v2195_v19, %v2106_v1 }
0x1146   :  { %v2199_v23 = vpop.f32.mrf.mxu0 }
0x1147   :  { %v5424_v24 = vpack.c.bf16 %v2196_v22, %v2192_v20  ;;  %2213 = vrot.lane.b32.xlu0 %v5422_v21, %s4796_s19  ;;  %v2200_v28 = vadd.f32 %v2199_v23, %v2102_v14 }
0x1148   :  { %v2201_v26 = vpop.f32.mrf.mxu0 }
0x1149   :  { %v2202_v34 = vadd.f32 %v2201_v26, %v2106_v1 }
0x114a   :  { %v2203_v47 = vpop.f32.mrf.mxu0 }
0x114b   :  { %v2204_v30 = vadd.f32 %v2203_v47, %v2102_v14 }
0x114c   :  { %v2205_v58 = vpop.f32.mrf.mxu0 }
0x114d   :  { %v5428_v45 = vpack.c.bf16 %v2204_v30, %v2200_v28  ;;  %v2206_v61 = vadd.f32 %v2205_v58, %v2106_v1 }
0x114f   :  { %2263 = vrot.lane.b32.xlu1 %v5428_v45, %s4796_s19  ;;  %v5442_v35 = vpack.c.bf16 %v2206_v61, %v2202_v34 }
0x11b9   :  { %v2214_v49 = vpop.permute.xlu0 %2213 }
0x11ba   :  { %v2219_v33 = vsel %vm431_vm2, %v2214_v49, 0 }
0x11bb   :  { %4355 = vmatpush3.bf16.xpose.msra.mxu1 %v2219_v33 }
0x11bc   :  { %4366 = vmatprep.subr.bf16.mxu1 %v4794_v46 }
0x11c1   :  { %v2264_v43 = vpop.permute.xlu1 %2263 }
0x11c2   :  { %v2269_v44 = vsel %vm431_vm2, %v2264_v43, 0  ;;  %4357 = vmatmul.mubr.msk.bf16.vlgmr.msra.gmra.mxu1 %vm431_vm2, %v5422_v21 }
0x11c3   :  { %4361 = vmatpush3.bf16.xpose.msra.mxu0 %v2269_v44  ;;  %4367 = vmatpush3.bf16.msra.mxu1 %v5424_v24 }
0x11c4   :  { %4372 = vmatprep.subr.bf16.mxu0 %v4794_v46  ;;  %4368 = vmatprep.mubr.msk.bf16.mxu1 %vm4795_vm1, %v4794_v46 }
0x11c5   :  { %4378 = vmatprep.subr.bf16.mxu1 %v4794_v46 }
0x11ca   :  { %4363 = vmatmul.mubr.msk.bf16.vlgmr.msra.gmra.mxu0 %vm431_vm2, %v5428_v45 }
0x11cb   :  { %4373 = vmatpush3.bf16.msra.mxu0 %v5442_v35  ;;  %4374 = vmatprep.mubr.msk.bf16.mxu0 %vm4795_vm1, %v4794_v46 }
0x11cc   :  { %4384 = vmatprep.subr.bf16.mxu0 %v4794_v46 }
0x1282   :  { %v2255_v48 = vpop.f32.mrf.mxu1 }
0x1283   :  { %v2312_v0 = vsel %vm431_vm2, %v2255_v48, -inf }
0x1284   :  { %2313 = vmax.xlane.f32.xlu1 %v2312_v0  ;;  %v4358_v37 = vpop.f32.mrf.mxu1 }
0x1286   :  { %v2258_v38 = vpop.f32.mrf.mxu1 }
0x1287   :  { %v2315_v4 = vsel %vm431_vm2, %v2258_v38, -inf }
0x1288   :  { %2316 = vmax.xlane.f32.xlu0 %v2315_v4  ;;  %v4359_v39 = vpop.f32.mrf.mxu1 }
0x128a   :  { %v2305_v42 = vpop.f32.mrf.mxu0 }
0x128b   :  { %v2318_v29 = vsel %vm431_vm2, %v2305_v42, -inf }
0x128c   :  { %v4364_v50 = vpop.f32.mrf.mxu0  ;;  %2319 = vmax.xlane.f32.xlu0 %v2318_v29 }
0x128e   :  { %v2308_v27 = vpop.f32.mrf.mxu0 }
0x128f   :  { %v2321_v8 = vsel %vm431_vm2, %v2308_v27, -inf }
0x1290   :  { %v4365_v51 = vpop.f32.mrf.mxu0 }
0x1291   :  { %v4571_v51 = vld [vmem:[%s5750_s7 + $0x20] sm:$0xff]  }
0x1295   :  { %2504 = vrot.lane.b32.xlu1 %v5428_v45, %s4798_s26 }
0x12a2   :  { %2453 = vrot.lane.b32.xlu0 %v5422_v21, %s4798_s26 }
0x12b9   :  { %2322 = vmax.xlane.f32.xlu1 %v2321_v8 }
0x12ca   :  { %2451 = vrot.lane.b32.xlu1 %v5422_v21, %s4797_s1 }
0x12ce   :  { %2502 = vrot.lane.b32.xlu1 %v5428_v45, %s4797_s1 }
0x130d   :  { %v2314_v40 = vpop.xlane.xlu1 %2313 }
0x130e   :  { %v2324_v32 = vsub.f32 %v2255_v48, %v2314_v40 }
0x1310   :  { %v2328_v59 = vmul.f32 1.442695, %v2324_v32 }
0x1311   :  { %v2317_v6 = vpop.xlane.xlu0 %2316  ;;  %v2505_v41 = vpop.permute.xlu1 %2504 }
0x1312   :  { %v2325_v62 = vsub.f32 %v2258_v38, %v2317_v6  ;;  %4683 = vpow2.f32 %v2328_v59  ;;  %v2510_v14 = vsel %vm431_vm2, %v2505_v41, 0 }
0x1314   :  { %v2330_v52 = vmul.f32 1.442695, %v2325_v62 }
0x1315   :  { %v2320_v53 = vpop.xlane.xlu0 %2319 }
0x1316   :  { %4685 = vpow2.f32 %v2330_v52  ;;  %v2326_v12 = vsub.f32 %v2305_v42, %v2320_v53 }
0x1318   :  { %v2332_v25 = vmul.f32 1.442695, %v2326_v12 }
0x1319   :  { %v2454_v5 = vpop.permute.xlu0 %2453 }
0x131a   :  { %v2459_v9 = vsel %vm431_vm2, %v2454_v5, 0  ;;  %4687 = vpow2.f32 %v2332_v25 }
0x131f   :  { %v4684_v54 = vpop.eup %4683 }
0x1320   :  { %v2336_v38 = vsel %vm431_vm2, %v4684_v54, 0.0 }
0x1323   :  { %v4686_v56 = vpop.eup %4685 }
0x1324   :  { %v2348_v7 = vpack.c.bf16 %v4686_v56, %v4684_v54  ;;  %v2339_v0 = vsel %vm431_vm2, %v4686_v56, 0.0 }
0x1326   :  { %4369 = vmatmul.mubr.msk.bf16.vlgmr.msra.gmra.mxu1 %vm431_vm2, %v2348_v7 }
0x1327   :  { %4379 = vmatpush3.bf16.xpose.msra.mxu1 %v2459_v9  ;;  %4380 = vmatprep.mubr.msk.bf16.mxu1 %vm4795_vm1, %v4794_v46  ;;  %v4688_v63 = vpop.eup %4687 }
0x1328   :  { %4390 = vmatprep.subr.bf16.mxu1 %v4794_v46  ;;  %v2342_v4 = vsel %vm431_vm2, %v4688_v63, 0.0 }
0x1342   :  { %v2323_v13 = vpop.xlane.xlu1 %2322 }
0x1343   :  { %v2327_v57 = vsub.f32 %v2308_v27, %v2323_v13 }
0x1345   :  { %v2334_v36 = vmul.f32 1.442695, %v2327_v57 }
0x1346   :  { %v2452_v60 = vpop.permute.xlu1 %2451 }
0x1347   :  { %4689 = vpow2.f32 %v2334_v36  ;;  %4381 = vmatmul.mubr.msk.bf16.vlgmr.msra.gmra.mxu1 %vm431_vm2, %v2452_v60 }
0x1348   :  { %4392 = vmatprep.mubr.msk.bf16.mxu1 %vm4795_vm1, %v4794_v46 }
0x134a   :  { %v2503_v15 = vpop.permute.xlu1 %2502 }
0x1354   :  { %v4690_v31 = vpop.eup %4689 }
0x1355   :  { %v2349_v2 = vpack.c.bf16 %v4690_v31, %v4688_v63  ;;  %v2345_v37 = vsel %vm431_vm2, %v4690_v31, 0.0 }
0x1357   :  { %4375 = vmatmul.mubr.msk.bf16.vlgmr.msra.gmra.mxu0 %vm431_vm2, %v2349_v2 }
0x1358   :  { %4385 = vmatpush3.bf16.xpose.msra.mxu0 %v2510_v14  ;;  %4386 = vmatprep.mubr.msk.bf16.mxu0 %vm4795_vm1, %v4794_v46 }
0x1359   :  { %4396 = vmatprep.subr.bf16.mxu0 %v4794_v46 }
0x135f   :  { %4387 = vmatmul.mubr.msk.bf16.vlgmr.msra.gmra.mxu0 %vm431_vm2, %v2503_v15 }
0x1360   :  { %4398 = vmatprep.mubr.msk.bf16.mxu0 %vm4795_vm1, %v4794_v46 }
0x13e6   :  { %v5478_v1 = vpop.f32.mrf.mxu1 }
0x13e8   :  { %v4370_v16 = vpop.f32.mrf.mxu1 }
0x13ea   :  { %v5480_v17 = vpop.f32.mrf.mxu1 }
0x13ec   :  { %v4371_v18 = vpop.f32.mrf.mxu1 }
0x1407   :  { %v2495_v19 = vpop.f32.mrf.mxu1 }
0x1408   :  { %v2553_v20 = vsel %vm431_vm2, %v2495_v19, -inf }
0x1409   :  { %2554 = vmax.xlane.f32.xlu0 %v2553_v20  ;;  %v4382_v22 = vpop.f32.mrf.mxu1 }
0x140b   :  { %v2498_v23 = vpop.f32.mrf.mxu1 }
0x140c   :  { %v2556_v26 = vsel %vm431_vm2, %v2498_v23, -inf }
0x140d   :  { %2557 = vmax.xlane.f32.xlu1 %v2556_v26  ;;  %v4383_v47 = vpop.f32.mrf.mxu1 }
0x1417   :  { %v5484_v28 = vpop.f32.mrf.mxu0 }
0x1419   :  { %v4376_v30 = vpop.f32.mrf.mxu0 }
0x141b   :  { %v5486_v49 = vpop.f32.mrf.mxu0 }
0x141d   :  { %v4377_v33 = vpop.f32.mrf.mxu0 }
0x141e   :  { %2640 = vrot.lane.b32.xlu1 %v5442_v35, %s4797_s1 }
0x141f   :  { %v2546_v43 = vpop.f32.mrf.mxu0 }
0x1420   :  { %v2559_v58 = vsel %vm431_vm2, %v2546_v43, -inf }
0x1421   :  { %v4388_v44 = vpop.f32.mrf.mxu0  ;;  %2560 = vmax.xlane.f32.xlu0 %v2559_v58 }
0x1423   :  { %v2549_v61 = vpop.f32.mrf.mxu0 }
0x1424   :  { %v2562_v34 = vsel %vm431_vm2, %v2549_v61, -inf }
0x1425   :  { %v4389_v48 = vpop.f32.mrf.mxu0  ;;  %2563 = vmax.xlane.f32.xlu0 %v2562_v34 }
0x143b   :  { %2592 = vrot.lane.b32.xlu0 %v5424_v24, %s4797_s1 }
0x1442   :  { %2340 = vadd.xlane.f32.xlu1 %v2339_v0 }
0x1446   :  { %2346 = vadd.xlane.f32.xlu1 %v2345_v37 }
0x145a   :  { %2337 = vadd.xlane.f32.xlu0 %v2336_v38 }
0x145e   :  { %2343 = vadd.xlane.f32.xlu0 %v2342_v4 }
0x1492   :  { %v2555_v39 = vpop.xlane.xlu0 %2554 }
0x1493   :  { %v2565_v42 = vsub.f32 %v2495_v19, %v2555_v39 }
0x1495   :  { %v2569_v29 = vmul.f32 1.442695, %v2565_v42 }
0x1496   :  { %v2558_v50 = vpop.xlane.xlu1 %2557 }
0x1497   :  { %4691 = vpow2.f32 %v2569_v29  ;;  %v2566_v27 = vsub.f32 %v2498_v23, %v2558_v50 }
0x1499   :  { %v2571_v8 = vmul.f32 1.442695, %v2566_v27 }
0x149a   :  { %v2641_v40 = vpop.permute.xlu1 %2640 }
0x149b   :  { %4693 = vpow2.f32 %v2571_v8  ;;  %4397 = vmatpush3.bf16.msra.mxu0 %v2641_v40 }
0x149c   :  { %4408 = vmatprep.subr.bf16.mxu0 %v4571_v51 }
0x14a4   :  { %v4692_v32 = vpop.eup %4691 }
0x14a5   :  { %v2577_v59 = vsel %vm431_vm2, %v4692_v32, 0.0 }
0x14a6   :  { %2578 = vadd.xlane.f32.xlu1 %v2577_v59 }
0x14a8   :  { %v4694_v6 = vpop.eup %4693 }
0x14a9   :  { %v2580_v62 = vsel %vm431_vm2, %v4694_v6, 0.0  ;;  %v2589_v41 = vpack.c.bf16 %v4694_v6, %v4692_v32 }
0x14aa   :  { %v2561_v52 = vpop.xlane.xlu0 %2560  ;;  %2581 = vadd.xlane.f32.xlu0 %v2580_v62 }
0x14ab   :  { %v2567_v53 = vsub.f32 %v2546_v43, %v2561_v52 }
0x14ad   :  { %v2573_v54 = vmul.f32 1.442695, %v2567_v53 }
0x14ae   :  { %v2564_v56 = vpop.xlane.xlu0 %2563 }
0x14af   :  { %4695 = vpow2.f32 %v2573_v54  ;;  %v2568_v5 = vsub.f32 %v2549_v61, %v2564_v56 }
0x14b1   :  { %v2575_v7 = vmul.f32 1.442695, %v2568_v5 }
0x14b2   :  { %v2593_v9 = vpop.permute.xlu0 %2592 }
0x14b3   :  { %4697 = vpow2.f32 %v2575_v7  ;;  %4391 = vmatpush3.bf16.msra.mxu1 %v2593_v9 }
0x14b6   :  { %4393 = vmatmul.mubr.msk.bf16.vlgmr.msra.gmra.mxu1 %vm431_vm2, %v2589_v41 }
0x14b7   :  { %2875 = vrot.lane.b32.xlu1 %v5428_v45, %s4799_s23 }
0x14bc   :  { %v4696_v12 = vpop.eup %4695 }
0x14bd   :  { %v2583_v25 = vsel %vm431_vm2, %v4696_v12, 0.0 }
0x14be   :  { %2584 = vadd.xlane.f32.xlu0 %v2583_v25 }
0x14c0   :  { %v4698_v13 = vpop.eup %4697 }
0x14c1   :  { %v2590_v57 = vpack.c.bf16 %v4698_v13, %v4696_v12  ;;  %v2586_v36 = vsel %vm431_vm2, %v4698_v13, 0.0 }
0x14c3   :  { %4399 = vmatmul.mubr.msk.bf16.vlgmr.msra.gmra.mxu0 %vm431_vm2, %v2590_v57 }
0x14c4   :  { %4409 = vmatpush3.bf16.msra.mxu0 %v4571_v51 }
0x14c5   :  { %4420 = vmatprep.subr.bf16.mxu0 %v4794_v46 }
0x14cb   :  { %v2341_v60 = vpop.xlane.xlu1 %2340 }
0x14cc   :  { %4699 = vrcp.f32 %v2341_v60 }
0x14cf   :  { %v2347_v63 = vpop.xlane.xlu1 %2346 }
0x14d4   :  { %2824 = vrot.lane.b32.xlu0 %v5422_v21, %s4799_s23  ;;  %s5769_s23 = smov 80  }
0x14d9   :  { %v4700_v14 = vpop.eup %4699 }
0x14da   :  { %v2443_v18 = vmul.f32 %v4700_v14, %v5480_v17 }
0x14db   :  { %2587 = vadd.xlane.f32.xlu1 %v2586_v36 }
0x14e3   :  { %v2338_v31 = vpop.xlane.xlu0 %2337 }
0x14e4   :  { %4701 = vrcp.f32 %v2338_v31 }
0x14e5   :  { %4703 = vrcp.f32 %v2347_v63 }
0x14e7   :  { %v2344_v2 = vpop.xlane.xlu0 %2343 }
0x14e8   :  { %4705 = vrcp.f32 %v2344_v2 }
0x14ec   :  { %2822 = vrot.lane.b32.xlu1 %v5422_v21, %s4800_s24 }
0x14f0   :  { %2873 = vrot.lane.b32.xlu1 %v5428_v45, %s4800_s24 }
0x14f1   :  { %v4702_v15 = vpop.eup %4701 }
0x14f2   :  { %v2442_v16 = vmul.f32 %v4702_v15, %v5478_v1  ;;  %v4704_v19 = vpop.eup %4703  ;;  %v4572_v1 = vld [vmem:[%s5750_s7 + $0x28] sm:$0xff]  }
0x14f3   :  { %v2445_v26 = vmul.f32 %v4704_v19, %v5486_v49  ;;  %4402 = vmatprep.subr.bf16.mxu1 %v4572_v1 }
0x14f4   :  { %v2446_v20 = vpack.c.bf16 %v2443_v18, %v2442_v16  ;;  %4403 = vmatpush3.bf16.msra.mxu1 %v4572_v1 }
0x14f5   :  { %v4706_v22 = vpop.eup %4705  ;;  %4414 = vmatprep.subr.bf16.mxu1 %v4794_v46 }
0x14f6   :  { %4410 = vmatprep.mubr.msk.bf16.mxu0 %vm431_vm2, %v2446_v20  ;;  %v2444_v23 = vmul.f32 %v4706_v22, %v5484_v28 }
0x14f8   :  { %v2447_v47 = vpack.c.bf16 %v2445_v26, %v2444_v23 }
0x14fa   :  { %4411 = vmatmul.mubr.msk.bf16.vlgmr.msra.gmra.mxu0 %vm431_vm2, %v2447_v47 }
0x14fb   :  { %4422 = vmatprep.mubr.msk.bf16.mxu0 %vm4795_vm1, %v4794_v46 }
0x152f   :  { %v2579_v17 = vpop.xlane.xlu1 %2578 }
0x1530   :  { %4707 = vrcp.f32 %v2579_v17 }
0x1533   :  { %v2876_v30 = vpop.permute.xlu1 %2875  ;;  %v2582_v43 = vpop.xlane.xlu0 %2581 }
0x1534   :  { %v2881_v28 = vsel %vm431_vm2, %v2876_v30, 0  ;;  %4709 = vrcp.f32 %v2582_v43 }
0x1535   :  { %4421 = vmatpush3.bf16.xpose.msra.mxu0 %v2881_v28 }
0x1536   :  { %4432 = vmatprep.subr.bf16.mxu0 %v4794_v46 }
0x153d   :  { %v4708_v48 = vpop.eup %4707 }
0x1541   :  { %v4710_v0 = vpop.eup %4709 }
0x1547   :  { %v2585_v44 = vpop.xlane.xlu0 %2584 }
0x1548   :  { %4711 = vrcp.f32 %v2585_v44 }
0x154b   :  { %v2825_v59 = vpop.permute.xlu0 %2824 }
0x154c   :  { %v2830_v52 = vsel %vm431_vm2, %v2825_v59, 0 }
0x1555   :  { %v4712_v27 = vpop.eup %4711 }
0x1564   :  { %v2588_v49 = vpop.xlane.xlu1 %2587 }
0x1565   :  { %4713 = vrcp.f32 %v2588_v49 }
0x1568   :  { %v2823_v33 = vpop.permute.xlu1 %2822 }
0x156c   :  { %v2874_v58 = vpop.permute.xlu1 %2873 }
0x156d   :  { %4423 = vmatmul.mubr.msk.bf16.vlgmr.msra.gmra.mxu0 %vm431_vm2, %v2874_v58 }
0x156e   :  { %4434 = vmatprep.mubr.msk.bf16.mxu0 %vm4795_vm1, %v4794_v46 }
0x1572   :  { %v4714_v51 = vpop.eup %4713 }
0x1576   :  { %v2632_v61 = vpop.f32.mrf.mxu1 }
0x1577   :  { %v2691_v38 = vmul.f32 %v4708_v48, %v2632_v61 }
0x1578   :  { %v4394_v34 = vpop.f32.mrf.mxu1 }
0x157a   :  { %v2635_v37 = vpop.f32.mrf.mxu1 }
0x157b   :  { %v2692_v4 = vmul.f32 %v4710_v0, %v2635_v37 }
0x157c   :  { %v4395_v39 = vpop.f32.mrf.mxu1 }
0x157d   :  { %v2695_v42 = vpack.c.bf16 %v2692_v4, %v2691_v38 }
0x157f   :  { %4404 = vmatprep.mubr.msk.bf16.mxu1 %vm431_vm2, %v2695_v42 }
0x1583   :  { %v2680_v29 = vpop.f32.mrf.mxu0 }
0x1584   :  { %v2693_v40 = vmul.f32 %v4712_v27, %v2680_v29 }
0x1585   :  { %v4400_v50 = vpop.f32.mrf.mxu0 }
0x1586   :  { %v4573_v50 = vld [vmem:[%s5750_s7 + $0x30] sm:$0xff]  }
0x1587   :  { %v2683_v8 = vpop.f32.mrf.mxu0 }
0x1588   :  { %v2694_v32 = vmul.f32 %v4714_v51, %v2683_v8 }
0x1589   :  { %v4401_v6 = vpop.f32.mrf.mxu0 }
0x158a   :  { %v2696_v62 = vpack.c.bf16 %v2694_v32, %v2693_v40 }
0x158c   :  { %4405 = vmatmul.mubr.msk.bf16.vlgmr.msra.gmra.mxu1 %vm431_vm2, %v2696_v62 }
0x158d   :  { %4415 = vmatpush3.bf16.xpose.msra.mxu1 %v2830_v52  ;;  %4416 = vmatprep.mubr.msk.bf16.mxu1 %vm4795_vm1, %v4794_v46 }
0x158e   :  { %4426 = vmatprep.subr.bf16.mxu1 %v4794_v46 }
0x1594   :  { %4417 = vmatmul.mubr.msk.bf16.vlgmr.msra.gmra.mxu1 %vm431_vm2, %v2823_v33 }
0x1595   :  { %4428 = vmatprep.mubr.msk.bf16.mxu1 %vm4795_vm1, %v4794_v46 }
0x15ba   :  { %v5542_v53 = vpop.f32.mrf.mxu0 }
0x15bc   :  { %v5544_v54 = vpop.f32.mrf.mxu0 }
0x15be   :  { %v5546_v56 = vpop.f32.mrf.mxu0 }
0x15c0   :  { %v2810_v5 = vpop.f32.mrf.mxu0 }
0x162d   :  { %v2917_v7 = vpop.f32.mrf.mxu0 }
0x162e   :  { %v2930_v9 = vsel %vm431_vm2, %v2917_v7, -inf }
0x162f   :  { %2931 = vmax.xlane.f32.xlu0 %v2930_v9  ;;  %v4424_v41 = vpop.f32.mrf.mxu0 }
0x1631   :  { %v2920_v12 = vpop.f32.mrf.mxu0 }
0x1632   :  { %v2933_v25 = vsel %vm431_vm2, %v2920_v12, -inf }
0x1633   :  { %2934 = vmax.xlane.f32.xlu0 %v2933_v25  ;;  %v4425_v13 = vpop.f32.mrf.mxu0 }
0x164c   :  { %v5550_v57 = vpop.f32.mrf.mxu1 }
0x164e   :  { %v5552_v36 = vpop.f32.mrf.mxu1 }
0x1650   :  { %v5554_v60 = vpop.f32.mrf.mxu1 }
0x1652   :  { %v2749_v63 = vpop.f32.mrf.mxu1 }
0x1653   :  { %v5556_v31 = vadd.f32 %v2810_v5, %v2749_v63 }
0x1654   :  { %v2866_v2 = vpop.f32.mrf.mxu1 }
0x1655   :  { %v2924_v14 = vsel %vm431_vm2, %v2866_v2, -inf }
0x1656   :  { %2925 = vmax.xlane.f32.xlu0 %v2924_v14  ;;  %v4418_v15 = vpop.f32.mrf.mxu1 }
0x1658   :  { %v2869_v16 = vpop.f32.mrf.mxu1 }
0x1659   :  { %v2927_v18 = vsel %vm431_vm2, %v2869_v16, -inf }
0x165a   :  { %2928 = vmax.xlane.f32.xlu1 %v2927_v18  ;;  %v4419_v19 = vpop.f32.mrf.mxu1 }
0x166b   :  { %3009 = vrot.lane.b32.xlu1 %v5442_v35, %s4800_s24 }
0x166c   :  { %2962 = vrot.lane.b32.xlu0 %v5424_v24, %s4800_s24 }
0x16b8   :  { %v2932_v20 = vpop.xlane.xlu0 %2931 }
0x16b9   :  { %v2938_v22 = vsub.f32 %v2917_v7, %v2932_v20 }
0x16bb   :  { %v2944_v23 = vmul.f32 1.442695, %v2938_v22 }
0x16bc   :  { %v2935_v26 = vpop.xlane.xlu0 %2934 }
0x16bd   :  { %4715 = vpow2.f32 %v2944_v23  ;;  %v2939_v47 = vsub.f32 %v2920_v12, %v2935_v26 }
0x16bf   :  { %v2946_v1 = vmul.f32 1.442695, %v2939_v47 }
0x16c1   :  { %4717 = vpow2.f32 %v2946_v1 }
0x16ca   :  { %v4716_v17 = vpop.eup %4715 }
0x16cb   :  { %v2954_v30 = vsel %vm431_vm2, %v4716_v17, 0.0 }
0x16cc   :  { %2955 = vadd.xlane.f32.xlu0 %v2954_v30 }
0x16ce   :  { %v4718_v28 = vpop.eup %4717 }
0x16cf   :  { %v2957_v49 = vsel %vm431_vm2, %v4718_v28, 0.0  ;;  %v2961_v37 = vpack.c.bf16 %v4718_v28, %v4716_v17 }
0x16d0   :  { %2958 = vadd.xlane.f32.xlu1 %v2957_v49  ;;  %v2816_v49 = vadd.f32 %v5542_v53, %v5550_v57 }
0x16df   :  { %v2926_v33 = vpop.xlane.xlu0 %2925 }
0x16e0   :  { %v2936_v43 = vsub.f32 %v2866_v2, %v2926_v33 }
0x16e2   :  { %v2940_v58 = vmul.f32 1.442695, %v2936_v43 }
0x16e3   :  { %v2963_v44 = vpop.permute.xlu0 %2962  ;;  %v2929_v61 = vpop.xlane.xlu1 %2928 }
0x16e4   :  { %4719 = vpow2.f32 %v2940_v58  ;;  %v2937_v34 = vsub.f32 %v2869_v16, %v2929_v61  ;;  %4427 = vmatpush3.bf16.msra.mxu1 %v2963_v44  ;;  %v2819_v44 = vadd.f32 %v5546_v56, %v5554_v60 }
0x16e5   :  { %4438 = vmatprep.subr.bf16.mxu1 %v4573_v50 }
0x16e6   :  { %v2942_v48 = vmul.f32 1.442695, %v2937_v34 }
0x16e7   :  { %v3010_v0 = vpop.permute.xlu1 %3009 }
0x16e8   :  { %4721 = vpow2.f32 %v2942_v48  ;;  %4433 = vmatpush3.bf16.msra.mxu0 %v3010_v0 }
0x16e9   :  { %4444 = vmatprep.subr.bf16.mxu0 %v4794_v46 }
0x16eb   :  { %4435 = vmatmul.mubr.msk.bf16.vlgmr.msra.gmra.mxu0 %vm431_vm2, %v2961_v37 }
0x16ec   :  { %4446 = vmatprep.mubr.msk.bf16.mxu0 %vm4795_vm1, %v4794_v46 }
0x16f1   :  { %v4720_v38 = vpop.eup %4719 }
0x16f2   :  { %v2948_v4 = vsel %vm431_vm2, %v4720_v38, 0.0 }
0x16f3   :  { %2949 = vadd.xlane.f32.xlu1 %v2948_v4 }
0x16f5   :  { %v4722_v39 = vpop.eup %4721 }
0x16f6   :  { %v2951_v42 = vsel %vm431_vm2, %v4722_v39, 0.0  ;;  %v2960_v29 = vpack.c.bf16 %v4722_v39, %v4720_v38 }
0x16f7   :  { %2952 = vadd.xlane.f32.xlu0 %v2951_v42 }
0x16f8   :  { %4429 = vmatmul.mubr.msk.bf16.vlgmr.msra.gmra.mxu1 %vm431_vm2, %v2960_v29 }
0x16f9   :  { %4439 = vmatpush3.bf16.msra.mxu1 %v4573_v50 }
0x16fa   :  { %4450 = vmatprep.subr.bf16.mxu1 %v4794_v46 }
0x1704   :  { %3187 = vrot.lane.b32.xlu1 %v5428_v45, %s4801_s28 }
0x1708   :  { %3134 = vrot.lane.b32.xlu1 %v5422_v21, %s5769_s23 }
0x170c   :  { %3185 = vrot.lane.b32.xlu1 %v5428_v45, %s5769_s23 }
0x170d   :  { %3136 = vrot.lane.b32.xlu0 %v5422_v21, %s4801_s28 }
0x1755   :  { %v2956_v27 = vpop.xlane.xlu0 %2955 }
0x1759   :  { %v2959_v51 = vpop.xlane.xlu1 %2958 }
0x175a   :  { %4723 = vrcp.f32 %v2959_v51 }
0x1767   :  { %v4724_v9 = vpop.eup %4723 }
0x177c   :  { %v2950_v8 = vpop.xlane.xlu1 %2949 }
0x177d   :  { %4725 = vrcp.f32 %v2950_v8 }
0x1780   :  { %v2953_v40 = vpop.xlane.xlu0 %2952  ;;  %v3188_v6 = vpop.permute.xlu1 %3187 }
0x1781   :  { %4727 = vrcp.f32 %v2953_v40  ;;  %v3193_v22 = vsel %vm431_vm2, %v3188_v6, 0 }
0x1782   :  { %4729 = vrcp.f32 %v2956_v27 }
0x1784   :  { %v3137_v32 = vpop.permute.xlu0 %3136  ;;  %v3135_v21 = vpop.permute.xlu1 %3134 }
0x1785   :  { %v3142_v59 = vsel %vm431_vm2, %v3137_v32, 0 }
0x1786   :  { %4445 = vmatpush3.bf16.xpose.msra.mxu0 %v3142_v59 }
0x1787   :  { %4456 = vmatprep.subr.bf16.mxu0 %v4794_v46 }
0x1788   :  { %v3186_v23 = vpop.permute.xlu1 %3185 }
0x178a   :  { %v4726_v12 = vpop.eup %4725 }
0x178d   :  { %4447 = vmatmul.mubr.msk.bf16.vlgmr.msra.gmra.mxu0 %vm431_vm2, %v3135_v21 }
0x178e   :  { %4458 = vmatprep.mubr.msk.bf16.mxu0 %vm4795_vm1, %v4794_v46  ;;  %v4728_v25 = vpop.eup %4727 }
0x178f   :  { %v4730_v2 = vpop.eup %4729 }
0x17ab   :  { %v3049_v45 = vpop.f32.mrf.mxu0 }
0x17ac   :  { %v3062_v16 = vmul.f32 %v4730_v2, %v3049_v45 }
0x17ad   :  { %v4436_v62 = vpop.f32.mrf.mxu0 }
0x17af   :  { %v3052_v52 = vpop.f32.mrf.mxu0 }
0x17b0   :  { %v3063_v13 = vmul.f32 %v4724_v9, %v3052_v52 }
0x17b1   :  { %v4437_v5 = vpop.f32.mrf.mxu0 }
0x17b2   :  { %v3065_v20 = vpack.c.bf16 %v3063_v13, %v3062_v16 }
0x17b8   :  { %v3002_v7 = vpop.f32.mrf.mxu1 }
0x17b9   :  { %v3060_v14 = vmul.f32 %v4726_v12, %v3002_v7  ;;  %v4574_v12 = vld [vmem:[%s5750_s7 + $0x38] sm:$0xff]  }
0x17ba   :  { %v4430_v41 = vpop.f32.mrf.mxu1 }
0x17bc   :  { %v3005_v63 = vpop.f32.mrf.mxu1 }
0x17bd   :  { %v3061_v15 = vmul.f32 %v4728_v25, %v3005_v63 }
0x17be   :  { %v4431_v18 = vpop.f32.mrf.mxu1 }
0x17bf   :  { %v3064_v19 = vpack.c.bf16 %v3061_v15, %v3060_v14 }
0x17c1   :  { %4440 = vmatprep.mubr.msk.bf16.mxu1 %vm431_vm2, %v3064_v19 }
0x17c2   :  { %4441 = vmatmul.mubr.msk.bf16.vlgmr.msra.gmra.mxu1 %vm431_vm2, %v3065_v20 }
0x17c3   :  { %4451 = vmatpush3.bf16.xpose.msra.mxu1 %v3193_v22  ;;  %4452 = vmatprep.mubr.msk.bf16.mxu1 %vm4795_vm1, %v4794_v46 }
0x17c4   :  { %4462 = vmatprep.subr.bf16.mxu1 %v4794_v46 }
0x17ca   :  { %4453 = vmatmul.mubr.msk.bf16.vlgmr.msra.gmra.mxu1 %vm431_vm2, %v3186_v23 }
0x17cb   :  { %4464 = vmatprep.mubr.msk.bf16.mxu1 %vm4795_vm1, %v4794_v46  ;;  %v2808_v46 = vadd.f32 %v5544_v54, %v5552_v36 }
0x184d   :  { %v3178_v26 = vpop.f32.mrf.mxu0 }
0x184e   :  { %v3236_v47 = vsel %vm431_vm2, %v3178_v26, -inf }
0x184f   :  { %3237 = vmax.xlane.f32.xlu0 %v3236_v47  ;;  %v4448_v1 = vpop.f32.mrf.mxu0 }
0x1851   :  { %v3181_v17 = vpop.f32.mrf.mxu0 }
0x1852   :  { %v3239_v30 = vsel %vm431_vm2, %v3181_v17, -inf }
0x1853   :  { %3240 = vmax.xlane.f32.xlu1 %v3239_v30  ;;  %v4449_v28 = vpop.f32.mrf.mxu0 }
0x1864   :  { %3321 = vrot.lane.b32.xlu1 %v5442_v35, %s5769_s23 }
0x1882   :  { %v4442_v33 = vpop.f32.mrf.mxu1 }
0x1883   :  { %v5607_v43 = vadd.f32 %v4442_v33, %v2816_v49 }
0x1884   :  { %v3115_v58 = vpop.f32.mrf.mxu1 }
0x1885   :  { %v5611_v61 = vadd.f32 %v3115_v58, %v2808_v46 }
0x1886   :  { %v4443_v34 = vpop.f32.mrf.mxu1 }
0x1887   :  { %v5613_v48 = vadd.f32 %v4443_v34, %v2819_v44 }
0x1888   :  { %v3118_v0 = vpop.f32.mrf.mxu1 }
0x1889   :  { %v5616_v35 = vadd.f32 %v3118_v0, %v5556_v31 }
0x188a   :  { %v3229_v53 = vpop.f32.mrf.mxu1 }
0x188b   :  { %v3242_v57 = vsel %vm431_vm2, %v3229_v53, -inf }
0x188c   :  { %3243 = vmax.xlane.f32.xlu0 %v3242_v57  ;;  %v4454_v54 = vpop.f32.mrf.mxu1 }
0x188e   :  { %v3232_v36 = vpop.f32.mrf.mxu1 }
0x188f   :  { %v3245_v37 = vsel %vm431_vm2, %v3232_v36, -inf }
0x1890   :  { %3246 = vmax.xlane.f32.xlu0 %v3245_v37  ;;  %v4455_v38 = vpop.f32.mrf.mxu1 }
0x1891   :  { %v4033_v38 = vld [vmem:[%s5751_s8 + $0x1] ss:$0 sm:$0xff] }
0x18a6   :  { %3274 = vrot.lane.b32.xlu0 %v5424_v24, %s5769_s23 }
0x18d8   :  { %v3238_v56 = vpop.xlane.xlu0 %3237 }
0x18d9   :  { %v3248_v60 = vsub.f32 %v3178_v26, %v3238_v56 }
0x18db   :  { %v3252_v4 = vmul.f32 1.442695, %v3248_v60 }
0x18dc   :  { %v3241_v39 = vpop.xlane.xlu1 %3240 }
0x18dd   :  { %4731 = vpow2.f32 %v3252_v4  ;;  %v3249_v31 = vsub.f32 %v3181_v17, %v3241_v39 }
0x18df   :  { %v3254_v42 = vmul.f32 1.442695, %v3249_v31 }
0x18e0   :  { %v3322_v29 = vpop.permute.xlu1 %3321 }
0x18e1   :  { %4733 = vpow2.f32 %v3254_v42  ;;  %4463 = vmatpush3.bf16.msra.mxu1 %v3322_v29 }
0x18ea   :  { %v4732_v50 = vpop.eup %4731 }
0x18eb   :  { %v3260_v27 = vsel %vm431_vm2, %v4732_v50, 0.0 }
0x18ec   :  { %3261 = vadd.xlane.f32.xlu1 %v3260_v27 }
0x18ee   :  { %v4734_v51 = vpop.eup %4733 }
0x18ef   :  { %v3263_v8 = vsel %vm431_vm2, %v4734_v51, 0.0  ;;  %v3272_v62 = vpack.c.bf16 %v4734_v51, %v4732_v50 }
0x18f0   :  { %3264 = vadd.xlane.f32.xlu0 %v3263_v8 }
0x1915   :  { %v3244_v40 = vpop.xlane.xlu0 %3243 }
0x1916   :  { %v3250_v24 = vsub.f32 %v3229_v53, %v3244_v40 }
0x1918   :  { %v3256_v32 = vmul.f32 1.442695, %v3250_v24 }
0x1919   :  { %v3247_v59 = vpop.xlane.xlu0 %3246 }
0x191a   :  { %4735 = vpow2.f32 %v3256_v32  ;;  %v3251_v6 = vsub.f32 %v3232_v36, %v3247_v59 }
0x191c   :  { %v3258_v21 = vmul.f32 1.442695, %v3251_v6 }
0x191d   :  { %v3275_v45 = vpop.permute.xlu0 %3274 }
0x191e   :  { %4737 = vpow2.f32 %v3258_v21  ;;  %4457 = vmatpush3.bf16.msra.mxu0 %v3275_v45 }
0x191f   :  { %4468 = vmatprep.subr.bf16.mxu0 %v4574_v12 }
0x1921   :  { %4459 = vmatmul.mubr.msk.bf16.vlgmr.msra.gmra.mxu0 %vm431_vm2, %v3272_v62 }
0x1922   :  { %4469 = vmatpush3.bf16.msra.mxu0 %v4574_v12  ;;  %v4575_v12 = vld [vmem:[%s5754_s11 + $0x38] sm:$0xff]  }
0x1923   :  { %4474 = vmatprep.subr.bf16.mxu1 %v4575_v12 }
0x1927   :  { %v4736_v52 = vpop.eup %4735 }
0x1928   :  { %v3266_v5 = vsel %vm431_vm2, %v4736_v52, 0.0 }
0x1929   :  { %3267 = vadd.xlane.f32.xlu0 %v3266_v5 }
0x192b   :  { %v4738_v7 = vpop.eup %4737 }
0x192c   :  { %v3269_v9 = vsel %vm431_vm2, %v4738_v7, 0.0  ;;  %v3273_v41 = vpack.c.bf16 %v4738_v7, %v4736_v52 }
0x192d   :  { %3270 = vadd.xlane.f32.xlu1 %v3269_v9 }
0x192e   :  { %4465 = vmatmul.mubr.msk.bf16.vlgmr.msra.gmra.mxu1 %vm431_vm2, %v3273_v41 }
0x192f   :  { %4475 = vmatpush3.bf16.msra.mxu1 %v4575_v12 }
0x1975   :  { %v3262_v25 = vpop.xlane.xlu1 %3261 }
0x1976   :  { %4739 = vrcp.f32 %v3262_v25  ;;  %v4576_v25 = vld [vmem:[%s5754_s11 + $0x30] sm:$0xff]  }
0x1977   :  { %4476 = vmatprep.subr.bf16.mxu1 %v4576_v25 }
0x1978   :  { %4477 = vmatpush3.bf16.msra.mxu1 %v4576_v25 }
0x1979   :  { %v3265_v13 = vpop.xlane.xlu0 %3264 }
0x197a   :  { %4741 = vrcp.f32 %v3265_v13  ;;  %v4577_v13 = vld [vmem:[%s5754_s11 + $0x28] sm:$0xff]  }
0x197b   :  { %4478 = vmatprep.subr.bf16.mxu1 %v4577_v13 }
0x197c   :  { %4479 = vmatpush3.bf16.msra.mxu1 %v4577_v13 }
0x1983   :  { %v4740_v16 = vpop.eup %4739 }
0x1987   :  { %v4742_v18 = vpop.eup %4741 }
0x19b2   :  { %v3268_v63 = vpop.xlane.xlu0 %3267 }
0x19b3   :  { %4743 = vrcp.f32 %v3268_v63  ;;  %v4578_v63 = vld [vmem:[%s5754_s11 + $0x20] sm:$0xff]  }
0x19b4   :  { %4480 = vmatprep.subr.bf16.mxu1 %v4578_v63 }
0x19b5   :  { %4481 = vmatpush3.bf16.msra.mxu1 %v4578_v63 }
0x19b6   :  { %v3271_v14 = vpop.xlane.xlu1 %3270 }
0x19b7   :  { %4745 = vrcp.f32 %v3271_v14 }
0x19c0   :  { %v4744_v17 = vpop.eup %4743 }
0x19c4   :  { %v4746_v30 = vpop.eup %4745 }
0x19e1   :  { %v3314_v2 = vpop.f32.mrf.mxu0 }
0x19e2   :  { %v3372_v20 = vmul.f32 %v4740_v16, %v3314_v2 }
0x19e3   :  { %v4460_v15 = vpop.f32.mrf.mxu0 }
0x19e5   :  { %v3317_v19 = vpop.f32.mrf.mxu0 }
0x19e6   :  { %v3373_v22 = vmul.f32 %v4742_v18, %v3317_v19 }
0x19e7   :  { %v4461_v23 = vpop.f32.mrf.mxu0 }
0x19e8   :  { %v3376_v26 = vpack.c.bf16 %v3373_v22, %v3372_v20 }
0x19ea   :  { %4470 = vmatprep.mubr.msk.bf16.mxu0 %vm431_vm2, %v3376_v26 }
0x19ee   :  { %v3361_v47 = vpop.f32.mrf.mxu1 }
0x19ef   :  { %v3374_v49 = vmul.f32 %v4744_v17, %v3361_v47 }
0x19f0   :  { %v4466_v1 = vpop.f32.mrf.mxu1 }
0x19f2   :  { %v3364_v28 = vpop.f32.mrf.mxu1 }
0x19f3   :  { %v3375_v33 = vmul.f32 %v4746_v30, %v3364_v28  ;;  %v4036_v28 = vld [vmem:[%s5752_s9 + $0x1] ss:$0 sm:$0xff] }
0x19f4   :  { %v4467_v46 = vpop.f32.mrf.mxu1 }
0x19f5   :  { %v3377_v58 = vpack.c.bf16 %v3375_v33, %v3374_v49 }
0x19f7   :  { %4471 = vmatmul.mubr.msk.bf16.vlgmr.msra.gmra.mxu0 %vm431_vm2, %v3377_v58 }
0x1ab7   :  { %v4472_v44 = vpop.f32.mrf.mxu0 }
0x1ab8   :  { %v3444_v34 = vadd.f32 %v4472_v44, %v5607_v43 }
0x1ab9   :  { %v3427_v0 = vpop.f32.mrf.mxu0 }
0x1aba   :  { %v3442_v53 = vadd.f32 %v3427_v0, %v5611_v61  ;;  %v3448_v54 = vadd.f32 %v3444_v34, %v5355_v3  ;;  %v4037_v34 = vld [vmem:[%s5753_s10 + $0x1] ss:$0 sm:$0xff] }
0x1abb   :  { %v4473_v57 = vpop.f32.mrf.mxu0 }
0x1abc   :  { %v3446_v36 = vadd.f32 %v3442_v53, %v5352_v55  ;;  %v3445_v37 = vadd.f32 %v4473_v57, %v5613_v48  ;;  %v5644_v43 = vadd.f32 %v4033_v38, %v3448_v54 }
0x1abd   :  { %v3430_v56 = vpop.f32.mrf.mxu0 }
0x1abe   :  { %v5641_v60 = vadd.f32 %v4033_v38, %v3446_v36  ;;  %v3443_v4 = vadd.f32 %v3430_v56, %v5616_v35  ;;  %v3449_v61 = vadd.f32 %v3445_v37, %v5363_v11  ;;  %v3472_v31 = vsel %vm166_vm0, %v5644_v43, 0.0 }
0x1ac0   :  { %v3447_v39 = vadd.f32 %v3443_v4, %v5360_v10  ;;  %v3466_v55 = vsel %vm166_vm0, %v5641_v60, 0.0  ;;  %v5652_v48 = vadd.f32 %v4033_v38, %v3449_v61 }
0x1ac1   :  { %3467 = vadd.xlane.f32.xlu0 %v3466_v55  ;;  %v4579_v55 = vld [vmem:[%s5756_s13 + $0x78] sm:$0xff]  }
0x1ac2   :  { %v5650_v3 = vadd.f32 %v4033_v38, %v3447_v39  ;;  %v3475_v11 = vsel %vm166_vm0, %v5652_v48, 0.0  ;;  %4486 = vmatprep.subr.bf16.mxu0 %v4579_v55 }
0x1ac3   :  { %4487 = vmatpush3.bf16.msra.mxu0 %v4579_v55 }
0x1ac4   :  { %v3469_v35 = vsel %vm166_vm0, %v5650_v3, 0.0 }
0x1ac5   :  { %3473 = vadd.xlane.f32.xlu0 %v3472_v31  ;;  %3470 = vadd.xlane.f32.xlu1 %v3469_v35  ;;  %v4580_v31 = vld [vmem:[%s5756_s13 + $0x70] sm:$0xff]   ;;  %v4581_v35 = vld [vmem:[%s5756_s13 + $0x68] sm:$0xff]  }
0x1ac6   :  { %4488 = vmatprep.subr.bf16.mxu0 %v4580_v31 }
0x1ac7   :  { %4489 = vmatpush3.bf16.msra.mxu0 %v4580_v31 }
0x1ac8   :  { %4490 = vmatprep.subr.bf16.mxu0 %v4581_v35 }
0x1ac9   :  { %3476 = vadd.xlane.f32.xlu1 %v3475_v11  ;;  %v4582_v11 = vld [vmem:[%s5756_s13 + $0x60] sm:$0xff]  }
0x1acb   :  { %4491 = vmatpush3.bf16.msra.mxu0 %v4581_v35 }
0x1acc   :  { %4492 = vmatprep.subr.bf16.mxu0 %v4582_v11 }
0x1acf   :  { %4493 = vmatpush3.bf16.msra.mxu0 %v4582_v11 }
0x1b4a   :  { %v3468_v10 = vpop.xlane.xlu0 %3467 }
0x1b4b   :  { %v3478_v42 = vmul.f32 0.015625, %v3468_v10  ;;  %v4583_v10 = vld [vmem:[%s5756_s13 + $0x58] sm:$0xff]  }
0x1b4c   :  { %4494 = vmatprep.subr.bf16.mxu0 %v4583_v10 }
0x1b4d   :  { %v3482_v29 = vsub.f32 %v5641_v60, %v3478_v42  ;;  %v4584_v42 = vld [vmem:[%s5756_s13 + $0x50] sm:$0xff]   ;;  %4495 = vmatpush3.bf16.msra.mxu0 %v4583_v10 }
0x1b4e   :  { %v3474_v50 = vpop.xlane.xlu0 %3473  ;;  %v3471_v27 = vpop.xlane.xlu1 %3470  ;;  %4496 = vmatprep.subr.bf16.mxu0 %v4584_v42 }
0x1b4f   :  { %v3480_v51 = vmul.f32 0.015625, %v3474_v50  ;;  %v3479_v8 = vmul.f32 0.015625, %v3471_v27  ;;  %v3486_v40 = vmul.f32 %v3482_v29, %v3482_v29  ;;  %v4586_v50 = vld [vmem:[%s5756_s13 + $0x40] sm:$0xff]  }
0x1b50   :  { %v4047_v27 = vld [vmem:[%s5755_s12 + $0x1] ss:$0 sm:$0xff] }
0x1b51   :  { %v3484_v24 = vsub.f32 %v5644_v43, %v3480_v51  ;;  %v3483_v32 = vsub.f32 %v5650_v3, %v3479_v8  ;;  %v3490_v59 = vsel %vm166_vm0, %v3486_v40, 0.0  ;;  %4497 = vmatpush3.bf16.msra.mxu0 %v4584_v42 }
0x1b52   :  { %3491 = vadd.xlane.f32.xlu0 %v3490_v59  ;;  %v3477_v6 = vpop.xlane.xlu1 %3476 }
0x1b53   :  { %v3481_v21 = vmul.f32 0.015625, %v3477_v6  ;;  %v3488_v45 = vmul.f32 %v3484_v24, %v3484_v24  ;;  %v3487_v62 = vmul.f32 %v3483_v32, %v3483_v32 }
0x1b55   :  { %v3485_v52 = vsub.f32 %v5652_v48, %v3481_v21  ;;  %v3496_v5 = vsel %vm166_vm0, %v3488_v45, 0.0  ;;  %v3493_v7 = vsel %vm166_vm0, %v3487_v62, 0.0 }
0x1b56   :  { %3497 = vadd.xlane.f32.xlu0 %v3496_v5  ;;  %3494 = vadd.xlane.f32.xlu1 %v3493_v7 }
0x1b57   :  { %v3489_v9 = vmul.f32 %v3485_v52, %v3485_v52 }
0x1b59   :  { %v3499_v41 = vsel %vm166_vm0, %v3489_v9, 0.0 }
0x1b5a   :  { %3500 = vadd.xlane.f32.xlu1 %v3499_v41 }
0x1bdb   :  { %v3492_v2 = vpop.xlane.xlu0 %3491 }
0x1bdc   :  { %v3502_v14 = vmul.f32 0.015625, %v3492_v2 }
0x1bde   :  { %v3506_v15 = vadd.f32 1e-06, %v3502_v14 }
0x1bdf   :  { %v3498_v16 = vpop.xlane.xlu0 %3497  ;;  %v3495_v18 = vpop.xlane.xlu1 %3494 }
0x1be0   :  { %4747 = vrsqrt.f32 %v3506_v15  ;;  %v3504_v19 = vmul.f32 0.015625, %v3498_v16  ;;  %v3503_v20 = vmul.f32 0.015625, %v3495_v18 }
0x1be2   :  { %v3508_v22 = vadd.f32 1e-06, %v3504_v19  ;;  %v3507_v23 = vadd.f32 1e-06, %v3503_v20 }
0x1be3   :  { %v3501_v26 = vpop.xlane.xlu1 %3500 }
0x1be4   :  { %4749 = vrsqrt.f32 %v3508_v22  ;;  %v3505_v47 = vmul.f32 0.015625, %v3501_v26 }
0x1be5   :  { %4751 = vrsqrt.f32 %v3507_v23 }
0x1be6   :  { %v3509_v1 = vadd.f32 1e-06, %v3505_v47 }
0x1be8   :  { %4753 = vrsqrt.f32 %v3509_v1 }
0x1bed   :  { %v4748_v17 = vpop.eup %4747 }
0x1bee   :  { %v3514_v30 = vmul.f32 %v4748_v17, %v3482_v29  ;;  %v4585_v29 = vld [vmem:[%s5756_s13 + $0x48] sm:$0xff]  }
0x1bef   :  { %4498 = vmatprep.subr.bf16.mxu0 %v4585_v29 }
0x1bf0   :  { %v3524_v44 = vmul.f32 %v4036_v28, %v3514_v30  ;;  %4499 = vmatpush3.bf16.msra.mxu0 %v4585_v29 }
0x1bf1   :  { %v4750_v49 = vpop.eup %4749  ;;  %4500 = vmatprep.subr.bf16.mxu0 %v4586_v50 }
0x1bf2   :  { %v4752_v33 = vpop.eup %4751  ;;  %v3516_v46 = vmul.f32 %v4750_v49, %v3484_v24  ;;  %v3534_v36 = vadd.f32 %v4037_v34, %v3524_v44 }
0x1bf3   :  { %v3515_v58 = vmul.f32 %v4752_v33, %v3483_v32 }
0x1bf4   :  { %v3526_v54 = vmul.f32 %v4036_v28, %v3516_v46  ;;  %4501 = vmatpush3.bf16.msra.mxu0 %v4586_v50 }
0x1bf5   :  { %v4754_v0 = vpop.eup %4753  ;;  %v3525_v53 = vmul.f32 %v4036_v28, %v3515_v58 }
0x1bf6   :  { %v3517_v57 = vmul.f32 %v4754_v0, %v3485_v52  ;;  %v3536_v4 = vadd.f32 %v4037_v34, %v3526_v54 }
0x1bf7   :  { %v3535_v37 = vadd.f32 %v4037_v34, %v3525_v53 }
0x1bf8   :  { %v3527_v38 = vmul.f32 %v4036_v28, %v3517_v57 }
0x1bf9   :  { %v3538_v56 = vpack.c.bf16 %v3535_v37, %v3534_v36 }
0x1bfa   :  { %v3537_v61 = vadd.f32 %v4037_v34, %v3527_v38 }
0x1bfb   :  { %4482 = vmatprep.mubr.msk.bf16.mxu1 %vm166_vm0, %v3538_v56  ;;  %v4071_v56 = vld [vmem:[%s5757_s14 + $0x1] ss:$0 sm:$0xff] }
0x1bfc   :  { %v3539_v39 = vpack.c.bf16 %v3537_v61, %v3536_v4 }
0x1bfe   :  { %4483 = vmatmul.mubr.msk.bf16.vlgmr.msra.gmra.mxu1 %vm166_vm0, %v3539_v39 }
0x1cbe   :  { %v4484_v51 = vpop.f32.mrf.mxu1 }
0x1cbf   :  { %v3630_v8 = vadd.f32 %v4484_v51, %v4047_v27 }
0x1cc0   :  { %v3621_v40 = vpop.f32.mrf.mxu1 }
0x1cc1   :  { %v3642_v24 = vmul.f32 0.044715, %v3630_v8  ;;  %v3622_v32 = vadd.f32 %v4047_v27, %v3621_v40  ;;  %v3638_v34 = vmul.f32 0.5, %v3630_v8 }
0x1cc2   :  { %v4485_v59 = vpop.f32.mrf.mxu1 }
0x1cc3   :  { %v3646_v6 = vmul.f32 %v3642_v24, %v3630_v8  ;;  %v3640_v21 = vmul.f32 0.044715, %v3622_v32  ;;  %v3633_v45 = vadd.f32 %v4485_v59, %v4047_v27  ;;  %v3636_v46 = vmul.f32 0.5, %v3622_v32 }
0x1cc4   :  { %v3624_v62 = vpop.f32.mrf.mxu1 }
0x1cc5   :  { %v3650_v52 = vmul.f32 %v3646_v6, %v3630_v8  ;;  %v3644_v5 = vmul.f32 %v3640_v21, %v3622_v32  ;;  %v3643_v7 = vmul.f32 0.044715, %v3633_v45  ;;  %v3625_v9 = vadd.f32 %v4047_v27, %v3624_v62 }
0x1cc6   :  { %v3639_v49 = vmul.f32 0.5, %v3633_v45 }
0x1cc7   :  { %v3654_v41 = vadd.f32 %v3650_v52, %v3630_v8  ;;  %v3648_v12 = vmul.f32 %v3644_v5, %v3622_v32  ;;  %v3647_v25 = vmul.f32 %v3643_v7, %v3633_v45  ;;  %v3641_v13 = vmul.f32 0.044715, %v3625_v9 }
0x1cc8   :  { %v3637_v58 = vmul.f32 0.5, %v3625_v9 }
0x1cc9   :  { %v3651_v63 = vmul.f32 %v3647_v25, %v3633_v45  ;;  %v3645_v2 = vmul.f32 %v3641_v13, %v3625_v9  ;;  %v3652_v14 = vadd.f32 %v3648_v12, %v3622_v32  ;;  %v3658_v15 = vmul.f32 0.7978846, %v3654_v41 }
0x1ccb   :  { %v3655_v16 = vadd.f32 %v3651_v63, %v3633_v45  ;;  %v3649_v18 = vmul.f32 %v3645_v2, %v3625_v9  ;;  %v3656_v19 = vmul.f32 0.7978846, %v3652_v14 }
0x1ccd   :  { %v3659_v20 = vmul.f32 0.7978846, %v3655_v16  ;;  %v3653_v22 = vadd.f32 %v3649_v18, %v3625_v9  ;;  %4755 = vtanh.f32 %v3656_v19 }
0x1cce   :  { %4757 = vtanh.f32 %v3658_v15 }
0x1ccf   :  { %4759 = vtanh.f32 %v3659_v20  ;;  %v3657_v23 = vmul.f32 0.7978846, %v3653_v22 }
0x1cd1   :  { %4761 = vtanh.f32 %v3657_v23 }
0x1cda   :  { %v4756_v26 = vpop.eup %4755 }
0x1cdb   :  { %v4758_v47 = vpop.eup %4757  ;;  %v3664_v17 = vadd.f32 1.0, %v4756_v26 }
0x1cdc   :  { %v4760_v1 = vpop.eup %4759  ;;  %v3666_v33 = vadd.f32 1.0, %v4758_v47 }
0x1cdd   :  { %v3667_v30 = vadd.f32 1.0, %v4760_v1  ;;  %v3668_v53 = vmul.f32 %v3664_v17, %v3636_v46 }
0x1cde   :  { %v4762_v28 = vpop.eup %4761  ;;  %v3670_v54 = vmul.f32 %v3666_v33, %v3638_v34 }
0x1cdf   :  { %v3665_v44 = vadd.f32 1.0, %v4762_v28  ;;  %v3671_v0 = vmul.f32 %v3667_v30, %v3639_v49  ;;  %v4080_v30 = vld [vmem:[%s5758_s15] ss:$0 sm:$0xff]  ;;  %s4803_s15 = smov [#allocation2]  }
0x1ce0   :  { %v4081_v49 = vld [vmem:[%s5759_s16] ss:$0 sm:$0xff]  ;;  %s3883_s11 = sshll.u32 %s4803_s15, 4  ;;  %s3884_s11 = int_to_ptr.vmem [resolvable:$true] %s3883_s11 }
0x1ce1   :  { %v3669_v57 = vmul.f32 %v3665_v44, %v3637_v58  ;;  %v3673_v37 = vpack.c.bf16 %v3671_v0, %v3670_v54  ;;  %s4771_s16 = scalar_lea.vmem %s3884_s11, 512  ;;  %p4776_p1 = scmp.lt.s32.totalorder %s3884_s11, %s3884_s11 }
0x1ce2   :  { %p4772_p0 = scmp.ne.s32.totalorder %s3884_s11, %s4771_s16  ;;  %p4777_p2 = scmp.lt.s32.totalorder %s4771_s16, %s4771_s16 }
0x1ce3   :  { %v3672_v36 = vpack.c.bf16 %v3669_v57, %v3668_v53 }
0x1ce4   :  { %p4778_p3 = por %p4777_p2, %p4776_p1 }
0x1ce5   :  { %4502 = vmatprep.mubr.bf16.mxu0 %v3672_v36 }
0x1ce6   :  { %4503 = vmatmul.mubr.bf16.vlgmr.msra.gmra.mxu0 %v3673_v37  ;;  %p4779_p4 = pnand %p4778_p3, %p4772_p0 }
0x1da6   :  { %v4504_v38 = vpop.f32.mrf.mxu0 }
0x1da7   :  { %v3790_v61 = vadd.f32 %v4504_v38, %v4071_v56 }
0x1da8   :  { %v3781_v4 = vpop.f32.mrf.mxu0 }
0x1da9   :  { %v3782_v39 = vadd.f32 %v4071_v56, %v3781_v4  ;;  %v3798_v11 = vadd.f32 %v3790_v61, %v5644_v43 }
0x1daa   :  { %v4505_v55 = vpop.f32.mrf.mxu0 }
0x1dab   :  { %v3796_v31 = vadd.f32 %v3782_v39, %v5641_v60  ;;  %v3793_v10 = vadd.f32 %v4505_v55, %v4071_v56  ;;  %v3808_v8 = vsel %vm166_vm0, %v3798_v11, 0.0 }
0x1dac   :  { %v3784_v35 = vpop.f32.mrf.mxu0 }
0x1dad   :  { %v3785_v42 = vadd.f32 %v4071_v56, %v3784_v35  ;;  %v3802_v29 = vsel %vm166_vm0, %v3796_v31, 0.0  ;;  %v3799_v27 = vadd.f32 %v3793_v10, %v5652_v48 }
0x1dae   :  { %3803 = vadd.xlane.f32.xlu0 %v3802_v29 }
0x1daf   :  { %v3797_v50 = vadd.f32 %v3785_v42, %v5650_v3  ;;  %v3811_v60 = vsel %vm166_vm0, %v3799_v27, 0.0 }
0x1db1   :  { %v3805_v51 = vsel %vm166_vm0, %v3797_v50, 0.0 }
0x1db2   :  { %3806 = vadd.xlane.f32.xlu1 %v3805_v51  ;;  %3809 = vadd.xlane.f32.xlu0 %v3808_v8 }
0x1db6   :  { %3812 = vadd.xlane.f32.xlu1 %v3811_v60 }
0x1e37   :  { %v3804_v40 = vpop.xlane.xlu0 %3803 }
0x1e38   :  { %v3814_v43 = vmul.f32 0.015625, %v3804_v40 }
0x1e3a   :  { %v3818_v24 = vsub.f32 %v3796_v31, %v3814_v43 }
0x1e3b   :  { %v3807_v32 = vpop.xlane.xlu1 %3806  ;;  %v3810_v59 = vpop.xlane.xlu0 %3809 }
0x1e3c   :  { %v3815_v6 = vmul.f32 0.015625, %v3807_v32  ;;  %v3816_v21 = vmul.f32 0.015625, %v3810_v59  ;;  %v3822_v45 = vmul.f32 %v3818_v24, %v3818_v24 }
0x1e3e   :  { %v3819_v3 = vsub.f32 %v3797_v50, %v3815_v6  ;;  %v3820_v62 = vsub.f32 %v3798_v11, %v3816_v21  ;;  %v3826_v48 = vsel %vm166_vm0, %v3822_v45, 0.0 }
0x1e3f   :  { %v3813_v52 = vpop.xlane.xlu1 %3812  ;;  %3827 = vadd.xlane.f32.xlu0 %v3826_v48 }
0x1e40   :  { %v3817_v5 = vmul.f32 0.015625, %v3813_v52  ;;  %v3823_v7 = vmul.f32 %v3819_v3, %v3819_v3  ;;  %v3824_v9 = vmul.f32 %v3820_v62, %v3820_v62 }
0x1e42   :  { %v3821_v41 = vsub.f32 %v3799_v27, %v3817_v5  ;;  %v3829_v12 = vsel %vm166_vm0, %v3823_v7, 0.0  ;;  %v3832_v25 = vsel %vm166_vm0, %v3824_v9, 0.0 }
0x1e43   :  { %3830 = vadd.xlane.f32.xlu1 %v3829_v12  ;;  %3833 = vadd.xlane.f32.xlu0 %v3832_v25 }
0x1e44   :  { %v3825_v13 = vmul.f32 %v3821_v41, %v3821_v41 }
0x1e46   :  { %v3835_v63 = vsel %vm166_vm0, %v3825_v13, 0.0 }
0x1e47   :  { %3836 = vadd.xlane.f32.xlu1 %v3835_v63 }
0x1ec8   :  { %v3828_v2 = vpop.xlane.xlu0 %3827 }
0x1ec9   :  { %v3838_v14 = vmul.f32 0.015625, %v3828_v2 }
0x1ecb   :  { %v3842_v15 = vadd.f32 1e-06, %v3838_v14 }
0x1ecc   :  { %v3831_v16 = vpop.xlane.xlu1 %3830  ;;  %v3834_v18 = vpop.xlane.xlu0 %3833 }
0x1ecd   :  { %4763 = vrsqrt.f32 %v3842_v15  ;;  %v3839_v19 = vmul.f32 0.015625, %v3831_v16  ;;  %v3840_v20 = vmul.f32 0.015625, %v3834_v18 }
0x1ecf   :  { %v3843_v22 = vadd.f32 1e-06, %v3839_v19  ;;  %v3844_v23 = vadd.f32 1e-06, %v3840_v20 }
0x1ed0   :  { %v3837_v26 = vpop.xlane.xlu1 %3836 }
0x1ed1   :  { %4765 = vrsqrt.f32 %v3843_v22  ;;  %v3841_v47 = vmul.f32 0.015625, %v3837_v26 }
0x1ed2   :  { %4767 = vrsqrt.f32 %v3844_v23 }
0x1ed3   :  { %v3845_v1 = vadd.f32 1e-06, %v3841_v47 }
0x1ed5   :  { %4769 = vrsqrt.f32 %v3845_v1 }
0x1eda   :  { %v4764_v17 = vpop.eup %4763 }
0x1edb   :  { %v3850_v28 = vmul.f32 %v4764_v17, %v3818_v24 }
0x1edd   :  { %v3860_v33 = vmul.f32 %v4080_v30, %v3850_v28 }
0x1ede   :  { %v4766_v46 = vpop.eup %4765 }
0x1edf   :  { %v4768_v58 = vpop.eup %4767  ;;  %v3851_v44 = vmul.f32 %v4766_v46, %v3819_v3  ;;  %v3870_v34 = vadd.f32 %v4081_v49, %v3860_v33 }
0x1ee0   :  { %v3852_v0 = vmul.f32 %v4768_v58, %v3820_v62 }
0x1ee1   :  { %v3861_v53 = vmul.f32 %v4080_v30, %v3851_v44  ;;  %3874 = vst.msk [vmem:[#allocation2] sm:$0xff] %vm166_vm0, %v3870_v34 }
0x1ee2   :  { %v4770_v57 = vpop.eup %4769  ;;  %v3862_v54 = vmul.f32 %v4080_v30, %v3852_v0 }
0x1ee3   :  { %v3853_v36 = vmul.f32 %v4770_v57, %v3821_v41  ;;  %v3871_v37 = vadd.f32 %v4081_v49, %v3861_v53 }
0x1ee4   :  { %v3872_v38 = vadd.f32 %v4081_v49, %v3862_v54 }
0x1ee5   :  { %v3863_v56 = vmul.f32 %v4080_v30, %v3853_v36  ;;  %3875 = vst.msk [vmem:[#allocation2 + $0x8] sm:$0xff] %vm166_vm0, %v3871_v37 }
0x1ee6   :  { %3876 = vst.msk [vmem:[#allocation2 + $0x10] sm:$0xff] %vm166_vm0, %v3872_v38 }
0x1ee7   :  { %v3873_v4 = vadd.f32 %v4081_v49, %v3863_v56 }
0x1ee9   :  { %3877 = vst.msk [vmem:[#allocation2 + $0x18] sm:$0xff] %vm166_vm0, %v3873_v4 }
0x1eea   :  { %4782 = shalt.err (!%p4779_p4)
}
0x1eeb   :  { %s4804_s20 = smov 128   ;;  %s4805_s3 = smov 8  }
0x1eec   :  { %3889 = dma.vmem_to_hbm [thread:$0]  %s3884_s11, 512, %s5760_s17, [#allocation3], %s4804_s20, %s4804_s20, %s4805_s3  }
0x1eed   :  { %4791 = dma.done.wait [#allocation3], 512  }
0x1eee   :  { %4792 = vsyncadd [#allocation3], 4294966784 }
0x1eef   :  { %3893 = vsyncpa [#allocation3], 1 }

</bundles_post_ra>
